<compile_context>
chip_gen: v5e
topology: v5e:2x2
jax: 0.10.0
libtpu: 0.0.40
codegen_flags: <defaults>
</compile_context>

<pallas_src>
import jax
import jax.numpy as jnp
import numpy as np
from jax.experimental import pallas as pl
from jax.experimental.pallas import tpu as pltpu

# ---- synthetic stand-ins for the original `config` module ----------------
LSTMS_NUM = 2          # two LSTM cells in the stack
L2_NUM = 1             # one Linear+ReLU in linear_afterx / linear_aftert
ADJ_MASK = -1          # adj entries equal to N_EDGES + ADJ_MASK -> -inf logit
USE_TGRAPH = False

# ---- model dims (small, structure-consistent with the module) ------------
Z_DIM, T_DIM, TE_DIM, XE_DIM, H_DIM, O_DIM = 8, 12, 16, 32, 32, 16
N_EDGES, ADJ_W, EP_DIM = 32, 8, 4
B, L = 4, 6

D_IN0 = Z_DIM + XE_DIM + TE_DIM + EP_DIM     # LSTM-0 input width
D_ATT = 2 * TE_DIM                           # linear_aftert input width
D_MK = XE_DIM + TE_DIM + EP_DIM              # mlp_meta_{x,t} input width


def _gate_update(gates, c):
    """LSTM gate nonlinearity: (i, f, g, o) lane-chunks of `gates`."""
    hd = H_DIM
    i = jax.nn.sigmoid(gates[:, 0 * hd:1 * hd])
    f = jax.nn.sigmoid(gates[:, 1 * hd:2 * hd])
    g = jnp.tanh(gates[:, 2 * hd:3 * hd])
    o = jax.nn.sigmoid(gates[:, 3 * hd:4 * hd])
    c_new = f * c + i * g
    h_new = o * jnp.tanh(c_new)
    return h_new, c_new


# ---------------------------- Pallas kernel -------------------------------
def mtnet_fused_kernel(xin_ref, attin_ref, mk_ref, mask_ref,
                       wih0_ref, whh0_ref, b0_ref,
                       wih1_ref, whh1_ref, b1_ref,
                       wax_ref, bax_ref, wat_ref, bat_ref,
                       wmx_ref, bmx_ref, wmt_ref, bmt_ref,
                       out_ref, h1_scr):
    LB = L * B

    # ============ recurrence-independent prologue (batched) ================
    # LSTM-0 input projection for all L steps in one big-row matmul, kept as a
    # value (no VMEM scratch; per-step consumption is a static vreg slice).
    xg = (jnp.dot(xin_ref[...], wih0_ref[...],
                  preferred_element_type=jnp.float32) + b0_ref[...])   # (LB,4H)

    # ===================== sequential recurrence ============================
    whh0 = whh0_ref[...]
    wih1 = wih1_ref[...]
    whh1 = whh1_ref[...]
    b1v = b1_ref[...]

    h0 = jnp.zeros((B, H_DIM), jnp.float32)
    c0 = jnp.zeros((B, H_DIM), jnp.float32)
    h1 = jnp.zeros((B, H_DIM), jnp.float32)
    c1 = jnp.zeros((B, H_DIM), jnp.float32)

    # L is a small static constant -> fully unrolled; all slice starts static.
    # The loop body contains ONLY the two LSTM cells; the afterx / meta /
    # log_softmax epilogue is batched after the loop.
    for t in range(L):
        # -- LSTM cell 0: x-projection precomputed; only h0 @ Whh0 remains.
        gates0 = xg[t * B:(t + 1) * B, :] + jnp.dot(
            h0, whh0, preferred_element_type=jnp.float32)
        h0, c0 = _gate_update(gates0, c0)

        # -- LSTM cell 1: split matmuls (h1_old @ Whh1 has no dependence on
        #    this step's LSTM-0 output, so the scheduler can overlap it).
        gates1 = (jnp.dot(h0, wih1, preferred_element_type=jnp.float32)
                  + jnp.dot(h1, whh1, preferred_element_type=jnp.float32)
                  + b1v)
        h1, c1 = _gate_update(gates1, c1)

        # stash the top hidden state for the batched epilogue
        h1_scr[pl.ds(t * B, B), :] = h1

    # ====================== batched epilogue ================================
    h1_all = h1_scr[...]                                            # (LB, H)

    # linear_afterx (Linear+ReLU) on all steps at once.
    afterx = jnp.maximum(
        jnp.dot(h1_all, wax_ref[...],
                preferred_element_type=jnp.float32) + bax_ref[...], 0.0)

    # mlp_meta_x -> softmax_w, per-adjacency dot, mask, log_softmax (batched).
    sw = (jnp.dot(mk_ref[...], wmx_ref[...],
                  preferred_element_type=jnp.float32) + bmx_ref[...])
    px = jnp.sum(afterx[:, None, :] * sw.reshape(LB, ADJ_W, O_DIM),
                 axis=-1)                                           # (LB, A)
    px = jnp.where(mask_ref[...] > 0.5, -jnp.inf, px)
    m = jnp.max(px, axis=-1, keepdims=True)
    lse = jnp.log(jnp.sum(jnp.exp(px - m), axis=-1, keepdims=True)) + m
    px = px - lse
    # NOTE: if a row is fully masked this produces NaN, matching the
    # reference semantics (log_softmax of all -inf).

    # linear_aftert + mlp_meta_t -> sigmoid head (fully LSTM-independent).
    aftert = jnp.maximum(
        jnp.dot(attin_ref[...], wat_ref[...],
                preferred_element_type=jnp.float32) + bat_ref[...], 0.0)
    gw = (jnp.dot(mk_ref[...], wmt_ref[...],
                  preferred_element_type=jnp.float32) + bmt_ref[...])
    pt = jnp.sum(aftert.reshape(LB, ADJ_W, O_DIM)
                 * gw.reshape(LB, ADJ_W, O_DIM), axis=-1)           # (LB, A)
    pt = jax.nn.sigmoid(pt)

    # single output slab, written once (one writeback DMA).
    out_ref[:, 0:ADJ_W] = px
    out_ref[:, ADJ_W:2 * ADJ_W] = pt


def mtnet_pallas(xin_flat, attin_flat, mk_flat, mask_flat, params):
    LB = xin_flat.shape[0]

    inputs = [xin_flat, attin_flat, mk_flat, mask_flat,
              params["wih0"], params["whh0"], params["b0"],
              params["wih1"], params["whh1"], params["b1"],
              params["wax"], params["bax"], params["wat"], params["bat"],
              params["wmx"], params["bmx"], params["wmt"], params["bmt"]]

    def full_spec(arr):
        nd = arr.ndim
        return pl.BlockSpec(arr.shape, lambda i, _nd=nd: (0,) * _nd)

    grid_spec = pltpu.PrefetchScalarGridSpec(
        num_scalar_prefetch=0,
        grid=(1,),                        # single invocation; loop over L inside
        in_specs=[full_spec(a) for a in inputs],
        out_specs=pl.BlockSpec((LB, 2 * ADJ_W), lambda i: (0, 0)),
        scratch_shapes=[
            pltpu.VMEM((LB, H_DIM), jnp.float32),   # per-step h1 slab
        ],
    )
    out_shape = jax.ShapeDtypeStruct((LB, 2 * ADJ_W), jnp.float32)
    fn = pl.pallas_call(
        mtnet_fused_kernel,
        out_shape=out_shape,
        grid_spec=grid_spec,
        compiler_params=pltpu.CompilerParams(
            dimension_semantics=("arbitrary",)),   # recurrence => sequential
    )
    out = fn(*inputs)
    return out[:, :ADJ_W], out[:, ADJ_W:]


# ------------------------------ JAX glue -----------------------------------
def build_step_inputs(x, dpt, zt, tables):
    """Embedding gathers + concatenation (glue), pre-flattened for the kernel."""
    x_emb_t, t_emb_t, tcost_emb_t, eprop_t, adj = tables
    xt = x.T                      # (L, B)
    dptslot = dpt.T               # (L, B)
    Lh, Bh = xt.shape

    xt_emb = x_emb_t[xt]                            # (L, B, XE)
    tt_emb = t_emb_t[dptslot]                       # (L, B, TE)
    xt_ep = eprop_t[xt]                             # (L, B, EP)
    xin = jnp.concatenate([zt, xt_emb, tt_emb, xt_ep], axis=-1)

    adjs = adj[xt]                                  # (L, B, A)
    tt_exp = jnp.broadcast_to(tt_emb[:, :, None, :], (Lh, Bh, ADJ_W, TE_DIM))
    attin = jnp.concatenate([tcost_emb_t[adjs], tt_exp], axis=-1)
    mk = jnp.concatenate([x_emb_t[adjs], tt_exp, eprop_t[adjs]], axis=-1)
    mask = (adjs == (N_EDGES + ADJ_MASK)).astype(jnp.float32)

    return (xin.reshape(Lh * Bh, D_IN0),
            attin.reshape(Lh * Bh * ADJ_W, D_ATT),
            mk.reshape(Lh * Bh * ADJ_W, D_MK),
            mask.reshape(Lh * Bh, ADJ_W))


@jax.jit
def model_forward(x, dpt, zt, tables, params):
    xin_flat, attin_flat, mk_flat, mask_flat = build_step_inputs(x, dpt, zt, tables)
    predx, predt = mtnet_pallas(xin_flat, attin_flat, mk_flat, mask_flat, params)
    # (L*B, A) -> (L, B, A) -> (B, L, A) -> (B*L, A)
    # (matches torch.stack(pred, 1).view(-1, adj.size(1)))
    predx = predx.reshape(L, B, ADJ_W).transpose(1, 0, 2).reshape(-1, ADJ_W)
    predt = predt.reshape(L, B, ADJ_W).transpose(1, 0, 2).reshape(-1, ADJ_W)
    return predx, predt


# ------------------------- pure-JAX reference ------------------------------
def ref_forward(xin_flat, attin_flat, mk_flat, mask_flat, params):
    xin = xin_flat.reshape(L, B, D_IN0)
    attin = attin_flat.reshape(L, B * ADJ_W, D_ATT)
    mk = mk_flat.reshape(L, B * ADJ_W, D_MK)
    mask = mask_flat.reshape(L, B, ADJ_W)
    h0 = jnp.zeros((B, H_DIM), jnp.float32)
    c0 = jnp.zeros_like(h0)
    h1 = jnp.zeros((B, H_DIM), jnp.float32)
    c1 = jnp.zeros_like(h1)
    px, pt = [], []
    for i in range(L):
        g0 = xin[i] @ params["wih0"] + h0 @ params["whh0"] + params["b0"]
        h0, c0 = _gate_update(g0, c0)
        g1 = h0 @ params["wih1"] + h1 @ params["whh1"] + params["b1"]
        h1, c1 = _gate_update(g1, c1)
        afterx = jax.nn.relu(h1 @ params["wax"] + params["bax"])
        aftert = jax.nn.relu(attin[i] @ params["wat"] + params["bat"]
                             ).reshape(B, ADJ_W, O_DIM)
        sw = (mk[i] @ params["wmx"] + params["bmx"]).reshape(B, ADJ_W, O_DIM)
        gw = (mk[i] @ params["wmt"] + params["bmt"]).reshape(B, ADJ_W, O_DIM)
        pred_x = jnp.sum(afterx[:, None, :] * sw, axis=-1)
        pred_x = jnp.where(mask[i] > 0.5, -jnp.inf, pred_x)
        pred_t = jnp.sum(aftert * gw, axis=-1)
        px.append(jax.nn.log_softmax(pred_x, axis=-1))
        pt.append(jax.nn.sigmoid(pred_t))
    px = jnp.stack(px, 1).reshape(-1, ADJ_W)
    pt = jnp.stack(pt, 1).reshape(-1, ADJ_W)
    return px, pt


# --------------------------------- main -------------------------------------
if __name__ == "__main__":
    key = jax.random.PRNGKey(0)
    keys = iter(jax.random.split(key, 32))

    def nrm(shape, scale=0.5):
        return jax.random.normal(next(keys), shape, jnp.float32) * scale

    # buffers / embedding tables (deterministic synthetic init)
    x_emb_t = nrm((N_EDGES, XE_DIM))
    t_emb_t = nrm((T_DIM, TE_DIM))
    tcost_emb_t = nrm((N_EDGES, TE_DIM))
    eprop_t = nrm((N_EDGES, EP_DIM))
    adj = jax.random.randint(next(keys), (N_EDGES, ADJ_W), 0,
                             N_EDGES - 1).astype(jnp.int32)
    adj = adj.at[:, -1].set(N_EDGES + ADJ_MASK)   # padded column -> masked
    tables = (x_emb_t, t_emb_t, tcost_emb_t, eprop_t, adj)

    def lin(in_d, out_d):
        k = 1.0 / np.sqrt(in_d)
        w = jax.random.uniform(next(keys), (in_d, out_d), jnp.float32, -k, k)
        bb = jax.random.uniform(next(keys), (1, out_d), jnp.float32, -k, k)
        return w, bb

    params = {}
    params["wih0"], _ = lin(D_IN0, 4 * H_DIM)
    params["whh0"], params["b0"] = lin(H_DIM, 4 * H_DIM)
    params["wih1"], _ = lin(H_DIM, 4 * H_DIM)
    params["whh1"], params["b1"] = lin(H_DIM, 4 * H_DIM)
    params["wax"], params["bax"] = lin(H_DIM, O_DIM)
    params["wat"], params["bat"] = lin(D_ATT, O_DIM)
    params["wmx"], params["bmx"] = lin(D_MK, O_DIM)
    params["wmt"], params["bmt"] = lin(D_MK, O_DIM)

    # inputs: (B, L) int indices, per-step Gaussian noise z_t
    # (the original module calls torch.randn inside step(); noise is drawn
    #  once here with a JAX PRNG and fed in)
    x = jax.random.randint(next(keys), (B, L), 0, N_EDGES).astype(jnp.int32)
    dpt = jax.random.randint(next(keys), (B, L), 0, T_DIM).astype(jnp.int32)
    zt = jax.random.normal(next(keys), (L, B, Z_DIM), jnp.float32)

    pred_x, pred_t = model_forward(x, dpt, zt, tables, params)
    jax.block_until_ready((pred_x, pred_t))

    # correctness check against a pure-JAX reference
    xin_flat, attin_flat, mk_flat, mask_flat = build_step_inputs(x, dpt, zt, tables)
    ref_x, ref_t = ref_forward(xin_flat, attin_flat, mk_flat, mask_flat, params)

    assert pred_x.shape == (B * L, ADJ_W) and pred_t.shape == (B * L, ADJ_W)
    assert np.allclose(np.asarray(pred_x), np.asarray(ref_x),
                       rtol=1e-2, atol=1e-2)
    assert np.allclose(np.asarray(pred_t), np.asarray(ref_t),
                       rtol=1e-2, atol=1e-2)
    print("KERNEL_OK")
</pallas_src>

<mosaic_0001>
module attributes {stable_mosaic.version = 11 : i64} {
  func.func @mtnet_fused_kernel(%arg0: i32, %arg1: memref<24x60xf32, #tpu.memory_space<vmem>>, %arg2: memref<192x32xf32, #tpu.memory_space<vmem>>, %arg3: memref<192x52xf32, #tpu.memory_space<vmem>>, %arg4: memref<24x8xf32, #tpu.memory_space<vmem>>, %arg5: memref<60x128xf32, #tpu.memory_space<vmem>>, %arg6: memref<32x128xf32, #tpu.memory_space<vmem>>, %arg7: memref<1x128xf32, #tpu.memory_space<vmem>>, %arg8: memref<32x128xf32, #tpu.memory_space<vmem>>, %arg9: memref<32x128xf32, #tpu.memory_space<vmem>>, %arg10: memref<1x128xf32, #tpu.memory_space<vmem>>, %arg11: memref<32x16xf32, #tpu.memory_space<vmem>>, %arg12: memref<1x16xf32, #tpu.memory_space<vmem>>, %arg13: memref<32x16xf32, #tpu.memory_space<vmem>>, %arg14: memref<1x16xf32, #tpu.memory_space<vmem>>, %arg15: memref<52x16xf32, #tpu.memory_space<vmem>>, %arg16: memref<1x16xf32, #tpu.memory_space<vmem>>, %arg17: memref<52x16xf32, #tpu.memory_space<vmem>>, %arg18: memref<1x16xf32, #tpu.memory_space<vmem>>, %arg19: memref<24x16xf32, #tpu.memory_space<vmem>>, %arg20: memref<24x32xf32, #tpu.memory_space<vmem>>) attributes {dimension_semantics = [#tpu.dimension_semantics<arbitrary>], iteration_bounds = array<i64: 1>, scalar_prefetch = 0 : i64, scratch_operands = 1 : i64, tpu.core_type = #tpu.core_type<tc>, window_params = [{pipeline_mode = #tpu.pipeline_mode<synchronous>, transform_indices = @transform_0, window_bounds = array<i64: 24, 60>}, {pipeline_mode = #tpu.pipeline_mode<synchronous>, transform_indices = @transform_1, window_bounds = array<i64: 192, 32>}, {pipeline_mode = #tpu.pipeline_mode<synchronous>, transform_indices = @transform_2, window_bounds = array<i64: 192, 52>}, {pipeline_mode = #tpu.pipeline_mode<synchronous>, transform_indices = @transform_3, window_bounds = array<i64: 24, 8>}, {pipeline_mode = #tpu.pipeline_mode<synchronous>, transform_indices = @transform_4, window_bounds = array<i64: 60, 128>}, {pipeline_mode = #tpu.pipeline_mode<synchronous>, transform_indices = @transform_5, window_bounds = array<i64: 32, 128>}, {pipeline_mode = #tpu.pipeline_mode<synchronous>, transform_indices = @transform_6, window_bounds = array<i64: 1, 128>}, {pipeline_mode = #tpu.pipeline_mode<synchronous>, transform_indices = @transform_7, window_bounds = array<i64: 32, 128>}, {pipeline_mode = #tpu.pipeline_mode<synchronous>, transform_indices = @transform_8, window_bounds = array<i64: 32, 128>}, {pipeline_mode = #tpu.pipeline_mode<synchronous>, transform_indices = @transform_9, window_bounds = array<i64: 1, 128>}, {pipeline_mode = #tpu.pipeline_mode<synchronous>, transform_indices = @transform_10, window_bounds = array<i64: 32, 16>}, {pipeline_mode = #tpu.pipeline_mode<synchronous>, transform_indices = @transform_11, window_bounds = array<i64: 1, 16>}, {pipeline_mode = #tpu.pipeline_mode<synchronous>, transform_indices = @transform_12, window_bounds = array<i64: 32, 16>}, {pipeline_mode = #tpu.pipeline_mode<synchronous>, transform_indices = @transform_13, window_bounds = array<i64: 1, 16>}, {pipeline_mode = #tpu.pipeline_mode<synchronous>, transform_indices = @transform_14, window_bounds = array<i64: 52, 16>}, {pipeline_mode = #tpu.pipeline_mode<synchronous>, transform_indices = @transform_15, window_bounds = array<i64: 1, 16>}, {pipeline_mode = #tpu.pipeline_mode<synchronous>, transform_indices = @transform_16, window_bounds = array<i64: 52, 16>}, {pipeline_mode = #tpu.pipeline_mode<synchronous>, transform_indices = @transform_17, window_bounds = array<i64: 1, 16>}, {pipeline_mode = #tpu.pipeline_mode<synchronous>, transform_indices = @transform_18, window_bounds = array<i64: 24, 16>}]} {
    %c0 = arith.constant 0 : index
    %c0_0 = arith.constant 0 : index
    %0 = vector.load %arg1[%c0, %c0_0] : memref<24x60xf32, #tpu.memory_space<vmem>>, vector<24x60xf32>
    %c0_1 = arith.constant 0 : index
    %c0_2 = arith.constant 0 : index
    %1 = vector.load %arg5[%c0_1, %c0_2] : memref<60x128xf32, #tpu.memory_space<vmem>>, vector<60x128xf32>
    %cst = arith.constant dense<0.000000e+00> : vector<24x128xf32>
    %2 = tpu.matmul %0, %1, %cst {dimension_numbers = #tpu.dot_dimension_numbers<[1], [0], [0], [1], [0, 0, 1, 1], [], []>} : vector<24x60xf32>, vector<60x128xf32>, vector<24x128xf32> -> vector<24x128xf32>
    %c0_3 = arith.constant 0 : index
    %c0_4 = arith.constant 0 : index
    %3 = vector.load %arg7[%c0_3, %c0_4] : memref<1x128xf32, #tpu.memory_space<vmem>>, vector<1x128xf32>
    %4 = vector.broadcast %3 : vector<1x128xf32> to vector<24x128xf32>
    %5 = arith.addf %2, %4 : vector<24x128xf32>
    %c0_5 = arith.constant 0 : index
    %c0_6 = arith.constant 0 : index
    %6 = vector.load %arg6[%c0_5, %c0_6] : memref<32x128xf32, #tpu.memory_space<vmem>>, vector<32x128xf32>
    %c0_7 = arith.constant 0 : index
    %c0_8 = arith.constant 0 : index
    %7 = vector.load %arg8[%c0_7, %c0_8] : memref<32x128xf32, #tpu.memory_space<vmem>>, vector<32x128xf32>
    %c0_9 = arith.constant 0 : index
    %c0_10 = arith.constant 0 : index
    %8 = vector.load %arg9[%c0_9, %c0_10] : memref<32x128xf32, #tpu.memory_space<vmem>>, vector<32x128xf32>
    %c0_11 = arith.constant 0 : index
    %c0_12 = arith.constant 0 : index
    %9 = vector.load %arg10[%c0_11, %c0_12] : memref<1x128xf32, #tpu.memory_space<vmem>>, vector<1x128xf32>
    %cst_13 = arith.constant 0.000000e+00 : f32
    %10 = vector.broadcast %cst_13 : f32 to vector<4x32xf32>
    %cst_14 = arith.constant 0.000000e+00 : f32
    %11 = vector.broadcast %cst_14 : f32 to vector<4x32xf32>
    %cst_15 = arith.constant 0.000000e+00 : f32
    %12 = vector.broadcast %cst_15 : f32 to vector<4x32xf32>
    %cst_16 = arith.constant 0.000000e+00 : f32
    %13 = vector.broadcast %cst_16 : f32 to vector<4x32xf32>
    %14 = vector.extract_strided_slice %5 {offsets = [0, 0], sizes = [4, 128], strides = [1, 1]} : vector<24x128xf32> to vector<4x128xf32>
    %cst_17 = arith.constant dense<0.000000e+00> : vector<4x128xf32>
    %15 = tpu.matmul %10, %6, %cst_17 {dimension_numbers = #tpu.dot_dimension_numbers<[1], [0], [0], [1], [0, 0, 1, 1], [], []>} : vector<4x32xf32>, vector<32x128xf32>, vector<4x128xf32> -> vector<4x128xf32>
    %16 = arith.addf %14, %15 : vector<4x128xf32>
    %17 = vector.extract_strided_slice %16 {offsets = [0, 0], sizes = [4, 32], strides = [1, 1]} : vector<4x128xf32> to vector<4x32xf32>
    %18 = arith.negf %17 : vector<4x32xf32>
    %19 = math.exp %18 : vector<4x32xf32>
    %cst_18 = arith.constant 1.000000e+00 : f32
    %20 = vector.broadcast %cst_18 : f32 to vector<4x32xf32>
    %21 = arith.addf %20, %19 : vector<4x32xf32>
    %22 = arith.divf %20, %21 : vector<4x32xf32>
    %23 = vector.extract_strided_slice %16 {offsets = [0, 32], sizes = [4, 32], strides = [1, 1]} : vector<4x128xf32> to vector<4x32xf32>
    %24 = arith.negf %23 : vector<4x32xf32>
    %25 = math.exp %24 : vector<4x32xf32>
    %cst_19 = arith.constant 1.000000e+00 : f32
    %26 = vector.broadcast %cst_19 : f32 to vector<4x32xf32>
    %27 = arith.addf %26, %25 : vector<4x32xf32>
    %28 = arith.divf %26, %27 : vector<4x32xf32>
    %29 = vector.extract_strided_slice %16 {offsets = [0, 64], sizes = [4, 32], strides = [1, 1]} : vector<4x128xf32> to vector<4x32xf32>
    %30 = math.tanh %29 : vector<4x32xf32>
    %31 = vector.extract_strided_slice %16 {offsets = [0, 96], sizes = [4, 32], strides = [1, 1]} : vector<4x128xf32> to vector<4x32xf32>
    %32 = arith.negf %31 : vector<4x32xf32>
    %33 = math.exp %32 : vector<4x32xf32>
    %cst_20 = arith.constant 1.000000e+00 : f32
    %34 = vector.broadcast %cst_20 : f32 to vector<4x32xf32>
    %35 = arith.addf %34, %33 : vector<4x32xf32>
    %36 = arith.divf %34, %35 : vector<4x32xf32>
    %37 = arith.mulf %28, %11 : vector<4x32xf32>
    %38 = arith.mulf %22, %30 : vector<4x32xf32>
    %39 = arith.addf %37, %38 : vector<4x32xf32>
    %40 = math.tanh %39 : vector<4x32xf32>
    %41 = arith.mulf %36, %40 : vector<4x32xf32>
    %cst_21 = arith.constant dense<0.000000e+00> : vector<4x128xf32>
    %42 = tpu.matmul %41, %7, %cst_21 {dimension_numbers = #tpu.dot_dimension_numbers<[1], [0], [0], [1], [0, 0, 1, 1], [], []>} : vector<4x32xf32>, vector<32x128xf32>, vector<4x128xf32> -> vector<4x128xf32>
    %cst_22 = arith.constant dense<0.000000e+00> : vector<4x128xf32>
    %43 = tpu.matmul %12, %8, %cst_22 {dimension_numbers = #tpu.dot_dimension_numbers<[1], [0], [0], [1], [0, 0, 1, 1], [], []>} : vector<4x32xf32>, vector<32x128xf32>, vector<4x128xf32> -> vector<4x128xf32>
    %44 = arith.addf %42, %43 : vector<4x128xf32>
    %45 = vector.broadcast %9 : vector<1x128xf32> to vector<4x128xf32>
    %46 = arith.addf %44, %45 : vector<4x128xf32>
    %47 = vector.extract_strided_slice %46 {offsets = [0, 0], sizes = [4, 32], strides = [1, 1]} : vector<4x128xf32> to vector<4x32xf32>
    %48 = arith.negf %47 : vector<4x32xf32>
    %49 = math.exp %48 : vector<4x32xf32>
    %cst_23 = arith.constant 1.000000e+00 : f32
    %50 = vector.broadcast %cst_23 : f32 to vector<4x32xf32>
    %51 = arith.addf %50, %49 : vector<4x32xf32>
    %52 = arith.divf %50, %51 : vector<4x32xf32>
    %53 = vector.extract_strided_slice %46 {offsets = [0, 32], sizes = [4, 32], strides = [1, 1]} : vector<4x128xf32> to vector<4x32xf32>
    %54 = arith.negf %53 : vector<4x32xf32>
    %55 = math.exp %54 : vector<4x32xf32>
    %cst_24 = arith.constant 1.000000e+00 : f32
    %56 = vector.broadcast %cst_24 : f32 to vector<4x32xf32>
    %57 = arith.addf %56, %55 : vector<4x32xf32>
    %58 = arith.divf %56, %57 : vector<4x32xf32>
    %59 = vector.extract_strided_slice %46 {offsets = [0, 64], sizes = [4, 32], strides = [1, 1]} : vector<4x128xf32> to vector<4x32xf32>
    %60 = math.tanh %59 : vector<4x32xf32>
    %61 = vector.extract_strided_slice %46 {offsets = [0, 96], sizes = [4, 32], strides = [1, 1]} : vector<4x128xf32> to vector<4x32xf32>
    %62 = arith.negf %61 : vector<4x32xf32>
    %63 = math.exp %62 : vector<4x32xf32>
    %cst_25 = arith.constant 1.000000e+00 : f32
    %64 = vector.broadcast %cst_25 : f32 to vector<4x32xf32>
    %65 = arith.addf %64, %63 : vector<4x32xf32>
    %66 = arith.divf %64, %65 : vector<4x32xf32>
    %67 = arith.mulf %58, %13 : vector<4x32xf32>
    %68 = arith.mulf %52, %60 : vector<4x32xf32>
    %69 = arith.addf %67, %68 : vector<4x32xf32>
    %70 = math.tanh %69 : vector<4x32xf32>
    %71 = arith.mulf %66, %70 : vector<4x32xf32>
    %c0_26 = arith.constant 0 : index
    %c0_27 = arith.constant 0 : index
    %72 = vector.load %arg20[%c0_26, %c0_27] : memref<24x32xf32, #tpu.memory_space<vmem>>, vector<4x32xf32>
    tpu.vector_store %arg20[%c0_26, %c0_27], %71 {strides = array<i32>} : memref<24x32xf32, #tpu.memory_space<vmem>>, vector<4x32xf32>,
    %73 = vector.extract_strided_slice %5 {offsets = [4, 0], sizes = [4, 128], strides = [1, 1]} : vector<24x128xf32> to vector<4x128xf32>
    %cst_28 = arith.constant dense<0.000000e+00> : vector<4x128xf32>
    %74 = tpu.matmul %41, %6, %cst_28 {dimension_numbers = #tpu.dot_dimension_numbers<[1], [0], [0], [1], [0, 0, 1, 1], [], []>} : vector<4x32xf32>, vector<32x128xf32>, vector<4x128xf32> -> vector<4x128xf32>
    %75 = arith.addf %73, %74 : vector<4x128xf32>
    %76 = vector.extract_strided_slice %75 {offsets = [0, 0], sizes = [4, 32], strides = [1, 1]} : vector<4x128xf32> to vector<4x32xf32>
    %77 = arith.negf %76 : vector<4x32xf32>
    %78 = math.exp %77 : vector<4x32xf32>
    %cst_29 = arith.constant 1.000000e+00 : f32
    %79 = vector.broadcast %cst_29 : f32 to vector<4x32xf32>
    %80 = arith.addf %79, %78 : vector<4x32xf32>
    %81 = arith.divf %79, %80 : vector<4x32xf32>
    %82 = vector.extract_strided_slice %75 {offsets = [0, 32], sizes = [4, 32], strides = [1, 1]} : vector<4x128xf32> to vector<4x32xf32>
    %83 = arith.negf %82 : vector<4x32xf32>
    %84 = math.exp %83 : vector<4x32xf32>
    %cst_30 = arith.constant 1.000000e+00 : f32
    %85 = vector.broadcast %cst_30 : f32 to vector<4x32xf32>
    %86 = arith.addf %85, %84 : vector<4x32xf32>
    %87 = arith.divf %85, %86 : vector<4x32xf32>
    %88 = vector.extract_strided_slice %75 {offsets = [0, 64], sizes = [4, 32], strides = [1, 1]} : vector<4x128xf32> to vector<4x32xf32>
    %89 = math.tanh %88 : vector<4x32xf32>
    %90 = vector.extract_strided_slice %75 {offsets = [0, 96], sizes = [4, 32], strides = [1, 1]} : vector<4x128xf32> to vector<4x32xf32>
    %91 = arith.negf %90 : vector<4x32xf32>
    %92 = math.exp %91 : vector<4x32xf32>
    %cst_31 = arith.constant 1.000000e+00 : f32
    %93 = vector.broadcast %cst_31 : f32 to vector<4x32xf32>
    %94 = arith.addf %93, %92 : vector<4x32xf32>
    %95 = arith.divf %93, %94 : vector<4x32xf32>
    %96 = arith.mulf %87, %39 : vector<4x32xf32>
    %97 = arith.mulf %81, %89 : vector<4x32xf32>
    %98 = arith.addf %96, %97 : vector<4x32xf32>
    %99 = math.tanh %98 : vector<4x32xf32>
    %100 = arith.mulf %95, %99 : vector<4x32xf32>
    %cst_32 = arith.constant dense<0.000000e+00> : vector<4x128xf32>
    %101 = tpu.matmul %100, %7, %cst_32 {dimension_numbers = #tpu.dot_dimension_numbers<[1], [0], [0], [1], [0, 0, 1, 1], [], []>} : vector<4x32xf32>, vector<32x128xf32>, vector<4x128xf32> -> vector<4x128xf32>
    %cst_33 = arith.constant dense<0.000000e+00> : vector<4x128xf32>
    %102 = tpu.matmul %71, %8, %cst_33 {dimension_numbers = #tpu.dot_dimension_numbers<[1], [0], [0], [1], [0, 0, 1, 1], [], []>} : vector<4x32xf32>, vector<32x128xf32>, vector<4x128xf32> -> vector<4x128xf32>
    %103 = arith.addf %101, %102 : vector<4x128xf32>
    %104 = vector.broadcast %9 : vector<1x128xf32> to vector<4x128xf32>
    %105 = arith.addf %103, %104 : vector<4x128xf32>
    %106 = vector.extract_strided_slice %105 {offsets = [0, 0], sizes = [4, 32], strides = [1, 1]} : vector<4x128xf32> to vector<4x32xf32>
    %107 = arith.negf %106 : vector<4x32xf32>
    %108 = math.exp %107 : vector<4x32xf32>
    %cst_34 = arith.constant 1.000000e+00 : f32
    %109 = vector.broadcast %cst_34 : f32 to vector<4x32xf32>
    %110 = arith.addf %109, %108 : vector<4x32xf32>
    %111 = arith.divf %109, %110 : vector<4x32xf32>
    %112 = vector.extract_strided_slice %105 {offsets = [0, 32], sizes = [4, 32], strides = [1, 1]} : vector<4x128xf32> to vector<4x32xf32>
    %113 = arith.negf %112 : vector<4x32xf32>
    %114 = math.exp %113 : vector<4x32xf32>
    %cst_35 = arith.constant 1.000000e+00 : f32
    %115 = vector.broadcast %cst_35 : f32 to vector<4x32xf32>
    %116 = arith.addf %115, %114 : vector<4x32xf32>
    %117 = arith.divf %115, %116 : vector<4x32xf32>
    %118 = vector.extract_strided_slice %105 {offsets = [0, 64], sizes = [4, 32], strides = [1, 1]} : vector<4x128xf32> to vector<4x32xf32>
    %119 = math.tanh %118 : vector<4x32xf32>
    %120 = vector.extract_strided_slice %105 {offsets = [0, 96], sizes = [4, 32], strides = [1, 1]} : vector<4x128xf32> to vector<4x32xf32>
    %121 = arith.negf %120 : vector<4x32xf32>
    %122 = math.exp %121 : vector<4x32xf32>
    %cst_36 = arith.constant 1.000000e+00 : f32
    %123 = vector.broadcast %cst_36 : f32 to vector<4x32xf32>
    %124 = arith.addf %123, %122 : vector<4x32xf32>
    %125 = arith.divf %123, %124 : vector<4x32xf32>
    %126 = arith.mulf %117, %69 : vector<4x32xf32>
    %127 = arith.mulf %111, %119 : vector<4x32xf32>
    %128 = arith.addf %126, %127 : vector<4x32xf32>
    %129 = math.tanh %128 : vector<4x32xf32>
    %130 = arith.mulf %125, %129 : vector<4x32xf32>
    %c4 = arith.constant 4 : index
    %c0_37 = arith.constant 0 : index
    %131 = vector.load %arg20[%c4, %c0_37] : memref<24x32xf32, #tpu.memory_space<vmem>>, vector<4x32xf32>
    tpu.vector_store %arg20[%c4, %c0_37], %130 {strides = array<i32>} : memref<24x32xf32, #tpu.memory_space<vmem>>, vector<4x32xf32>,
    %132 = vector.extract_strided_slice %5 {offsets = [8, 0], sizes = [4, 128], strides = [1, 1]} : vector<24x128xf32> to vector<4x128xf32>
    %cst_38 = arith.constant dense<0.000000e+00> : vector<4x128xf32>
    %133 = tpu.matmul %100, %6, %cst_38 {dimension_numbers = #tpu.dot_dimension_numbers<[1], [0], [0], [1], [0, 0, 1, 1], [], []>} : vector<4x32xf32>, vector<32x128xf32>, vector<4x128xf32> -> vector<4x128xf32>
    %134 = arith.addf %132, %133 : vector<4x128xf32>
    %135 = vector.extract_strided_slice %134 {offsets = [0, 0], sizes = [4, 32], strides = [1, 1]} : vector<4x128xf32> to vector<4x32xf32>
    %136 = arith.negf %135 : vector<4x32xf32>
    %137 = math.exp %136 : vector<4x32xf32>
    %cst_39 = arith.constant 1.000000e+00 : f32
    %138 = vector.broadcast %cst_39 : f32 to vector<4x32xf32>
    %139 = arith.addf %138, %137 : vector<4x32xf32>
    %140 = arith.divf %138, %139 : vector<4x32xf32>
    %141 = vector.extract_strided_slice %134 {offsets = [0, 32], sizes = [4, 32], strides = [1, 1]} : vector<4x128xf32> to vector<4x32xf32>
    %142 = arith.negf %141 : vector<4x32xf32>
    %143 = math.exp %142 : vector<4x32xf32>
    %cst_40 = arith.constant 1.000000e+00 : f32
    %144 = vector.broadcast %cst_40 : f32 to vector<4x32xf32>
    %145 = arith.addf %144, %143 : vector<4x32xf32>
    %146 = arith.divf %144, %145 : vector<4x32xf32>
    %147 = vector.extract_strided_slice %134 {offsets = [0, 64], sizes = [4, 32], strides = [1, 1]} : vector<4x128xf32> to vector<4x32xf32>
    %148 = math.tanh %147 : vector<4x32xf32>
    %149 = vector.extract_strided_slice %134 {offsets = [0, 96], sizes = [4, 32], strides = [1, 1]} : vector<4x128xf32> to vector<4x32xf32>
    %150 = arith.negf %149 : vector<4x32xf32>
    %151 = math.exp %150 : vector<4x32xf32>
    %cst_41 = arith.constant 1.000000e+00 : f32
    %152 = vector.broadcast %cst_41 : f32 to vector<4x32xf32>
    %153 = arith.addf %152, %151 : vector<4x32xf32>
    %154 = arith.divf %152, %153 : vector<4x32xf32>
    %155 = arith.mulf %146, %98 : vector<4x32xf32>
    %156 = arith.mulf %140, %148 : vector<4x32xf32>
    %157 = arith.addf %155, %156 : vector<4x32xf32>
    %158 = math.tanh %157 : vector<4x32xf32>
    %159 = arith.mulf %154, %158 : vector<4x32xf32>
    %cst_42 = arith.constant dense<0.000000e+00> : vector<4x128xf32>
    %160 = tpu.matmul %159, %7, %cst_42 {dimension_numbers = #tpu.dot_dimension_numbers<[1], [0], [0], [1], [0, 0, 1, 1], [], []>} : vector<4x32xf32>, vector<32x128xf32>, vector<4x128xf32> -> vector<4x128xf32>
    %cst_43 = arith.constant dense<0.000000e+00> : vector<4x128xf32>
    %161 = tpu.matmul %130, %8, %cst_43 {dimension_numbers = #tpu.dot_dimension_numbers<[1], [0], [0], [1], [0, 0, 1, 1], [], []>} : vector<4x32xf32>, vector<32x128xf32>, vector<4x128xf32> -> vector<4x128xf32>
    %162 = arith.addf %160, %161 : vector<4x128xf32>
    %163 = vector.broadcast %9 : vector<1x128xf32> to vector<4x128xf32>
    %164 = arith.addf %162, %163 : vector<4x128xf32>
    %165 = vector.extract_strided_slice %164 {offsets = [0, 0], sizes = [4, 32], strides = [1, 1]} : vector<4x128xf32> to vector<4x32xf32>
    %166 = arith.negf %165 : vector<4x32xf32>
    %167 = math.exp %166 : vector<4x32xf32>
    %cst_44 = arith.constant 1.000000e+00 : f32
    %168 = vector.broadcast %cst_44 : f32 to vector<4x32xf32>
    %169 = arith.addf %168, %167 : vector<4x32xf32>
    %170 = arith.divf %168, %169 : vector<4x32xf32>
    %171 = vector.extract_strided_slice %164 {offsets = [0, 32], sizes = [4, 32], strides = [1, 1]} : vector<4x128xf32> to vector<4x32xf32>
    %172 = arith.negf %171 : vector<4x32xf32>
    %173 = math.exp %172 : vector<4x32xf32>
    %cst_45 = arith.constant 1.000000e+00 : f32
    %174 = vector.broadcast %cst_45 : f32 to vector<4x32xf32>
    %175 = arith.addf %174, %173 : vector<4x32xf32>
    %176 = arith.divf %174, %175 : vector<4x32xf32>
    %177 = vector.extract_strided_slice %164 {offsets = [0, 64], sizes = [4, 32], strides = [1, 1]} : vector<4x128xf32> to vector<4x32xf32>
    %178 = math.tanh %177 : vector<4x32xf32>
    %179 = vector.extract_strided_slice %164 {offsets = [0, 96], sizes = [4, 32], strides = [1, 1]} : vector<4x128xf32> to vector<4x32xf32>
    %180 = arith.negf %179 : vector<4x32xf32>
    %181 = math.exp %180 : vector<4x32xf32>
    %cst_46 = arith.constant 1.000000e+00 : f32
    %182 = vector.broadcast %cst_46 : f32 to vector<4x32xf32>
    %183 = arith.addf %182, %181 : vector<4x32xf32>
    %184 = arith.divf %182, %183 : vector<4x32xf32>
    %185 = arith.mulf %176, %128 : vector<4x32xf32>
    %186 = arith.mulf %170, %178 : vector<4x32xf32>
    %187 = arith.addf %185, %186 : vector<4x32xf32>
    %188 = math.tanh %187 : vector<4x32xf32>
    %189 = arith.mulf %184, %188 : vector<4x32xf32>
    %c8 = arith.constant 8 : index
    %c0_47 = arith.constant 0 : index
    %190 = vector.load %arg20[%c8, %c0_47] : memref<24x32xf32, #tpu.memory_space<vmem>>, vector<4x32xf32>
    tpu.vector_store %arg20[%c8, %c0_47], %189 {strides = array<i32>} : memref<24x32xf32, #tpu.memory_space<vmem>>, vector<4x32xf32>,
    %191 = vector.extract_strided_slice %5 {offsets = [12, 0], sizes = [4, 128], strides = [1, 1]} : vector<24x128xf32> to vector<4x128xf32>
    %cst_48 = arith.constant dense<0.000000e+00> : vector<4x128xf32>
    %192 = tpu.matmul %159, %6, %cst_48 {dimension_numbers = #tpu.dot_dimension_numbers<[1], [0], [0], [1], [0, 0, 1, 1], [], []>} : vector<4x32xf32>, vector<32x128xf32>, vector<4x128xf32> -> vector<4x128xf32>
    %193 = arith.addf %191, %192 : vector<4x128xf32>
    %194 = vector.extract_strided_slice %193 {offsets = [0, 0], sizes = [4, 32], strides = [1, 1]} : vector<4x128xf32> to vector<4x32xf32>
    %195 = arith.negf %194 : vector<4x32xf32>
    %196 = math.exp %195 : vector<4x32xf32>
    %cst_49 = arith.constant 1.000000e+00 : f32
    %197 = vector.broadcast %cst_49 : f32 to vector<4x32xf32>
    %198 = arith.addf %197, %196 : vector<4x32xf32>
    %199 = arith.divf %197, %198 : vector<4x32xf32>
    %200 = vector.extract_strided_slice %193 {offsets = [0, 32], sizes = [4, 32], strides = [1, 1]} : vector<4x128xf32> to vector<4x32xf32>
    %201 = arith.negf %200 : vector<4x32xf32>
    %202 = math.exp %201 : vector<4x32xf32>
    %cst_50 = arith.constant 1.000000e+00 : f32
    %203 = vector.broadcast %cst_50 : f32 to vector<4x32xf32>
    %204 = arith.addf %203, %202 : vector<4x32xf32>
    %205 = arith.divf %203, %204 : vector<4x32xf32>
    %206 = vector.extract_strided_slice %193 {offsets = [0, 64], sizes = [4, 32], strides = [1, 1]} : vector<4x128xf32> to vector<4x32xf32>
    %207 = math.tanh %206 : vector<4x32xf32>
    %208 = vector.extract_strided_slice %193 {offsets = [0, 96], sizes = [4, 32], strides = [1, 1]} : vector<4x128xf32> to vector<4x32xf32>
    %209 = arith.negf %208 : vector<4x32xf32>
    %210 = math.exp %209 : vector<4x32xf32>
    %cst_51 = arith.constant 1.000000e+00 : f32
    %211 = vector.broadcast %cst_51 : f32 to vector<4x32xf32>
    %212 = arith.addf %211, %210 : vector<4x32xf32>
    %213 = arith.divf %211, %212 : vector<4x32xf32>
    %214 = arith.mulf %205, %157 : vector<4x32xf32>
    %215 = arith.mulf %199, %207 : vector<4x32xf32>
    %216 = arith.addf %214, %215 : vector<4x32xf32>
    %217 = math.tanh %216 : vector<4x32xf32>
    %218 = arith.mulf %213, %217 : vector<4x32xf32>
    %cst_52 = arith.constant dense<0.000000e+00> : vector<4x128xf32>
    %219 = tpu.matmul %218, %7, %cst_52 {dimension_numbers = #tpu.dot_dimension_numbers<[1], [0], [0], [1], [0, 0, 1, 1], [], []>} : vector<4x32xf32>, vector<32x128xf32>, vector<4x128xf32> -> vector<4x128xf32>
    %cst_53 = arith.constant dense<0.000000e+00> : vector<4x128xf32>
    %220 = tpu.matmul %189, %8, %cst_53 {dimension_numbers = #tpu.dot_dimension_numbers<[1], [0], [0], [1], [0, 0, 1, 1], [], []>} : vector<4x32xf32>, vector<32x128xf32>, vector<4x128xf32> -> vector<4x128xf32>
    %221 = arith.addf %219, %220 : vector<4x128xf32>
    %222 = vector.broadcast %9 : vector<1x128xf32> to vector<4x128xf32>
    %223 = arith.addf %221, %222 : vector<4x128xf32>
    %224 = vector.extract_strided_slice %223 {offsets = [0, 0], sizes = [4, 32], strides = [1, 1]} : vector<4x128xf32> to vector<4x32xf32>
    %225 = arith.negf %224 : vector<4x32xf32>
    %226 = math.exp %225 : vector<4x32xf32>
    %cst_54 = arith.constant 1.000000e+00 : f32
    %227 = vector.broadcast %cst_54 : f32 to vector<4x32xf32>
    %228 = arith.addf %227, %226 : vector<4x32xf32>
    %229 = arith.divf %227, %228 : vector<4x32xf32>
    %230 = vector.extract_strided_slice %223 {offsets = [0, 32], sizes = [4, 32], strides = [1, 1]} : vector<4x128xf32> to vector<4x32xf32>
    %231 = arith.negf %230 : vector<4x32xf32>
    %232 = math.exp %231 : vector<4x32xf32>
    %cst_55 = arith.constant 1.000000e+00 : f32
    %233 = vector.broadcast %cst_55 : f32 to vector<4x32xf32>
    %234 = arith.addf %233, %232 : vector<4x32xf32>
    %235 = arith.divf %233, %234 : vector<4x32xf32>
    %236 = vector.extract_strided_slice %223 {offsets = [0, 64], sizes = [4, 32], strides = [1, 1]} : vector<4x128xf32> to vector<4x32xf32>
    %237 = math.tanh %236 : vector<4x32xf32>
    %238 = vector.extract_strided_slice %223 {offsets = [0, 96], sizes = [4, 32], strides = [1, 1]} : vector<4x128xf32> to vector<4x32xf32>
    %239 = arith.negf %238 : vector<4x32xf32>
    %240 = math.exp %239 : vector<4x32xf32>
    %cst_56 = arith.constant 1.000000e+00 : f32
    %241 = vector.broadcast %cst_56 : f32 to vector<4x32xf32>
    %242 = arith.addf %241, %240 : vector<4x32xf32>
    %243 = arith.divf %241, %242 : vector<4x32xf32>
    %244 = arith.mulf %235, %187 : vector<4x32xf32>
    %245 = arith.mulf %229, %237 : vector<4x32xf32>
    %246 = arith.addf %244, %245 : vector<4x32xf32>
    %247 = math.tanh %246 : vector<4x32xf32>
    %248 = arith.mulf %243, %247 : vector<4x32xf32>
    %c12 = arith.constant 12 : index
    %c0_57 = arith.constant 0 : index
    %249 = vector.load %arg20[%c12, %c0_57] : memref<24x32xf32, #tpu.memory_space<vmem>>, vector<4x32xf32>
    tpu.vector_store %arg20[%c12, %c0_57], %248 {strides = array<i32>} : memref<24x32xf32, #tpu.memory_space<vmem>>, vector<4x32xf32>,
    %250 = vector.extract_strided_slice %5 {offsets = [16, 0], sizes = [4, 128], strides = [1, 1]} : vector<24x128xf32> to vector<4x128xf32>
    %cst_58 = arith.constant dense<0.000000e+00> : vector<4x128xf32>
    %251 = tpu.matmul %218, %6, %cst_58 {dimension_numbers = #tpu.dot_dimension_numbers<[1], [0], [0], [1], [0, 0, 1, 1], [], []>} : vector<4x32xf32>, vector<32x128xf32>, vector<4x128xf32> -> vector<4x128xf32>
    %252 = arith.addf %250, %251 : vector<4x128xf32>
    %253 = vector.extract_strided_slice %252 {offsets = [0, 0], sizes = [4, 32], strides = [1, 1]} : vector<4x128xf32> to vector<4x32xf32>
    %254 = arith.negf %253 : vector<4x32xf32>
    %255 = math.exp %254 : vector<4x32xf32>
    %cst_59 = arith.constant 1.000000e+00 : f32
    %256 = vector.broadcast %cst_59 : f32 to vector<4x32xf32>
    %257 = arith.addf %256, %255 : vector<4x32xf32>
    %258 = arith.divf %256, %257 : vector<4x32xf32>
    %259 = vector.extract_strided_slice %252 {offsets = [0, 32], sizes = [4, 32], strides = [1, 1]} : vector<4x128xf32> to vector<4x32xf32>
    %260 = arith.negf %259 : vector<4x32xf32>
    %261 = math.exp %260 : vector<4x32xf32>
    %cst_60 = arith.constant 1.000000e+00 : f32
    %262 = vector.broadcast %cst_60 : f32 to vector<4x32xf32>
    %263 = arith.addf %262, %261 : vector<4x32xf32>
    %264 = arith.divf %262, %263 : vector<4x32xf32>
    %265 = vector.extract_strided_slice %252 {offsets = [0, 64], sizes = [4, 32], strides = [1, 1]} : vector<4x128xf32> to vector<4x32xf32>
    %266 = math.tanh %265 : vector<4x32xf32>
    %267 = vector.extract_strided_slice %252 {offsets = [0, 96], sizes = [4, 32], strides = [1, 1]} : vector<4x128xf32> to vector<4x32xf32>
    %268 = arith.negf %267 : vector<4x32xf32>
    %269 = math.exp %268 : vector<4x32xf32>
    %cst_61 = arith.constant 1.000000e+00 : f32
    %270 = vector.broadcast %cst_61 : f32 to vector<4x32xf32>
    %271 = arith.addf %270, %269 : vector<4x32xf32>
    %272 = arith.divf %270, %271 : vector<4x32xf32>
    %273 = arith.mulf %264, %216 : vector<4x32xf32>
    %274 = arith.mulf %258, %266 : vector<4x32xf32>
    %275 = arith.addf %273, %274 : vector<4x32xf32>
    %276 = math.tanh %275 : vector<4x32xf32>
    %277 = arith.mulf %272, %276 : vector<4x32xf32>
    %cst_62 = arith.constant dense<0.000000e+00> : vector<4x128xf32>
    %278 = tpu.matmul %277, %7, %cst_62 {dimension_numbers = #tpu.dot_dimension_numbers<[1], [0], [0], [1], [0, 0, 1, 1], [], []>} : vector<4x32xf32>, vector<32x128xf32>, vector<4x128xf32> -> vector<4x128xf32>
    %cst_63 = arith.constant dense<0.000000e+00> : vector<4x128xf32>
    %279 = tpu.matmul %248, %8, %cst_63 {dimension_numbers = #tpu.dot_dimension_numbers<[1], [0], [0], [1], [0, 0, 1, 1], [], []>} : vector<4x32xf32>, vector<32x128xf32>, vector<4x128xf32> -> vector<4x128xf32>
    %280 = arith.addf %278, %279 : vector<4x128xf32>
    %281 = vector.broadcast %9 : vector<1x128xf32> to vector<4x128xf32>
    %282 = arith.addf %280, %281 : vector<4x128xf32>
    %283 = vector.extract_strided_slice %282 {offsets = [0, 0], sizes = [4, 32], strides = [1, 1]} : vector<4x128xf32> to vector<4x32xf32>
    %284 = arith.negf %283 : vector<4x32xf32>
    %285 = math.exp %284 : vector<4x32xf32>
    %cst_64 = arith.constant 1.000000e+00 : f32
    %286 = vector.broadcast %cst_64 : f32 to vector<4x32xf32>
    %287 = arith.addf %286, %285 : vector<4x32xf32>
    %288 = arith.divf %286, %287 : vector<4x32xf32>
    %289 = vector.extract_strided_slice %282 {offsets = [0, 32], sizes = [4, 32], strides = [1, 1]} : vector<4x128xf32> to vector<4x32xf32>
    %290 = arith.negf %289 : vector<4x32xf32>
    %291 = math.exp %290 : vector<4x32xf32>
    %cst_65 = arith.constant 1.000000e+00 : f32
    %292 = vector.broadcast %cst_65 : f32 to vector<4x32xf32>
    %293 = arith.addf %292, %291 : vector<4x32xf32>
    %294 = arith.divf %292, %293 : vector<4x32xf32>
    %295 = vector.extract_strided_slice %282 {offsets = [0, 64], sizes = [4, 32], strides = [1, 1]} : vector<4x128xf32> to vector<4x32xf32>
    %296 = math.tanh %295 : vector<4x32xf32>
    %297 = vector.extract_strided_slice %282 {offsets = [0, 96], sizes = [4, 32], strides = [1, 1]} : vector<4x128xf32> to vector<4x32xf32>
    %298 = arith.negf %297 : vector<4x32xf32>
    %299 = math.exp %298 : vector<4x32xf32>
    %cst_66 = arith.constant 1.000000e+00 : f32
    %300 = vector.broadcast %cst_66 : f32 to vector<4x32xf32>
    %301 = arith.addf %300, %299 : vector<4x32xf32>
    %302 = arith.divf %300, %301 : vector<4x32xf32>
    %303 = arith.mulf %294, %246 : vector<4x32xf32>
    %304 = arith.mulf %288, %296 : vector<4x32xf32>
    %305 = arith.addf %303, %304 : vector<4x32xf32>
    %306 = math.tanh %305 : vector<4x32xf32>
    %307 = arith.mulf %302, %306 : vector<4x32xf32>
    %c16 = arith.constant 16 : index
    %c0_67 = arith.constant 0 : index
    %308 = vector.load %arg20[%c16, %c0_67] : memref<24x32xf32, #tpu.memory_space<vmem>>, vector<4x32xf32>
    tpu.vector_store %arg20[%c16, %c0_67], %307 {strides = array<i32>} : memref<24x32xf32, #tpu.memory_space<vmem>>, vector<4x32xf32>,
    %309 = vector.extract_strided_slice %5 {offsets = [20, 0], sizes = [4, 128], strides = [1, 1]} : vector<24x128xf32> to vector<4x128xf32>
    %cst_68 = arith.constant dense<0.000000e+00> : vector<4x128xf32>
    %310 = tpu.matmul %277, %6, %cst_68 {dimension_numbers = #tpu.dot_dimension_numbers<[1], [0], [0], [1], [0, 0, 1, 1], [], []>} : vector<4x32xf32>, vector<32x128xf32>, vector<4x128xf32> -> vector<4x128xf32>
    %311 = arith.addf %309, %310 : vector<4x128xf32>
    %312 = vector.extract_strided_slice %311 {offsets = [0, 0], sizes = [4, 32], strides = [1, 1]} : vector<4x128xf32> to vector<4x32xf32>
    %313 = arith.negf %312 : vector<4x32xf32>
    %314 = math.exp %313 : vector<4x32xf32>
    %cst_69 = arith.constant 1.000000e+00 : f32
    %315 = vector.broadcast %cst_69 : f32 to vector<4x32xf32>
    %316 = arith.addf %315, %314 : vector<4x32xf32>
    %317 = arith.divf %315, %316 : vector<4x32xf32>
    %318 = vector.extract_strided_slice %311 {offsets = [0, 32], sizes = [4, 32], strides = [1, 1]} : vector<4x128xf32> to vector<4x32xf32>
    %319 = arith.negf %318 : vector<4x32xf32>
    %320 = math.exp %319 : vector<4x32xf32>
    %cst_70 = arith.constant 1.000000e+00 : f32
    %321 = vector.broadcast %cst_70 : f32 to vector<4x32xf32>
    %322 = arith.addf %321, %320 : vector<4x32xf32>
    %323 = arith.divf %321, %322 : vector<4x32xf32>
    %324 = vector.extract_strided_slice %311 {offsets = [0, 64], sizes = [4, 32], strides = [1, 1]} : vector<4x128xf32> to vector<4x32xf32>
    %325 = math.tanh %324 : vector<4x32xf32>
    %326 = vector.extract_strided_slice %311 {offsets = [0, 96], sizes = [4, 32], strides = [1, 1]} : vector<4x128xf32> to vector<4x32xf32>
    %327 = arith.negf %326 : vector<4x32xf32>
    %328 = math.exp %327 : vector<4x32xf32>
    %cst_71 = arith.constant 1.000000e+00 : f32
    %329 = vector.broadcast %cst_71 : f32 to vector<4x32xf32>
    %330 = arith.addf %329, %328 : vector<4x32xf32>
    %331 = arith.divf %329, %330 : vector<4x32xf32>
    %332 = arith.mulf %323, %275 : vector<4x32xf32>
    %333 = arith.mulf %317, %325 : vector<4x32xf32>
    %334 = arith.addf %332, %333 : vector<4x32xf32>
    %335 = math.tanh %334 : vector<4x32xf32>
    %336 = arith.mulf %331, %335 : vector<4x32xf32>
    %cst_72 = arith.constant dense<0.000000e+00> : vector<4x128xf32>
    %337 = tpu.matmul %336, %7, %cst_72 {dimension_numbers = #tpu.dot_dimension_numbers<[1], [0], [0], [1], [0, 0, 1, 1], [], []>} : vector<4x32xf32>, vector<32x128xf32>, vector<4x128xf32> -> vector<4x128xf32>
    %cst_73 = arith.constant dense<0.000000e+00> : vector<4x128xf32>
    %338 = tpu.matmul %307, %8, %cst_73 {dimension_numbers = #tpu.dot_dimension_numbers<[1], [0], [0], [1], [0, 0, 1, 1], [], []>} : vector<4x32xf32>, vector<32x128xf32>, vector<4x128xf32> -> vector<4x128xf32>
    %339 = arith.addf %337, %338 : vector<4x128xf32>
    %340 = vector.broadcast %9 : vector<1x128xf32> to vector<4x128xf32>
    %341 = arith.addf %339, %340 : vector<4x128xf32>
    %342 = vector.extract_strided_slice %341 {offsets = [0, 0], sizes = [4, 32], strides = [1, 1]} : vector<4x128xf32> to vector<4x32xf32>
    %343 = arith.negf %342 : vector<4x32xf32>
    %344 = math.exp %343 : vector<4x32xf32>
    %cst_74 = arith.constant 1.000000e+00 : f32
    %345 = vector.broadcast %cst_74 : f32 to vector<4x32xf32>
    %346 = arith.addf %345, %344 : vector<4x32xf32>
    %347 = arith.divf %345, %346 : vector<4x32xf32>
    %348 = vector.extract_strided_slice %341 {offsets = [0, 32], sizes = [4, 32], strides = [1, 1]} : vector<4x128xf32> to vector<4x32xf32>
    %349 = arith.negf %348 : vector<4x32xf32>
    %350 = math.exp %349 : vector<4x32xf32>
    %cst_75 = arith.constant 1.000000e+00 : f32
    %351 = vector.broadcast %cst_75 : f32 to vector<4x32xf32>
    %352 = arith.addf %351, %350 : vector<4x32xf32>
    %353 = arith.divf %351, %352 : vector<4x32xf32>
    %354 = vector.extract_strided_slice %341 {offsets = [0, 64], sizes = [4, 32], strides = [1, 1]} : vector<4x128xf32> to vector<4x32xf32>
    %355 = math.tanh %354 : vector<4x32xf32>
    %356 = vector.extract_strided_slice %341 {offsets = [0, 96], sizes = [4, 32], strides = [1, 1]} : vector<4x128xf32> to vector<4x32xf32>
    %357 = arith.negf %356 : vector<4x32xf32>
    %358 = math.exp %357 : vector<4x32xf32>
    %cst_76 = arith.constant 1.000000e+00 : f32
    %359 = vector.broadcast %cst_76 : f32 to vector<4x32xf32>
    %360 = arith.addf %359, %358 : vector<4x32xf32>
    %361 = arith.divf %359, %360 : vector<4x32xf32>
    %362 = arith.mulf %353, %305 : vector<4x32xf32>
    %363 = arith.mulf %347, %355 : vector<4x32xf32>
    %364 = arith.addf %362, %363 : vector<4x32xf32>
    %365 = math.tanh %364 : vector<4x32xf32>
    %366 = arith.mulf %361, %365 : vector<4x32xf32>
    %c20 = arith.constant 20 : index
    %c0_77 = arith.constant 0 : index
    %367 = vector.load %arg20[%c20, %c0_77] : memref<24x32xf32, #tpu.memory_space<vmem>>, vector<4x32xf32>
    tpu.vector_store %arg20[%c20, %c0_77], %366 {strides = array<i32>} : memref<24x32xf32, #tpu.memory_space<vmem>>, vector<4x32xf32>,
    %c0_78 = arith.constant 0 : index
    %c0_79 = arith.constant 0 : index
    %368 = vector.load %arg20[%c0_78, %c0_79] : memref<24x32xf32, #tpu.memory_space<vmem>>, vector<24x32xf32>
    %c0_80 = arith.constant 0 : index
    %c0_81 = arith.constant 0 : index
    %369 = vector.load %arg11[%c0_80, %c0_81] : memref<32x16xf32, #tpu.memory_space<vmem>>, vector<32x16xf32>
    %cst_82 = arith.constant dense<0.000000e+00> : vector<24x16xf32>
    %370 = tpu.matmul %368, %369, %cst_82 {dimension_numbers = #tpu.dot_dimension_numbers<[1], [0], [0], [1], [0, 0, 1, 1], [], []>} : vector<24x32xf32>, vector<32x16xf32>, vector<24x16xf32> -> vector<24x16xf32>
    %c0_83 = arith.constant 0 : index
    %c0_84 = arith.constant 0 : index
    %371 = vector.load %arg12[%c0_83, %c0_84] : memref<1x16xf32, #tpu.memory_space<vmem>>, vector<1x16xf32>
    %372 = vector.broadcast %371 : vector<1x16xf32> to vector<24x16xf32>
    %373 = arith.addf %370, %372 : vector<24x16xf32>
    %cst_85 = arith.constant 0.000000e+00 : f32
    %374 = vector.broadcast %cst_85 : f32 to vector<24x16xf32>
    %375 = arith.maximumf %373, %374 : vector<24x16xf32>
    %c0_86 = arith.constant 0 : index
    %c0_87 = arith.constant 0 : index
    %376 = vector.load %arg3[%c0_86, %c0_87] : memref<192x52xf32, #tpu.memory_space<vmem>>, vector<192x52xf32>
    %c0_88 = arith.constant 0 : index
    %c0_89 = arith.constant 0 : index
    %377 = vector.load %arg15[%c0_88, %c0_89] : memref<52x16xf32, #tpu.memory_space<vmem>>, vector<52x16xf32>
    %cst_90 = arith.constant dense<0.000000e+00> : vector<192x16xf32>
    %378 = tpu.matmul %376, %377, %cst_90 {dimension_numbers = #tpu.dot_dimension_numbers<[1], [0], [0], [1], [0, 0, 1, 1], [], []>} : vector<192x52xf32>, vector<52x16xf32>, vector<192x16xf32> -> vector<192x16xf32>
    %c0_91 = arith.constant 0 : index
    %c0_92 = arith.constant 0 : index
    %379 = vector.load %arg16[%c0_91, %c0_92] : memref<1x16xf32, #tpu.memory_space<vmem>>, vector<1x16xf32>
    %380 = vector.broadcast %379 : vector<1x16xf32> to vector<192x16xf32>
    %381 = arith.addf %378, %380 : vector<192x16xf32>
    %382 = vector.shape_cast %375 : vector<24x16xf32> to vector<24x1x16xf32>
    %383 = vector.shape_cast %381 : vector<192x16xf32> to vector<24x8x16xf32>
    %384 = vector.broadcast %382 : vector<24x1x16xf32> to vector<24x8x16xf32>
    %385 = arith.mulf %384, %383 : vector<24x8x16xf32>
    %cst_93 = arith.constant dense<0.000000e+00> : vector<24x8xf32>
    %386 = vector.multi_reduction <add>, %385, %cst_93 [2] : vector<24x8x16xf32> to vector<24x8xf32>
    %c0_94 = arith.constant 0 : index
    %c0_95 = arith.constant 0 : index
    %387 = vector.load %arg4[%c0_94, %c0_95] : memref<24x8xf32, #tpu.memory_space<vmem>>, vector<24x8xf32>
    %cst_96 = arith.constant 5.000000e-01 : f32
    %388 = vector.broadcast %cst_96 : f32 to vector<24x8xf32>
    %389 = arith.cmpf ogt, %387, %388 : vector<24x8xf32>
    %cst_97 = arith.constant 0xFF800000 : f32
    %390 = vector.broadcast %cst_97 : f32 to vector<24x8xf32>
    %391 = arith.select %389, %390, %386 : vector<24x8xi1>, vector<24x8xf32>
    %cst_98 = arith.constant dense<0xFF800000> : vector<24xf32>
    %392 = vector.multi_reduction <maximumf>, %391, %cst_98 [1] : vector<24x8xf32> to vector<24xf32>
    %393 = vector.shape_cast %392 : vector<24xf32> to vector<24x1xf32>
    %394 = vector.broadcast %393 : vector<24x1xf32> to vector<24x8xf32>
    %395 = arith.subf %391, %394 : vector<24x8xf32>
    %396 = math.exp %395 : vector<24x8xf32>
    %cst_99 = arith.constant dense<0.000000e+00> : vector<24xf32>
    %397 = vector.multi_reduction <add>, %396, %cst_99 [1] : vector<24x8xf32> to vector<24xf32>
    %398 = vector.shape_cast %397 : vector<24xf32> to vector<24x1xf32>
    %399 = math.log %398 : vector<24x1xf32>
    %400 = arith.addf %399, %393 : vector<24x1xf32>
    %401 = vector.broadcast %400 : vector<24x1xf32> to vector<24x8xf32>
    %402 = arith.subf %391, %401 : vector<24x8xf32>
    %c0_100 = arith.constant 0 : index
    %c0_101 = arith.constant 0 : index
    %403 = vector.load %arg2[%c0_100, %c0_101] : memref<192x32xf32, #tpu.memory_space<vmem>>, vector<192x32xf32>
    %c0_102 = arith.constant 0 : index
    %c0_103 = arith.constant 0 : index
    %404 = vector.load %arg13[%c0_102, %c0_103] : memref<32x16xf32, #tpu.memory_space<vmem>>, vector<32x16xf32>
    %cst_104 = arith.constant dense<0.000000e+00> : vector<192x16xf32>
    %405 = tpu.matmul %403, %404, %cst_104 {dimension_numbers = #tpu.dot_dimension_numbers<[1], [0], [0], [1], [0, 0, 1, 1], [], []>} : vector<192x32xf32>, vector<32x16xf32>, vector<192x16xf32> -> vector<192x16xf32>
    %c0_105 = arith.constant 0 : index
    %c0_106 = arith.constant 0 : index
    %406 = vector.load %arg14[%c0_105, %c0_106] : memref<1x16xf32, #tpu.memory_space<vmem>>, vector<1x16xf32>
    %407 = vector.broadcast %406 : vector<1x16xf32> to vector<192x16xf32>
    %408 = arith.addf %405, %407 : vector<192x16xf32>
    %cst_107 = arith.constant 0.000000e+00 : f32
    %409 = vector.broadcast %cst_107 : f32 to vector<192x16xf32>
    %410 = arith.maximumf %408, %409 : vector<192x16xf32>
    %c0_108 = arith.constant 0 : index
    %c0_109 = arith.constant 0 : index
    %411 = vector.load %arg3[%c0_108, %c0_109] : memref<192x52xf32, #tpu.memory_space<vmem>>, vector<192x52xf32>
    %c0_110 = arith.constant 0 : index
    %c0_111 = arith.constant 0 : index
    %412 = vector.load %arg17[%c0_110, %c0_111] : memref<52x16xf32, #tpu.memory_space<vmem>>, vector<52x16xf32>
    %cst_112 = arith.constant dense<0.000000e+00> : vector<192x16xf32>
    %413 = tpu.matmul %411, %412, %cst_112 {dimension_numbers = #tpu.dot_dimension_numbers<[1], [0], [0], [1], [0, 0, 1, 1], [], []>} : vector<192x52xf32>, vector<52x16xf32>, vector<192x16xf32> -> vector<192x16xf32>
    %c0_113 = arith.constant 0 : index
    %c0_114 = arith.constant 0 : index
    %414 = vector.load %arg18[%c0_113, %c0_114] : memref<1x16xf32, #tpu.memory_space<vmem>>, vector<1x16xf32>
    %415 = vector.broadcast %414 : vector<1x16xf32> to vector<192x16xf32>
    %416 = arith.addf %413, %415 : vector<192x16xf32>
    %417 = vector.shape_cast %410 : vector<192x16xf32> to vector<24x8x16xf32>
    %418 = vector.shape_cast %416 : vector<192x16xf32> to vector<24x8x16xf32>
    %419 = arith.mulf %417, %418 : vector<24x8x16xf32>
    %cst_115 = arith.constant dense<0.000000e+00> : vector<24x8xf32>
    %420 = vector.multi_reduction <add>, %419, %cst_115 [2] : vector<24x8x16xf32> to vector<24x8xf32>
    %421 = arith.negf %420 : vector<24x8xf32>
    %422 = math.exp %421 : vector<24x8xf32>
    %cst_116 = arith.constant 1.000000e+00 : f32
    %423 = vector.broadcast %cst_116 : f32 to vector<24x8xf32>
    %424 = arith.addf %423, %422 : vector<24x8xf32>
    %425 = arith.divf %423, %424 : vector<24x8xf32>
    %c0_117 = arith.constant 0 : index
    %c0_118 = arith.constant 0 : index
    %426 = vector.load %arg19[%c0_117, %c0_118] : memref<24x16xf32, #tpu.memory_space<vmem>>, vector<24x8xf32>
    tpu.vector_store %arg19[%c0_117, %c0_118], %402 {strides = array<i32>} : memref<24x16xf32, #tpu.memory_space<vmem>>, vector<24x8xf32>,
    %c0_119 = arith.constant 0 : index
    %c8_120 = arith.constant 8 : index
    %427 = vector.load %arg19[%c0_119, %c8_120] : memref<24x16xf32, #tpu.memory_space<vmem>>, vector<24x8xf32>
    tpu.vector_store %arg19[%c0_119, %c8_120], %425 {strides = array<i32>} : memref<24x16xf32, #tpu.memory_space<vmem>>, vector<24x8xf32>,
    return
  }
  func.func @transform_0(%arg0: i32) -> (i32, i32) {
    %c0_i32 = arith.constant 0 : i32
    %c0_i32_0 = arith.constant 0 : i32
    %c0_i32_1 = arith.constant 0 : i32
    return %c0_i32, %c0_i32_0 : i32, i32
  }
  func.func @transform_1(%arg0: i32) -> (i32, i32) {
    %c0_i32 = arith.constant 0 : i32
    %c0_i32_0 = arith.constant 0 : i32
    %c0_i32_1 = arith.constant 0 : i32
    return %c0_i32, %c0_i32_0 : i32, i32
  }
  func.func @transform_2(%arg0: i32) -> (i32, i32) {
    %c0_i32 = arith.constant 0 : i32
    %c0_i32_0 = arith.constant 0 : i32
    %c0_i32_1 = arith.constant 0 : i32
    return %c0_i32, %c0_i32_0 : i32, i32
  }
  func.func @transform_3(%arg0: i32) -> (i32, i32) {
    %c0_i32 = arith.constant 0 : i32
    %c0_i32_0 = arith.constant 0 : i32
    %c0_i32_1 = arith.constant 0 : i32
    return %c0_i32, %c0_i32_0 : i32, i32
  }
  func.func @transform_4(%arg0: i32) -> (i32, i32) {
    %c0_i32 = arith.constant 0 : i32
    %c0_i32_0 = arith.constant 0 : i32
    %c0_i32_1 = arith.constant 0 : i32
    return %c0_i32, %c0_i32_0 : i32, i32
  }
  func.func @transform_5(%arg0: i32) -> (i32, i32) {
    %c0_i32 = arith.constant 0 : i32
    %c0_i32_0 = arith.constant 0 : i32
    %c0_i32_1 = arith.constant 0 : i32
    return %c0_i32, %c0_i32_0 : i32, i32
  }
  func.func @transform_6(%arg0: i32) -> (i32, i32) {
    %c0_i32 = arith.constant 0 : i32
    %c0_i32_0 = arith.constant 0 : i32
    %c0_i32_1 = arith.constant 0 : i32
    return %c0_i32, %c0_i32_0 : i32, i32
  }
  func.func @transform_7(%arg0: i32) -> (i32, i32) {
    %c0_i32 = arith.constant 0 : i32
    %c0_i32_0 = arith.constant 0 : i32
    %c0_i32_1 = arith.constant 0 : i32
    return %c0_i32, %c0_i32_0 : i32, i32
  }
  func.func @transform_8(%arg0: i32) -> (i32, i32) {
    %c0_i32 = arith.constant 0 : i32
    %c0_i32_0 = arith.constant 0 : i32
    %c0_i32_1 = arith.constant 0 : i32
    return %c0_i32, %c0_i32_0 : i32, i32
  }
  func.func @transform_9(%arg0: i32) -> (i32, i32) {
    %c0_i32 = arith.constant 0 : i32
    %c0_i32_0 = arith.constant 0 : i32
    %c0_i32_1 = arith.constant 0 : i32
    return %c0_i32, %c0_i32_0 : i32, i32
  }
  func.func @transform_10(%arg0: i32) -> (i32, i32) {
    %c0_i32 = arith.constant 0 : i32
    %c0_i32_0 = arith.constant 0 : i32
    %c0_i32_1 = arith.constant 0 : i32
    return %c0_i32, %c0_i32_0 : i32, i32
  }
  func.func @transform_11(%arg0: i32) -> (i32, i32) {
    %c0_i32 = arith.constant 0 : i32
    %c0_i32_0 = arith.constant 0 : i32
    %c0_i32_1 = arith.constant 0 : i32
    return %c0_i32, %c0_i32_0 : i32, i32
  }
  func.func @transform_12(%arg0: i32) -> (i32, i32) {
    %c0_i32 = arith.constant 0 : i32
    %c0_i32_0 = arith.constant 0 : i32
    %c0_i32_1 = arith.constant 0 : i32
    return %c0_i32, %c0_i32_0 : i32, i32
  }
  func.func @transform_13(%arg0: i32) -> (i32, i32) {
    %c0_i32 = arith.constant 0 : i32
    %c0_i32_0 = arith.constant 0 : i32
    %c0_i32_1 = arith.constant 0 : i32
    return %c0_i32, %c0_i32_0 : i32, i32
  }
  func.func @transform_14(%arg0: i32) -> (i32, i32) {
    %c0_i32 = arith.constant 0 : i32
    %c0_i32_0 = arith.constant 0 : i32
    %c0_i32_1 = arith.constant 0 : i32
    return %c0_i32, %c0_i32_0 : i32, i32
  }
  func.func @transform_15(%arg0: i32) -> (i32, i32) {
    %c0_i32 = arith.constant 0 : i32
    %c0_i32_0 = arith.constant 0 : i32
    %c0_i32_1 = arith.constant 0 : i32
    return %c0_i32, %c0_i32_0 : i32, i32
  }
  func.func @transform_16(%arg0: i32) -> (i32, i32) {
    %c0_i32 = arith.constant 0 : i32
    %c0_i32_0 = arith.constant 0 : i32
    %c0_i32_1 = arith.constant 0 : i32
    return %c0_i32, %c0_i32_0 : i32, i32
  }
  func.func @transform_17(%arg0: i32) -> (i32, i32) {
    %c0_i32 = arith.constant 0 : i32
    %c0_i32_0 = arith.constant 0 : i32
    %c0_i32_1 = arith.constant 0 : i32
    return %c0_i32, %c0_i32_0 : i32, i32
  }
  func.func @transform_18(%arg0: i32) -> (i32, i32) {
    %c0_i32 = arith.constant 0 : i32
    %c0_i32_0 = arith.constant 0 : i32
    %c0_i32_1 = arith.constant 0 : i32
    return %c0_i32, %c0_i32_0 : i32, i32
  }
}

</mosaic_0001>

<bundles_post_ra>
// kernel: model_forward.1
= control target key start
LH: loop header
LB: loop body
LE: loop exit
PB: predicated region body
PF: predicated region fallthrough
CT: control target
= control target key end

     0   :  { %vm84_vm0 = vcmask 1043456   ;;  %v2917_v11 = vmov 0.0   ;;  %vm74_vm1 = vcmask 490496   ;;  %s2918_s28 = smov 64   ;;  %s2919_s30 = smov 32   ;;  %vm127_vm6 = vcmask 261120   ;;  %s4821_s4 = inlined_call_operand.vmem [shape: f32[60,128], index: 4, kind: input, shape index: {}]   ;;  %s4822_s5 = inlined_call_operand.vmem [shape: f32[32,128], index: 5, kind: input, shape index: {}]   ;;  %s4823_s6 = inlined_call_operand.vmem [shape: f32[1,128], index: 6, kind: input, shape index: {}]   ;;  %s4824_s0 = inlined_call_operand.vmem [shape: f32[24,60], index: 0, kind: input, shape index: {}]   ;;  %s4825_s8 = inlined_call_operand.vmem [shape: f32[32,128], index: 8, kind: input, shape index: {}]   ;;  %s4826_s7 = inlined_call_operand.vmem [shape: f32[32,128], index: 7, kind: input, shape index: {}]   ;;  %s4827_s9 = inlined_call_operand.vmem [shape: f32[1,128], index: 9, kind: input, shape index: {}]   ;;  %s4828_s14 = inlined_call_operand.vmem [shape: f32[52,16], index: 14, kind: input, shape index: {}]   ;;  %s4829_s10 = inlined_call_operand.vmem [shape: f32[32,16], index: 10, kind: input, shape index: {}]   ;;  %s4830_s2 = inlined_call_operand.vmem [shape: f32[192,52], index: 2, kind: input, shape index: {}]   ;;  %s4831_s11 = inlined_call_operand.vmem [shape: f32[1,16], index: 11, kind: input, shape index: {}]   ;;  %s4832_s15 = inlined_call_operand.vmem [shape: f32[1,16], index: 15, kind: input, shape index: {}]   ;;  %s4833_s16 = inlined_call_operand.vmem [shape: f32[52,16], index: 16, kind: input, shape index: {}]   ;;  %s4834_s12 = inlined_call_operand.vmem [shape: f32[32,16], index: 12, kind: input, shape index: {}]   ;;  %s4835_s1 = inlined_call_operand.vmem [shape: f32[192,32], index: 1, kind: input, shape index: {}]   ;;  %s4836_s13 = inlined_call_operand.vmem [shape: f32[1,16], index: 13, kind: input, shape index: {}]   ;;  %s4837_s17 = inlined_call_operand.vmem [shape: f32[1,16], index: 17, kind: input, shape index: {}]   ;;  %s4838_s3 = inlined_call_operand.vmem [shape: f32[24,8], index: 3, kind: input, shape index: {}]   ;;  %s4839_s18 = inlined_call_operand.vmem [shape: f32[24,16], index: 18, kind: output, shape index: {}]  }
   0x1   :  { %4847 = sst [smem:[#allocation3_spill]] %s4821_s4  ;;  %v59_v13 = vld [vmem:[%s4824_s0] sm:$0xff]  ;;  %v3099_v39 = vld [vmem:[%s4825_s8 + $0x18] sm:$0xff]  ;;  %v3109_v41 = vld [vmem:[%s4825_s8 + $0x10] sm:$0xff]  ;;  %vm279_vm15 = vcmask 257024  }
   0x2   :  { %4848 = sst [smem:[#allocation4_spill]] %s4822_s5  ;;  %v3104_v40 = vld [vmem:[%s4826_s7 + $0x18] sm:$0xff]  ;;  %201 = vmatpush.msra.mxu2 %v3099_v39  ;;  %v3116_v42 = vld [vmem:[%s4826_s7 + $0x10] sm:$0xff]  ;;  %v3121_v43 = vld [vmem:[%s4825_s8 + $0x8] sm:$0xff] }
   0x3   :  { %4849 = sst [smem:[#allocation5_spill]] %s4823_s6  ;;  %226 = vmatpush.msra.mxu3 %v3104_v40  ;;  %v3126_v44 = vld [vmem:[%s4826_s7 + $0x8] sm:$0xff]  ;;  %v3134_v45 = vld [vmem:[%s4825_s8] sm:$0xff] }
   0x4   :  { %s4850_s29 = sld [smem:[#allocation3_spill]]  ;;  %202 = vmatpush.msra.mxu2 %v3109_v41  ;;  %v3139_v46 = vld [vmem:[%s4826_s7] sm:$0xff] }
   0x5   :  { %s4851_s22 = sld [smem:[#allocation4_spill]]  ;;  %227 = vmatpush.msra.mxu3 %v3116_v42  ;;  %v3176_v54 = vld [vmem:[%s4827_s9] ss:$0 sm:$0xff] }
   0x6   :  { %s4852_s27 = sld [smem:[#allocation5_spill]]  ;;  %203 = vmatpush.msra.mxu2 %v3121_v43 }
   0x7   :  { %228 = vmatpush.msra.mxu3 %v3126_v44 }
   0x8   :  { %204 = vmatpush.msra.mxu2 %v3134_v45 }
   0x9   :  { %229 = vmatpush.msra.mxu3 %v3139_v46  ;;  %205 = vmatmul.f32.vlgmr.msra.gmra.mxu2 %v2917_v11 }
   0xa   :  { %v69_v0 = vld [vmem:[%s4850_s29 + $0x38] sm:$0xf]  ;;  %v68_v1 = vld [vmem:[%s4850_s29 + $0x30] sm:$0xff]  ;;  %v67_v2 = vld [vmem:[%s4850_s29 + $0x28] sm:$0xff]  ;;  %359 = vmatpush.msrb.mxu2 %v3099_v39 }
   0xb   :  { %2552 = vmatpush.msk.msra.mxu0 %vm84_vm0, %v69_v0  ;;  %v3028_v3 = vld [vmem:[%s4851_s22 + $0x18] sm:$0xff]  ;;  %v3033_v4 = vld [vmem:[%s4851_s22 + $0x10] sm:$0xff]  ;;  %v66_v5 = vld [vmem:[%s4850_s29 + $0x20] sm:$0xff]  ;;  %385 = vmatpush.msrb.mxu3 %v3104_v40 }
   0xc   :  { %143 = vmatpush.msra.mxu1 %v3028_v3  ;;  %v3042_v6 = vld [vmem:[%s4851_s22 + $0x8] sm:$0xff]  ;;  %v65_v7 = vld [vmem:[%s4850_s29 + $0x18] sm:$0xff]  ;;  %v3051_v8 = vld [vmem:[%s4851_s22] sm:$0xff]  ;;  %360 = vmatpush.msrb.mxu2 %v3109_v41 }
   0xd   :  { %97 = vmatpush.msra.mxu0 %v68_v1  ;;  %v64_v9 = vld [vmem:[%s4850_s29 + $0x10] sm:$0xff]  ;;  %v63_v10 = vld [vmem:[%s4850_s29 + $0x8] sm:$0xff]  ;;  %v62_v12 = vld [vmem:[%s4850_s29] sm:$0xff]  ;;  %386 = vmatpush.msrb.mxu3 %v3116_v42 }
   0xe   :  { %144 = vmatpush.msra.mxu1 %v3033_v4  ;;  %v3084_v14 = vld [vmem:[%s4852_s27] ss:$0 sm:$0xff]  ;;  %361 = vmatpush.msrb.mxu2 %v3121_v43 }
   0xf   :  { %98 = vmatpush.msra.mxu0 %v67_v2  ;;  %387 = vmatpush.msrb.mxu3 %v3126_v44 }
  0x10   :  { %145 = vmatpush.msra.mxu1 %v3042_v6  ;;  %362 = vmatpush.msrb.mxu2 %v3134_v45 }
  0x11   :  { %99 = vmatpush.msra.mxu0 %v66_v5  ;;  %388 = vmatpush.msrb.mxu3 %v3139_v46 }
  0x12   :  { %146 = vmatpush.msra.mxu1 %v3051_v8  ;;  %511 = vmatpush.msra.mxu2 %v3099_v39 }
  0x13   :  { %100 = vmatpush.msra.mxu0 %v65_v7  ;;  %147 = vmatmul.f32.vlgmr.msra.gmra.mxu1 %v2917_v11 }
  0x14   :  { %293 = vmatpush.msrb.mxu1 %v3028_v3  ;;  %512 = vmatpush.msra.mxu2 %v3109_v41 }
  0x15   :  { %101 = vmatpush.msra.mxu0 %v64_v9 }
  0x16   :  { %294 = vmatpush.msrb.mxu1 %v3033_v4  ;;  %513 = vmatpush.msra.mxu2 %v3121_v43 }
  0x17   :  { %102 = vmatpush.msra.mxu0 %v63_v10 }
  0x18   :  { %295 = vmatpush.msrb.mxu1 %v3042_v6  ;;  %514 = vmatpush.msra.mxu2 %v3134_v45 }
  0x19   :  { %103 = vmatpush.msra.mxu0 %v62_v12 }
  0x1a   :  { %2553 = vmatmul.msk.f32.vlgmr.msra.gmra.mxu0 %vm74_vm1, %v59_v13  ;;  %296 = vmatpush.msrb.mxu1 %v3051_v8 }
  0x1b   :  { %754 = vmatpush.msrb.mxu0 %v3028_v3 }
  0x1c   :  { %448 = vmatpush.msra.mxu1 %v3028_v3 }
  0x1d   :  { %755 = vmatpush.msrb.mxu0 %v3033_v4 }
  0x1e   :  { %449 = vmatpush.msra.mxu1 %v3033_v4 }
  0x1f   :  { %756 = vmatpush.msrb.mxu0 %v3042_v6 }
  0x20   :  { %450 = vmatpush.msra.mxu1 %v3042_v6 }
  0x21   :  { %757 = vmatpush.msrb.mxu0 %v3051_v8 }
  0x22   :  { %451 = vmatpush.msra.mxu1 %v3051_v8 }
  0x23   :  { %971 = vmatpush.msra.mxu0 %v3099_v39 }
  0x25   :  { %972 = vmatpush.msra.mxu0 %v3109_v41 }
  0x27   :  { %973 = vmatpush.msra.mxu0 %v3121_v43 }
  0x29   :  { %974 = vmatpush.msra.mxu0 %v3134_v45 }
  0x8c   :  { %v206_v53 = vpop.f32.mrf.mxu2 }
  0x90   :  { %v148_v16 = vpop.f32.mrf.mxu1 }
  0x97   :  { %v105_v15 = vpop.f32.mrf.mxu0 }
  0x98   :  { %v3087_v17 = vadd.f32 %v3084_v14, %v105_v15 }
  0x9a   :  { %v151_v18 = vadd.f32 %v148_v16, %v3087_v17 }
  0x9c   :  { %2712 = vtanh.f32 %v151_v18  ;;  %v2556_v20 = vmul.f32 -1.442695, %v151_v18 }
  0x9e   :  { %2714 = vpow2.f32 %v2556_v20 }
  0xa2   :  { %v2713_v19 = vpop.eup %2712 }
  0xa3   :  { %174 = vrot.lane.b32.xlu0 %v2713_v19, %s2918_s28 }
  0xa4   :  { %v2715_v21 = vpop.eup %2714 }
  0xa5   :  { %v155_v22 = vadd.f32 1.0, %v2715_v21 }
  0xa7   :  { %2716 = vrcp.f32 %v155_v22  ;;  %v167_v28 = vand.u32 2147483648, %v155_v22  ;;  %vm161_vm3 = vweird.f32 %v155_v22  ;;  %v165_v29 = vand.u32 2147483647, %v155_v22 }
  0xa9   :  { %v168_v31 = vor.u32 1.1754944e-38, %v167_v28  ;;  %vm166_vm5 = vcmp.eq.f32.partialorder %v165_v29, 8.507059e+37 }
  0xad   :  { %v2717_v23 = vpop.eup %2716 }
  0xae   :  { %v157_v24 = vmul.f32 %v2717_v23, %v155_v22  ;;  %vm162_vm2 = vweird.f32 %v2717_v23 }
  0xaf   :  { %vm163_vm4 = vmor %vm161_vm3, %vm162_vm2 }
  0xb0   :  { %v158_v25 = vsub.f32 1.0, %v157_v24 }
  0xb2   :  { %v159_v26 = vmul.f32 %v2717_v23, %v158_v25 }
  0xb4   :  { %v160_v27 = vadd.f32 %v2717_v23, %v159_v26 }
  0xb6   :  { %v164_v30 = vsel %vm163_vm4, %v2717_v23, %v160_v27 }
  0xb7   :  { %v169_v33 = vsel %vm166_vm5, %v168_v31, %v164_v30 }
  0xb8   :  { %v172_v35 = vmul.f32 0.0, %v169_v33 }
 0x115   :  { %v175_v32 = vpop.permute.xlu0 %174 }
 0x116   :  { %v177_v34 = vmul.f32 %v175_v32, %v169_v33 }
 0x118   :  { %179 = vrot.lane.b32.xlu0 %v177_v34, %s2919_s30 }
 0x18a   :  { %v180_v36 = vpop.permute.xlu0 %179 }
 0x18b   :  { %v3092_v37 = vadd.f32 %v180_v36, %v172_v35 }
 0x18d   :  { %2718 = vtanh.f32 %v3092_v37  ;;  %v326_v31 = vrot.slane %v3092_v37, 4 }
 0x193   :  { %v2719_v38 = vpop.eup %2718 }
 0x194   :  { %185 = vrot.lane.b32.xlu1 %v2719_v38, %s2918_s28 }
 0x206   :  { %v186_v47 = vpop.permute.xlu1 %185 }
 0x207   :  { %v188_v48 = vmul.f32 %v186_v47, %v169_v33 }
 0x209   :  { %210 = vrot.lane.b32.xlu1 %v188_v48, %s2919_s30 }
 0x27b   :  { %v211_v49 = vpop.permute.xlu1 %210 }
 0x27c   :  { %2557 = vmatmul.msk.f32.vlgmr.msra.gmra.mxu3 %vm127_vm6, %v211_v49  ;;  %2559 = vmatmul.msk.f32.vlgmr.msrb.gmra.mxu1 %vm127_vm6, %v211_v49 }
 0x27d   :  { %536 = vmatpush.msra.mxu3 %v3104_v40  ;;  %599 = vmatpush.msrb.mxu1 %v3028_v3 }
 0x27f   :  { %537 = vmatpush.msra.mxu3 %v3116_v42  ;;  %600 = vmatpush.msrb.mxu1 %v3033_v4 }
 0x281   :  { %538 = vmatpush.msra.mxu3 %v3126_v44  ;;  %601 = vmatpush.msrb.mxu1 %v3042_v6 }
 0x283   :  { %539 = vmatpush.msra.mxu3 %v3139_v46  ;;  %602 = vmatpush.msrb.mxu1 %v3051_v8 }
 0x2f9   :  { %v298_v50 = vpop.f32.mrf.mxu1 }
 0x2fa   :  { %v302_v51 = vrot.slane %v298_v50, 4 }
 0x2fc   :  { %v304_v52 = vadd.f32 %v302_v51, %v3087_v17  ;;  %v60_v51 = vld [vmem:[%s4824_s0 + $0x8] sm:$0xff] }
 0x2fd   :  { %2554 = vmatmul.msk.f32.gmra.mxu0 %vm74_vm1, %v60_v51 }
 0x2fe   :  { %2720 = vtanh.f32 %v304_v52  ;;  %v2560_v60 = vmul.f32 -1.442695, %v304_v52 }
 0x2ff   :  { %v231_v55 = vpop.f32.mrf.mxu3 }
 0x300   :  { %v232_v56 = vadd.f32 %v231_v55, %v206_v53 }
 0x302   :  { %v237_v57 = vadd.f32 %v3176_v54, %v232_v56 }
 0x304   :  { %v2721_v58 = vpop.eup %2720  ;;  %2722 = vtanh.f32 %v237_v57  ;;  %v2558_v61 = vmul.f32 -1.442695, %v237_v57 }
 0x305   :  { %330 = vrot.lane.b32.xlu2 %v2721_v58, %s2918_s28  ;;  %2724 = vpow2.f32 %v2560_v60 }
 0x306   :  { %2726 = vpow2.f32 %v2558_v61 }
 0x30a   :  { %v2723_v59 = vpop.eup %2722 }
 0x30b   :  { %v2725_v62 = vpop.eup %2724 }
 0x30c   :  { %v308_v63 = vadd.f32 1.0, %v2725_v62  ;;  %v2727_v0 = vpop.eup %2726 }
 0x30d   :  { %260 = vrot.lane.b32.xlu2 %v2723_v59, %s2918_s28  ;;  %v241_v1 = vadd.f32 1.0, %v2727_v0 }
 0x30e   :  { %2728 = vrcp.f32 %v308_v63  ;;  %v320_v15 = vand.u32 2147483648, %v308_v63  ;;  %vm314_vm8 = vweird.f32 %v308_v63  ;;  %v318_v16 = vand.u32 2147483647, %v308_v63 }
 0x30f   :  { %2730 = vrcp.f32 %v241_v1  ;;  %v253_v24 = vand.u32 2147483648, %v241_v1  ;;  %vm247_vm12 = vweird.f32 %v241_v1  ;;  %v251_v25 = vand.u32 2147483647, %v241_v1 }
 0x310   :  { %v321_v19 = vor.u32 1.1754944e-38, %v320_v15  ;;  %vm319_vm10 = vcmp.eq.f32.partialorder %v318_v16, 8.507059e+37 }
 0x311   :  { %v254_v27 = vor.u32 1.1754944e-38, %v253_v24  ;;  %vm252_vm14 = vcmp.eq.f32.partialorder %v251_v25, 8.507059e+37 }
 0x314   :  { %v2729_v2 = vpop.eup %2728 }
 0x315   :  { %v310_v5 = vmul.f32 %v2729_v2, %v308_v63  ;;  %v2731_v9 = vpop.eup %2730  ;;  %vm315_vm7 = vweird.f32 %v2729_v2 }
 0x316   :  { %v243_v11 = vmul.f32 %v2731_v9, %v241_v1  ;;  %vm316_vm9 = vmor %vm314_vm8, %vm315_vm7  ;;  %vm248_vm11 = vweird.f32 %v2731_v9 }
 0x317   :  { %v311_v7 = vsub.f32 1.0, %v310_v5  ;;  %vm249_vm13 = vmor %vm247_vm12, %vm248_vm11 }
 0x318   :  { %v244_v13 = vsub.f32 1.0, %v243_v11 }
 0x319   :  { %v312_v10 = vmul.f32 %v2729_v2, %v311_v7 }
 0x31a   :  { %v245_v18 = vmul.f32 %v2731_v9, %v244_v13 }
 0x31b   :  { %v313_v12 = vadd.f32 %v2729_v2, %v312_v10 }
 0x31c   :  { %v246_v23 = vadd.f32 %v2731_v9, %v245_v18 }
 0x31d   :  { %v317_v17 = vsel %vm316_vm9, %v2729_v2, %v313_v12 }
 0x31e   :  { %v322_v21 = vsel %vm319_vm10, %v321_v19, %v317_v17  ;;  %v250_v26 = vsel %vm249_vm13, %v2731_v9, %v246_v23 }
 0x31f   :  { %v255_v29 = vsel %vm252_vm14, %v254_v27, %v250_v26  ;;  %v328_v32 = vmul.f32 %v326_v31, %v322_v21 }
 0x320   :  { %v258_v35 = vmul.f32 0.0, %v255_v29 }
 0x35f   :  { %v331_v20 = vpop.permute.xlu2 %330 }
 0x360   :  { %v333_v22 = vmul.f32 %v331_v20, %v322_v21 }
 0x362   :  { %335 = vrot.lane.b32.xlu0 %v333_v22, %s2919_s30 }
 0x367   :  { %v261_v28 = vpop.permute.xlu2 %260 }
 0x368   :  { %v263_v30 = vmul.f32 %v261_v28, %v255_v29 }
 0x36a   :  { %265 = vrot.lane.b32.xlu1 %v263_v30, %s2919_s30 }
 0x37a   :  { %v108_v57 = vpop.f32.mrf.mxu0 }
 0x37b   :  { %v3215_v58 = vadd.f32 %v3084_v14, %v108_v57 }
 0x3d4   :  { %v336_v33 = vpop.permute.xlu0 %335 }
 0x3d5   :  { %v3184_v34 = vadd.f32 %v336_v33, %v328_v32 }
 0x3d7   :  { %2732 = vtanh.f32 %v3184_v34 }
 0x3dc   :  { %v266_v36 = vpop.permute.xlu1 %265 }
 0x3dd   :  { %v2733_v38 = vpop.eup %2732  ;;  %v3187_v47 = vadd.f32 %v266_v36, %v258_v35  ;;  %v478_v35 = vrot.slane %v3184_v34, 4 }
 0x3de   :  { %341 = vrot.lane.b32.xlu2 %v2733_v38, %s2918_s28 }
 0x3df   :  { %2734 = vtanh.f32 %v3187_v47 }
 0x3e5   :  { %v2735_v48 = vpop.eup %2734 }
 0x3e6   :  { %271 = vrot.lane.b32.xlu0 %v2735_v48, %s2918_s28 }
 0x438   :  { %v342_v49 = vpop.permute.xlu2 %341 }
 0x439   :  { %v344_v37 = vmul.f32 %v342_v49, %v322_v21 }
 0x43b   :  { %v368_v50 = vrot.slane %v344_v37, 4 }
 0x43d   :  { %369 = vrot.lane.b32.xlu2 %v368_v50, %s2919_s30 }
 0x458   :  { %v272_v52 = vpop.permute.xlu0 %271 }
 0x459   :  { %v274_v53 = vmul.f32 %v272_v52, %v255_v29 }
 0x45b   :  { %276 = vrot.lane.b32.xlu1 %v274_v53, %s2919_s30 }
 0x497   :  { %v370_v55 = vpop.permute.xlu2 %369 }
 0x498   :  { %2562 = vmatmul.msk.f32.vlgmr.msrb.gmra.mxu3 %vm127_vm6, %v370_v55  ;;  %2564 = vmatmul.msk.f32.vlgmr.msra.gmra.mxu1 %vm127_vm6, %v370_v55 }
 0x499   :  { %691 = vmatpush.msrb.mxu3 %v3104_v40  ;;  %817 = vmatpush.msra.mxu1 %v3099_v39 }
 0x49b   :  { %692 = vmatpush.msrb.mxu3 %v3116_v42  ;;  %818 = vmatpush.msra.mxu1 %v3109_v41 }
 0x49d   :  { %693 = vmatpush.msrb.mxu3 %v3126_v44  ;;  %819 = vmatpush.msra.mxu1 %v3121_v43 }
 0x49f   :  { %694 = vmatpush.msrb.mxu3 %v3139_v46  ;;  %820 = vmatpush.msra.mxu1 %v3134_v45 }
 0x4cd   :  { %v277_v56 = vpop.permute.xlu1 %276 }
 0x4ce   :  { %280 = vst.msk [vmem:[#allocation2] sm:$0xf] %vm279_vm15, %v277_v56  ;;  %2561 = vmatmul.msk.f32.vlgmr.msrb.gmra.mxu2 %vm127_vm6, %v277_v56 }
 0x4cf   :  { %665 = vmatpush.msrb.mxu2 %v3099_v39 }
 0x4d1   :  { %666 = vmatpush.msrb.mxu2 %v3109_v41 }
 0x4d3   :  { %667 = vmatpush.msrb.mxu2 %v3121_v43 }
 0x4d5   :  { %668 = vmatpush.msrb.mxu2 %v3134_v45 }
 0x515   :  { %v453_v59 = vpop.f32.mrf.mxu1 }
 0x516   :  { %v456_v60 = vadd.f32 %v453_v59, %v3215_v58 }
 0x518   :  { %2736 = vtanh.f32 %v456_v60  ;;  %v2565_v45 = vmul.f32 -1.442695, %v456_v60 }
 0x51b   :  { %v390_v62 = vpop.f32.mrf.mxu3 }
 0x51e   :  { %v2737_v61 = vpop.eup %2736 }
 0x51f   :  { %482 = vrot.lane.b32.xlu1 %v2737_v61, %s2918_s28 }
 0x551   :  { %v364_v63 = vpop.f32.mrf.mxu2 }
 0x552   :  { %v391_v39 = vadd.f32 %v390_v62, %v364_v63 }
 0x554   :  { %v393_v41 = vadd.f32 %v3176_v54, %v391_v39 }
 0x556   :  { %2738 = vtanh.f32 %v393_v41  ;;  %v2563_v19 = vmul.f32 -1.442695, %v393_v41 }
 0x557   :  { %2740 = vpow2.f32 %v2565_v45 }
 0x55c   :  { %v2739_v43 = vpop.eup %2738 }
 0x55d   :  { %416 = vrot.lane.b32.xlu0 %v2739_v43, %s2918_s28  ;;  %v2741_v0 = vpop.eup %2740 }
 0x55e   :  { %v460_v1 = vadd.f32 1.0, %v2741_v0 }
 0x560   :  { %2742 = vrcp.f32 %v460_v1  ;;  %v472_v11 = vand.u32 2147483648, %v460_v1  ;;  %vm466_vm3 = vweird.f32 %v460_v1  ;;  %v470_v12 = vand.u32 2147483647, %v460_v1 }
 0x561   :  { %2744 = vpow2.f32 %v2563_v19 }
 0x562   :  { %v473_v15 = vor.u32 1.1754944e-38, %v472_v11  ;;  %vm471_vm5 = vcmp.eq.f32.partialorder %v470_v12, 8.507059e+37 }
 0x566   :  { %v2743_v2 = vpop.eup %2742 }
 0x567   :  { %v462_v5 = vmul.f32 %v2743_v2, %v460_v1  ;;  %vm467_vm2 = vweird.f32 %v2743_v2  ;;  %v2745_v20 = vpop.eup %2744 }
 0x568   :  { %vm468_vm4 = vmor %vm466_vm3, %vm467_vm2  ;;  %v397_v21 = vadd.f32 1.0, %v2745_v20 }
 0x569   :  { %v463_v7 = vsub.f32 1.0, %v462_v5 }
 0x56a   :  { %2746 = vrcp.f32 %v397_v21  ;;  %v409_v27 = vand.u32 2147483648, %v397_v21  ;;  %vm403_vm8 = vweird.f32 %v397_v21  ;;  %v407_v28 = vand.u32 2147483647, %v397_v21 }
 0x56b   :  { %v464_v9 = vmul.f32 %v2743_v2, %v463_v7 }
 0x56c   :  { %v410_v30 = vor.u32 1.1754944e-38, %v409_v27  ;;  %vm408_vm10 = vcmp.eq.f32.partialorder %v407_v28, 8.507059e+37 }
 0x56d   :  { %v465_v10 = vadd.f32 %v2743_v2, %v464_v9 }
 0x56f   :  { %v469_v13 = vsel %vm468_vm4, %v2743_v2, %v465_v10 }
 0x570   :  { %v474_v16 = vsel %vm471_vm5, %v473_v15, %v469_v13  ;;  %v2747_v22 = vpop.eup %2746 }
 0x571   :  { %v399_v23 = vmul.f32 %v2747_v22, %v397_v21  ;;  %vm404_vm7 = vweird.f32 %v2747_v22  ;;  %v480_v36 = vmul.f32 %v478_v35, %v474_v16 }
 0x572   :  { %vm405_vm9 = vmor %vm403_vm8, %vm404_vm7 }
 0x573   :  { %v400_v24 = vsub.f32 1.0, %v399_v23 }
 0x575   :  { %v401_v25 = vmul.f32 %v2747_v22, %v400_v24 }
 0x577   :  { %v402_v26 = vadd.f32 %v2747_v22, %v401_v25 }
 0x579   :  { %v406_v29 = vsel %vm405_vm9, %v2747_v22, %v402_v26 }
 0x57a   :  { %v411_v32 = vsel %vm408_vm10, %v410_v30, %v406_v29 }
 0x57b   :  { %v414_v37 = vmul.f32 %v411_v32, %v3187_v47 }
 0x591   :  { %v483_v17 = vpop.permute.xlu1 %482 }
 0x592   :  { %v485_v18 = vmul.f32 %v483_v17, %v474_v16 }
 0x594   :  { %487 = vrot.lane.b32.xlu0 %v485_v18, %s2919_s30 }
 0x5cf   :  { %v417_v31 = vpop.permute.xlu0 %416 }
 0x5d0   :  { %v419_v33 = vmul.f32 %v417_v31, %v411_v32 }
 0x5d2   :  { %421 = vrot.lane.b32.xlu2 %v419_v33, %s2919_s30 }
 0x606   :  { %v488_v38 = vpop.permute.xlu0 %487 }
 0x607   :  { %v3224_v48 = vadd.f32 %v488_v38, %v480_v36 }
 0x609   :  { %2748 = vtanh.f32 %v3224_v48  ;;  %v632_v26 = vrot.slane %v3224_v48, 4 }
 0x60f   :  { %v2749_v49 = vpop.eup %2748 }
 0x610   :  { %493 = vrot.lane.b32.xlu2 %v2749_v49, %s2918_s28  ;;  %v61_v49 = vld [vmem:[%s4824_s0 + $0x10] sm:$0xff] }
 0x611   :  { %2555 = vmatmul.msk.f32.gmra.mxu0 %vm74_vm1, %v61_v49  ;;  %v1053_v49 = vld [vmem:[%s4829_s10 + $0x10] sm:$0xff] }
 0x62c   :  { %v422_v50 = vpop.permute.xlu2 %421 }
 0x62d   :  { %v3229_v51 = vadd.f32 %v422_v50, %v414_v37 }
 0x62f   :  { %2750 = vtanh.f32 %v3229_v51 }
 0x635   :  { %v2751_v52 = vpop.eup %2750 }
 0x636   :  { %427 = vrot.lane.b32.xlu1 %v2751_v52, %s2918_s28 }
 0x66a   :  { %v494_v34 = vpop.permute.xlu2 %493 }
 0x66b   :  { %v496_v53 = vmul.f32 %v494_v34, %v474_v16 }
 0x66d   :  { %520 = vrot.lane.b32.xlu1 %v496_v53, %s2919_s30 }
 0x68e   :  { %v111_v34 = vpop.f32.mrf.mxu0 }
 0x68f   :  { %v3278_v53 = vadd.f32 %v3084_v14, %v111_v34  ;;  %v1121_v34 = vld [vmem:[%s4828_s14] sm:$0xff] }
 0x6a8   :  { %v428_v55 = vpop.permute.xlu1 %427 }
 0x6a9   :  { %v430_v56 = vmul.f32 %v428_v55, %v411_v32 }
 0x6ab   :  { %432 = vrot.lane.b32.xlu0 %v430_v56, %s2919_s30 }
 0x6df   :  { %v521_v57 = vpop.permute.xlu1 %520 }
 0x6e0   :  { %2567 = vmatmul.msk.f32.vlgmr.msra.gmra.mxu3 %vm127_vm6, %v521_v57  ;;  %2569 = vmatmul.msk.f32.vlgmr.msrb.gmra.mxu1 %vm127_vm6, %v521_v57 }
 0x6e1   :  { %905 = vmatpush.msra.mxu3 %v3028_v3  ;;  %997 = vmatpush.msrb.mxu1 %v3104_v40 }
 0x6e3   :  { %906 = vmatpush.msra.mxu3 %v3033_v4  ;;  %998 = vmatpush.msrb.mxu1 %v3116_v42 }
 0x6e5   :  { %907 = vmatpush.msra.mxu3 %v3042_v6  ;;  %999 = vmatpush.msrb.mxu1 %v3126_v44 }
 0x6e7   :  { %908 = vmatpush.msra.mxu3 %v3051_v8  ;;  %1000 = vmatpush.msrb.mxu1 %v3139_v46 }
 0x71d   :  { %v433_v47 = vpop.permute.xlu0 %432 }
 0x71e   :  { %435 = vst.msk [vmem:[#allocation2 + $0x4] sm:$0xf] %vm279_vm15, %v433_v47  ;;  %2566 = vmatmul.msk.f32.vlgmr.msra.gmra.mxu2 %vm127_vm6, %v433_v47 }
 0x71f   :  { %842 = vmatpush.msra.mxu2 %v3104_v40 }
 0x721   :  { %843 = vmatpush.msra.mxu2 %v3116_v42 }
 0x723   :  { %844 = vmatpush.msra.mxu2 %v3126_v44 }
 0x725   :  { %845 = vmatpush.msra.mxu2 %v3139_v46 }
 0x75d   :  { %v604_v3 = vpop.f32.mrf.mxu1 }
 0x75e   :  { %v608_v4 = vrot.slane %v604_v3, 4 }
 0x760   :  { %v610_v6 = vadd.f32 %v608_v4, %v3215_v58 }
 0x762   :  { %2752 = vtanh.f32 %v610_v6  ;;  %v2570_v59 = vmul.f32 -1.442695, %v610_v6 }
 0x763   :  { %v541_v61 = vpop.f32.mrf.mxu3 }
 0x764   :  { %2754 = vpow2.f32 %v2570_v59 }
 0x768   :  { %v2753_v8 = vpop.eup %2752 }
 0x769   :  { %636 = vrot.lane.b32.xlu2 %v2753_v8, %s2918_s28 }
 0x76a   :  { %v2755_v60 = vpop.eup %2754 }
 0x76b   :  { %v614_v63 = vadd.f32 1.0, %v2755_v60 }
 0x76d   :  { %v626_v45 = vand.u32 2147483648, %v614_v63  ;;  %vm620_vm12 = vweird.f32 %v614_v63  ;;  %v624_v0 = vand.u32 2147483647, %v614_v63 }
 0x76f   :  { %v627_v2 = vor.u32 1.1754944e-38, %v626_v45  ;;  %vm625_vm14 = vcmp.eq.f32.partialorder %v624_v0, 8.507059e+37 }
 0x7a1   :  { %v516_v62 = vpop.f32.mrf.mxu2 }
 0x7a2   :  { %v542_v40 = vadd.f32 %v541_v61, %v516_v62 }
 0x7a4   :  { %v544_v42 = vadd.f32 %v3176_v54, %v542_v40 }
 0x7a6   :  { %2756 = vtanh.f32 %v544_v42  ;;  %v2568_v10 = vmul.f32 -1.442695, %v544_v42 }
 0x7a7   :  { %2758 = vrcp.f32 %v614_v63 }
 0x7a8   :  { %2760 = vpow2.f32 %v2568_v10 }
 0x7ac   :  { %v2757_v44 = vpop.eup %2756 }
 0x7ad   :  { %v2759_v46 = vpop.eup %2758  ;;  %567 = vrot.lane.b32.xlu0 %v2757_v44, %s2918_s28 }
 0x7ae   :  { %v616_v58 = vmul.f32 %v2759_v46, %v614_v63  ;;  %vm621_vm11 = vweird.f32 %v2759_v46  ;;  %v2761_v11 = vpop.eup %2760 }
 0x7af   :  { %vm622_vm13 = vmor %vm620_vm12, %vm621_vm11  ;;  %v548_v12 = vadd.f32 1.0, %v2761_v11 }
 0x7b0   :  { %v617_v39 = vsub.f32 1.0, %v616_v58 }
 0x7b1   :  { %2762 = vrcp.f32 %v548_v12  ;;  %v560_v19 = vand.u32 2147483648, %v548_v12  ;;  %vm554_vm3 = vweird.f32 %v548_v12  ;;  %v558_v20 = vand.u32 2147483647, %v548_v12 }
 0x7b2   :  { %v618_v41 = vmul.f32 %v2759_v46, %v617_v39 }
 0x7b3   :  { %v561_v22 = vor.u32 1.1754944e-38, %v560_v19  ;;  %vm559_vm5 = vcmp.eq.f32.partialorder %v558_v20, 8.507059e+37 }
 0x7b4   :  { %v619_v43 = vadd.f32 %v2759_v46, %v618_v41 }
 0x7b6   :  { %v623_v1 = vsel %vm622_vm13, %v2759_v46, %v619_v43 }
 0x7b7   :  { %v628_v7 = vsel %vm625_vm14, %v627_v2, %v623_v1  ;;  %v2763_v13 = vpop.eup %2762  ;;  %vm1132_vm14 = vcmask 424960  }
 0x7b8   :  { %v550_v15 = vmul.f32 %v2763_v13, %v548_v12  ;;  %vm555_vm2 = vweird.f32 %v2763_v13  ;;  %v634_v27 = vmul.f32 %v632_v26, %v628_v7 }
 0x7b9   :  { %vm556_vm4 = vmor %vm554_vm3, %vm555_vm2 }
 0x7ba   :  { %v551_v16 = vsub.f32 1.0, %v550_v15 }
 0x7bc   :  { %v552_v17 = vmul.f32 %v2763_v13, %v551_v16 }
 0x7be   :  { %v553_v18 = vadd.f32 %v2763_v13, %v552_v17 }
 0x7c0   :  { %v557_v21 = vsel %vm556_vm4, %v2763_v13, %v553_v18 }
 0x7c1   :  { %v562_v24 = vsel %vm559_vm5, %v561_v22, %v557_v21 }
 0x7c2   :  { %v565_v31 = vmul.f32 %v562_v24, %v3229_v51 }
 0x7c3   :  { %v637_v5 = vpop.permute.xlu2 %636 }
 0x7c4   :  { %v639_v9 = vmul.f32 %v637_v5, %v628_v7 }
 0x7c6   :  { %641 = vrot.lane.b32.xlu1 %v639_v9, %s2919_s30 }
 0x81f   :  { %v568_v23 = vpop.permute.xlu0 %567 }
 0x820   :  { %v570_v25 = vmul.f32 %v568_v23, %v562_v24 }
 0x822   :  { %572 = vrot.lane.b32.xlu2 %v570_v25, %s2919_s30 }
 0x838   :  { %v642_v28 = vpop.permute.xlu1 %641 }
 0x839   :  { %v3258_v29 = vadd.f32 %v642_v28, %v634_v27 }
 0x83b   :  { %2764 = vtanh.f32 %v3258_v29  ;;  %v784_v20 = vrot.slane %v3258_v29, 4 }
 0x841   :  { %v2765_v30 = vpop.eup %2764 }
 0x842   :  { %647 = vrot.lane.b32.xlu0 %v2765_v30, %s2918_s28 }
 0x87c   :  { %v573_v32 = vpop.permute.xlu2 %572 }
 0x87d   :  { %v3263_v33 = vadd.f32 %v573_v32, %v565_v31  ;;  %v1127_v31 = vld [vmem:[%s4828_s14 + $0x30] sm:$0xf]  ;;  %v1126_v32 = vld [vmem:[%s4828_s14 + $0x28] sm:$0xff] }
 0x87f   :  { %2766 = vtanh.f32 %v3263_v33 }
 0x885   :  { %v2767_v35 = vpop.eup %2766 }
 0x886   :  { %578 = vrot.lane.b32.xlu1 %v2767_v35, %s2918_s28 }
 0x8b4   :  { %v648_v36 = vpop.permute.xlu0 %647 }
 0x8b5   :  { %v650_v38 = vmul.f32 %v648_v36, %v628_v7 }
 0x8b7   :  { %v674_v48 = vrot.slane %v650_v38, 4  ;;  %v1054_v38 = vld [vmem:[%s4829_s10 + $0x18] sm:$0xff] }
 0x8b9   :  { %675 = vrot.lane.b32.xlu0 %v674_v48, %s2919_s30  ;;  %v1124_v48 = vld [vmem:[%s4828_s14 + $0x18] sm:$0xff] }
 0x8f8   :  { %v579_v37 = vpop.permute.xlu1 %578 }
 0x8f9   :  { %v581_v50 = vmul.f32 %v579_v37, %v562_v24  ;;  %v1123_v37 = vld [vmem:[%s4828_s14 + $0x10] sm:$0xff] }
 0x8fb   :  { %583 = vrot.lane.b32.xlu2 %v581_v50, %s2919_s30  ;;  %v1052_v50 = vld [vmem:[%s4829_s10 + $0x8] sm:$0xff] }
 0x92b   :  { %v676_v51 = vpop.permute.xlu0 %675 }
 0x92c   :  { %2572 = vmatmul.msk.f32.vlgmr.msrb.gmra.mxu3 %vm127_vm6, %v676_v51  ;;  %2574 = vmatmul.msk.f32.vlgmr.msrb.gmra.mxu0 %vm127_vm6, %v676_v51  ;;  %v1122_v51 = vld [vmem:[%s4828_s14 + $0x8] sm:$0xff] }
 0x92d   :  { %2685 = vmatpush.msk.msrb.mxu3 %vm84_vm0, %v1127_v31 }
 0x92f   :  { %2686 = vmatpush.msrb.mxu3 %v1126_v32 }
 0x955   :  { %v584_v52 = vpop.permute.xlu2 %583 }
 0x956   :  { %586 = vst.msk [vmem:[#allocation2 + $0x8] sm:$0xf] %vm279_vm15, %v584_v52  ;;  %2571 = vmatmul.msk.f32.vlgmr.msrb.gmra.mxu2 %vm127_vm6, %v584_v52  ;;  %v1051_v52 = vld [vmem:[%s4829_s10] sm:$0xff] }
 0x957   :  { %1080 = vmatpush.msrb.mxu2 %v1054_v38 }
 0x959   :  { %1081 = vmatpush.msrb.mxu2 %v1053_v49 }
 0x95b   :  { %1082 = vmatpush.msrb.mxu2 %v1052_v50 }
 0x95d   :  { %1083 = vmatpush.msrb.mxu2 %v1051_v52 }
 0x9a9   :  { %v759_v55 = vpop.f32.mrf.mxu0 }
 0x9aa   :  { %v762_v56 = vadd.f32 %v759_v55, %v3278_v53 }
 0x9ac   :  { %2768 = vtanh.f32 %v762_v56  ;;  %v2575_v59 = vmul.f32 -1.442695, %v762_v56  ;;  %v3338_v56 = vld [vmem:[%s4830_s2 + $0x28] sm:$0xff] }
 0x9af   :  { %v696_v47 = vpop.f32.mrf.mxu3 }
 0x9b2   :  { %v2769_v57 = vpop.eup %2768 }
 0x9b3   :  { %788 = vrot.lane.b32.xlu1 %v2769_v57, %s2918_s28  ;;  %v1048_v57 = vld [vmem:[#allocation2] sm:$0xff] }
 0x9d9   :  { %v670_v3 = vpop.f32.mrf.mxu2 }
 0x9da   :  { %v697_v4 = vadd.f32 %v696_v47, %v670_v3  ;;  %v3346_v47 = vld [vmem:[%s4830_s2 + $0x30] sm:$0xff]  ;;  %v3353_v3 = vld [vmem:[%s4830_s2 + $0x38] sm:$0xff] }
 0x9dc   :  { %v699_v6 = vadd.f32 %v3176_v54, %v697_v4 }
 0x9de   :  { %2770 = vtanh.f32 %v699_v6  ;;  %v2573_v62 = vmul.f32 -1.442695, %v699_v6  ;;  %v3362_v6 = vld [vmem:[%s4830_s2 + $0x40] sm:$0xff] }
 0x9df   :  { %2772 = vpow2.f32 %v2575_v59  ;;  %v3370_v59 = vld [vmem:[%s4830_s2 + $0x48] sm:$0xff] }
 0x9e4   :  { %v2771_v8 = vpop.eup %2770 }
 0x9e5   :  { %722 = vrot.lane.b32.xlu2 %v2771_v8, %s2918_s28  ;;  %v2773_v14 = vpop.eup %2772 }
 0x9e6   :  { %v766_v60 = vadd.f32 1.0, %v2773_v14  ;;  %v3377_v14 = vld [vmem:[%s4830_s2 + $0x50] sm:$0xff] }
 0x9e8   :  { %2774 = vrcp.f32 %v766_v60  ;;  %v778_v39 = vand.u32 2147483648, %v766_v60  ;;  %vm772_vm7 = vweird.f32 %v766_v60  ;;  %v776_v41 = vand.u32 2147483647, %v766_v60 }
 0x9e9   :  { %2776 = vpow2.f32 %v2573_v62  ;;  %v3398_v62 = vld [vmem:[%s4830_s2 + $0x68] sm:$0xff] }
 0x9ea   :  { %v779_v45 = vor.u32 1.1754944e-38, %v778_v39  ;;  %vm777_vm9 = vcmp.eq.f32.partialorder %v776_v41, 8.507059e+37  ;;  %v3420_v39 = vld [vmem:[%s4831_s11] ss:$0 sm:$0xff] }
 0x9ee   :  { %v2775_v61 = vpop.eup %2774 }
 0x9ef   :  { %v768_v40 = vmul.f32 %v2775_v61, %v766_v60  ;;  %v2777_v44 = vpop.eup %2776  ;;  %vm773_vm1 = vweird.f32 %v2775_v61  ;;  %v3384_v60 = vld [vmem:[%s4830_s2 + $0x58] sm:$0xff] }
 0x9f0   :  { %v703_v58 = vadd.f32 1.0, %v2777_v44  ;;  %vm774_vm8 = vmor %vm772_vm7, %vm773_vm1 }
 0x9f1   :  { %v769_v63 = vsub.f32 1.0, %v768_v40  ;;  %v3405_v40 = vld [vmem:[%s4830_s2 + $0x70] sm:$0xff] }
 0x9f2   :  { %2778 = vrcp.f32 %v703_v58  ;;  %v715_v12 = vand.u32 2147483648, %v703_v58  ;;  %vm709_vm11 = vweird.f32 %v703_v58  ;;  %v713_v13 = vand.u32 2147483647, %v703_v58 }
 0x9f3   :  { %v770_v42 = vmul.f32 %v2775_v61, %v769_v63  ;;  %v3412_v63 = vld [vmem:[%s4830_s2 + $0x78] sm:$0xff] }
 0x9f4   :  { %v716_v16 = vor.u32 1.1754944e-38, %v715_v12  ;;  %vm714_vm13 = vcmp.eq.f32.partialorder %v713_v13, 8.507059e+37 }
 0x9f5   :  { %v771_v46 = vadd.f32 %v2775_v61, %v770_v42 }
 0x9f7   :  { %v775_v43 = vsel %vm774_vm8, %v2775_v61, %v771_v46  ;;  %v3391_v61 = vld [vmem:[%s4830_s2 + $0x60] sm:$0xff] }
 0x9f8   :  { %v780_v0 = vsel %vm777_vm9, %v779_v45, %v775_v43  ;;  %v2779_v5 = vpop.eup %2778 }
 0x9f9   :  { %v705_v7 = vmul.f32 %v2779_v5, %v703_v58  ;;  %vm710_vm10 = vweird.f32 %v2779_v5  ;;  %v786_v21 = vmul.f32 %v784_v20, %v780_v0 }
 0x9fa   :  { %vm711_vm12 = vmor %vm709_vm11, %vm710_vm10 }
 0x9fb   :  { %v706_v9 = vsub.f32 1.0, %v705_v7 }
 0x9fd   :  { %v707_v10 = vmul.f32 %v2779_v5, %v706_v9 }
 0x9ff   :  { %v708_v11 = vadd.f32 %v2779_v5, %v707_v10 }
 0xa01   :  { %v712_v15 = vsel %vm711_vm12, %v2779_v5, %v708_v11 }
 0xa02   :  { %v717_v18 = vsel %vm714_vm13, %v716_v16, %v712_v15 }
 0xa03   :  { %v720_v25 = vmul.f32 %v717_v18, %v3263_v33  ;;  %v1125_v33 = vld [vmem:[%s4828_s14 + $0x20] sm:$0xff] }
 0xa04   :  { %2687 = vmatpush.msrb.mxu3 %v1125_v33 }
 0xa06   :  { %2688 = vmatpush.msrb.mxu3 %v1124_v48 }
 0xa08   :  { %2689 = vmatpush.msrb.mxu3 %v1123_v37 }
 0xa0a   :  { %2690 = vmatpush.msrb.mxu3 %v1122_v51 }
 0xa0c   :  { %2691 = vmatpush.msrb.mxu3 %v1121_v34 }
 0xa25   :  { %v789_v1 = vpop.permute.xlu1 %788 }
 0xa26   :  { %v791_v2 = vmul.f32 %v789_v1, %v780_v0 }
 0xa28   :  { %793 = vrot.lane.b32.xlu0 %v791_v2, %s2919_s30 }
 0xa3f   :  { %v723_v17 = vpop.permute.xlu2 %722 }
 0xa40   :  { %v725_v19 = vmul.f32 %v723_v17, %v717_v18 }
 0xa42   :  { %727 = vrot.lane.b32.xlu1 %v725_v19, %s2919_s30 }
 0xa9a   :  { %v794_v22 = vpop.permute.xlu0 %793 }
 0xa9b   :  { %v3287_v23 = vadd.f32 %v794_v22, %v786_v21 }
 0xa9d   :  { %2780 = vtanh.f32 %v3287_v23 }
 0xaa3   :  { %v2781_v24 = vpop.eup %2780 }
 0xaa4   :  { %799 = vrot.lane.b32.xlu2 %v2781_v24, %s2918_s28 }
 0xab4   :  { %v728_v26 = vpop.permute.xlu1 %727 }
 0xab5   :  { %v3292_v27 = vadd.f32 %v728_v26, %v720_v25 }
 0xab7   :  { %2782 = vtanh.f32 %v3292_v27 }
 0xabd   :  { %v2783_v28 = vpop.eup %2782 }
 0xabe   :  { %733 = vrot.lane.b32.xlu0 %v2783_v28, %s2918_s28 }
 0xafe   :  { %v800_v29 = vpop.permute.xlu2 %799 }
 0xaff   :  { %v802_v30 = vmul.f32 %v800_v29, %v780_v0  ;;  %v3426_v0 = vld [vmem:[%s4832_s15] ss:$0 sm:$0xff] }
 0xb01   :  { %826 = vrot.lane.b32.xlu1 %v802_v30, %s2919_s30 }
 0xb30   :  { %v734_v35 = vpop.permute.xlu0 %733 }
 0xb31   :  { %v736_v36 = vmul.f32 %v734_v35, %v717_v18 }
 0xb33   :  { %738 = vrot.lane.b32.xlu2 %v736_v36, %s2919_s30 }
 0xb73   :  { %v827_v55 = vpop.permute.xlu1 %826 }
 0xb74   :  { %2577 = vmatmul.msk.f32.vlgmr.msra.gmra.mxu2 %vm127_vm6, %v827_v55  ;;  %2579 = vmatmul.msk.f32.vlgmr.msra.gmra.mxu3 %vm127_vm6, %v827_v55 }
 0xb75   :  { %2587 = vmatpush.msk.msra.mxu2 %vm84_vm0, %v1127_v31 }
 0xb77   :  { %1218 = vmatpush.msra.mxu2 %v1126_v32 }
 0xb79   :  { %1219 = vmatpush.msra.mxu2 %v1125_v33 }
 0xb7b   :  { %1220 = vmatpush.msra.mxu2 %v1124_v48 }
 0xb7c   :  { %2584 = vmatmul.msk.f32.vlgmr.msrb.gmra.mxu2 %vm127_vm6, %v1048_v57  ;;  %2593 = vmatmul.msk.f32.vlgmr.msrb.gmra.mxu3 %vm1132_vm14, %v3338_v56 }
 0xb7d   :  { %1221 = vmatpush.msra.mxu2 %v1123_v37 }
 0xb7f   :  { %1222 = vmatpush.msra.mxu2 %v1122_v51 }
 0xb81   :  { %1223 = vmatpush.msra.mxu2 %v1121_v34 }
 0xb84   :  { %2594 = vmatmul.msk.f32.gmra.mxu3 %vm1132_vm14, %v3346_v47 }
 0xb8c   :  { %2595 = vmatmul.msk.f32.gmra.mxu3 %vm1132_vm14, %v3353_v3 }
 0xb8d   :  { %v739_v4 = vpop.permute.xlu2 %738 }
 0xb8e   :  { %741 = vst.msk [vmem:[#allocation2 + $0xc] sm:$0xf] %vm279_vm15, %v739_v4  ;;  %2576 = vmatmul.msk.f32.vlgmr.msra.gmra.mxu1 %vm127_vm6, %v739_v4 }
 0xb94   :  { %2596 = vmatmul.msk.f32.gmra.mxu3 %vm1132_vm14, %v3362_v6 }
 0xb95   :  { %v1049_v8 = vld [vmem:[#allocation2 + $0x8] sm:$0xff] }
 0xb96   :  { %2585 = vmatmul.msk.f32.gmra.mxu2 %vm127_vm6, %v1049_v8 }
 0xb9c   :  { %2597 = vmatmul.msk.f32.gmra.mxu3 %vm1132_vm14, %v3370_v59 }
 0xba4   :  { %2598 = vmatmul.msk.f32.gmra.mxu3 %vm1132_vm14, %v3377_v14 }
 0xbac   :  { %2599 = vmatmul.msk.f32.gmra.mxu3 %vm1132_vm14, %v3384_v60 }
 0xbb4   :  { %2600 = vmatmul.msk.f32.gmra.mxu3 %vm1132_vm14, %v3391_v61 }
 0xbbc   :  { %2601 = vmatmul.msk.f32.gmra.mxu3 %vm1132_vm14, %v3398_v62 }
 0xbc4   :  { %2602 = vmatmul.msk.f32.gmra.mxu3 %vm1132_vm14, %v3405_v40 }
 0xbcc   :  { %2603 = vmatmul.msk.f32.gmra.mxu3 %vm1132_vm14, %v3412_v63 }
 0xbf7   :  { %v847_v42 = vpop.f32.mrf.mxu2  ;;  %v910_v44 = vpop.f32.mrf.mxu3 }
 0xbf8   :  { %v914_v46 = vrot.slane %v910_v44, 4 }
 0xbfa   :  { %v916_v58 = vadd.f32 %v914_v46, %v3278_v53 }
 0xbfc   :  { %2784 = vtanh.f32 %v916_v58  ;;  %v2580_v49 = vmul.f32 -1.442695, %v916_v58 }
 0xbff   :  { %v1085_v41 = vpop.f32.mrf.mxu2  ;;  %v1240_v43 = vpop.f32.mrf.mxu3 }
 0xc00   :  { %v1086_v45 = vadd.f32 %v3420_v39, %v1085_v41  ;;  %v1241_v53 = vadd.f32 %v3426_v0, %v1240_v43 }
 0xc02   :  { %v2785_v1 = vpop.eup %2784  ;;  %v3428_v2 = vmax.f32 %v1086_v45, 0.0 }
 0xc03   :  { %942 = vrot.lane.b32.xlu0 %v2785_v1, %s2918_s28 }
 0xc04   :  { %v1304_v5 = vrot.slane %v3428_v2, 5  ;;  %v1305_v7 = vrot.slane %v3428_v2, 6  ;;  %v1306_v18 = vrot.slane %v3428_v2, 7 }
 0xc06   :  { %v1326_v9 = vperm.slane %v1304_v5, 0  ;;  %v1327_v13 = vperm.slane %v1305_v7, 0  ;;  %v1328_v22 = vperm.slane %v1306_v18, 0 }
 0xc07   :  { %v1243_v10 = vpop.f32.mrf.mxu3 }
 0xc08   :  { %v1244_v11 = vadd.f32 %v3426_v0, %v1243_v10  ;;  %v3435_v12 = vmul.f32 %v1326_v9, %v1241_v53 }
 0xc0a   :  { %v3437_v15 = vmul.f32 %v1327_v13, %v1244_v11 }
 0xc0b   :  { %v822_v16 = vpop.f32.mrf.mxu1 }
 0xc0c   :  { %v848_v17 = vadd.f32 %v847_v42, %v822_v16 }
 0xc0e   :  { %v850_v19 = vadd.f32 %v3176_v54, %v848_v17 }
 0xc0f   :  { %v1246_v20 = vpop.f32.mrf.mxu3 }
 0xc10   :  { %2786 = vtanh.f32 %v850_v19  ;;  %v1247_v21 = vadd.f32 %v3426_v0, %v1246_v20  ;;  %v2578_v51 = vmul.f32 -1.442695, %v850_v19 }
 0xc11   :  { %2788 = vpow2.f32 %v2580_v49 }
 0xc12   :  { %v3442_v24 = vmul.f32 %v1328_v22, %v1247_v21  ;;  %v938_v21 = vrot.slane %v3287_v23, 4 }
 0xc16   :  { %v2787_v25 = vpop.eup %2786 }
 0xc17   :  { %v1249_v26 = vpop.f32.mrf.mxu3  ;;  %873 = vrot.lane.b32.xlu1 %v2787_v25, %s2918_s28  ;;  %v2789_v37 = vpop.eup %2788 }
 0xc18   :  { %v1250_v31 = vadd.f32 %v3426_v0, %v1249_v26  ;;  %v920_v50 = vadd.f32 1.0, %v2789_v37 }
 0xc19   :  { %v1088_v28 = vpop.f32.mrf.mxu2 }
 0xc1a   :  { %v1089_v29 = vadd.f32 %v3420_v39, %v1088_v28  ;;  %2790 = vrcp.f32 %v920_v50  ;;  %v932_v44 = vand.u32 2147483648, %v920_v50  ;;  %vm926_vm3 = vweird.f32 %v920_v50 }
 0xc1b   :  { %2792 = vpow2.f32 %v2578_v51  ;;  %v930_v46 = vand.u32 2147483647, %v920_v50 }
 0xc1c   :  { %v3446_v30 = vmax.f32 %v1089_v29, 0.0  ;;  %v933_v43 = vor.u32 1.1754944e-38, %v932_v44 }
 0xc1d   :  { %vm931_vm5 = vcmp.eq.f32.partialorder %v930_v46, 8.507059e+37 }
 0xc1e   :  { %v1329_v54 = vperm.slane %v3446_v30, 0  ;;  %v1307_v33 = vrot.slane %v3446_v30, 1 }
 0xc1f   :  { %v1252_v32 = vpop.f32.mrf.mxu3 }
 0xc20   :  { %v1253_v35 = vadd.f32 %v3426_v0, %v1252_v32  ;;  %v3452_v36 = vmul.f32 %v1329_v54, %v1250_v31  ;;  %v1330_v38 = vperm.slane %v1307_v33, 0  ;;  %v2791_v52 = vpop.eup %2790 }
 0xc21   :  { %v922_v34 = vmul.f32 %v2791_v52, %v920_v50  ;;  %v2793_v55 = vpop.eup %2792  ;;  %vm927_vm2 = vweird.f32 %v2791_v52 }
 0xc22   :  { %v3454_v48 = vmul.f32 %v1330_v38, %v1253_v35  ;;  %v854_v4 = vadd.f32 1.0, %v2793_v55  ;;  %vm928_vm4 = vmor %vm926_vm3, %vm927_vm2  ;;  %vm1393_vm2 = vcmask 130048   ;;  %vm4845_vm3 = vcmask 1044484  }
 0xc23   :  { %v923_v57 = vsub.f32 1.0, %v922_v34  ;;  %v2916_v34 = vld [vmem:[%s4827_s9] ss:$0 sm:$0xff] }
 0xc24   :  { %2794 = vrcp.f32 %v854_v4  ;;  %v866_v11 = vand.u32 2147483648, %v854_v4  ;;  %vm860_vm7 = vweird.f32 %v854_v4  ;;  %v864_v13 = vand.u32 2147483647, %v854_v4 }
 0xc25   :  { %v924_v8 = vmul.f32 %v2791_v52, %v923_v57 }
 0xc26   :  { %v867_v17 = vor.u32 1.1754944e-38, %v866_v11  ;;  %vm865_vm9 = vcmp.eq.f32.partialorder %v864_v13, 8.507059e+37  ;;  %v1308_v13 = vrot.slane %v3446_v30, 2 }
 0xc27   :  { %v925_v42 = vadd.f32 %v2791_v52, %v924_v8  ;;  %v1255_v11 = vpop.f32.mrf.mxu3 }
 0xc29   :  { %v929_v58 = vsel %vm928_vm4, %v2791_v52, %v925_v42  ;;  %vm4844_vm4 = vcmask 1045509  }
 0xc2a   :  { %v2795_v41 = vpop.eup %2794  ;;  %v934_v1 = vsel %vm931_vm5, %v933_v43, %v929_v58  ;;  %vm4842_vm5 = vcmask 1047559  }
 0xc2b   :  { %v856_v5 = vmul.f32 %v2795_v41, %v854_v4  ;;  %vm861_vm1 = vweird.f32 %v2795_v41  ;;  %v940_v22 = vmul.f32 %v938_v21, %v934_v1 }
 0xc2c   :  { %vm862_vm8 = vmor %vm860_vm7, %vm861_vm1  ;;  %vm1556_vm7 = vcmask 64512  }
 0xc2d   :  { %v857_v7 = vsub.f32 1.0, %v856_v5 }
 0xc2f   :  { %v858_v9 = vmul.f32 %v2795_v41, %v857_v7 }
 0xc31   :  { %v859_v10 = vadd.f32 %v2795_v41, %v858_v9 }
 0xc33   :  { %v863_v16 = vsel %vm862_vm8, %v2795_v41, %v859_v10 }
 0xc34   :  { %v868_v19 = vsel %vm865_vm9, %v867_v17, %v863_v16  ;;  %v1258_v16 = vpop.f32.mrf.mxu3  ;;  %v1256_v17 = vadd.f32 %v3426_v0, %v1255_v11  ;;  %v3540_v11 = vld [vmem:[%s4833_s16 + $0x20] sm:$0xff] }
 0xc35   :  { %v871_v29 = vmul.f32 %v868_v19, %v3292_v27  ;;  %v1259_v21 = vadd.f32 %v3426_v0, %v1258_v16  ;;  %v3551_v16 = vld [vmem:[%s4833_s16 + $0x18] sm:$0xff] }
 0xc75   :  { %v943_v45 = vpop.permute.xlu0 %942 }
 0xc76   :  { %v945_v53 = vmul.f32 %v943_v45, %v934_v1 }
 0xc78   :  { %947 = vrot.lane.b32.xlu2 %v945_v53, %s2919_s30 }
 0xc89   :  { %v874_v18 = vpop.permute.xlu1 %873 }
 0xc8a   :  { %v876_v20 = vmul.f32 %v874_v18, %v868_v19  ;;  %v1331_v18 = vperm.slane %v1308_v13, 0  ;;  %v1621_v13 = vld [vmem:[%s4834_s12 + $0x8] sm:$0xff] }
 0xc8c   :  { %878 = vrot.lane.b32.xlu0 %v876_v20, %s2919_s30  ;;  %v1309_v20 = vrot.slane %v3446_v30, 3 }
 0xcd2   :  { %v948_v25 = vpop.permute.xlu2 %947 }
 0xcd3   :  { %v950_v26 = vadd.f32 %v948_v25, %v940_v22  ;;  %v1261_v25 = vpop.f32.mrf.mxu3 }
 0xcd5   :  { %2796 = vtanh.f32 %v950_v26  ;;  %v1332_v26 = vperm.slane %v1309_v20, 0  ;;  %v1418_v20 = vsel %vm1393_vm2, %v3452_v36, 0.0  ;;  %v3583_v36 = vld [vmem:[%s4833_s16] sm:$0xff] }
 0xcdb   :  { %v2797_v28 = vpop.eup %2796 }
 0xcdc   :  { %953 = vrot.lane.b32.xlu1 %v2797_v28, %s2918_s28  ;;  %v1380_v28 = vmul.f32 %v1332_v26, %v1259_v21  ;;  %v3571_v21 = vld [vmem:[%s4830_s2 + $0xa0] sm:$0xff]  ;;  %v1597_v26 = vld [vmem:[%s4835_s1 + $0x8] sm:$0xff] }
 0xcfe   :  { %v879_v31 = vpop.permute.xlu0 %878 }
 0xcff   :  { %v3461_v32 = vadd.f32 %v879_v31, %v871_v29  ;;  %v1310_v29 = vrot.slane %v3446_v30, 4  ;;  %v1262_v31 = vadd.f32 %v3426_v0, %v1261_v25  ;;  %v1097_v25 = vld [vmem:[%s4830_s2] sm:$0xff] }
 0xd01   :  { %2798 = vtanh.f32 %v3461_v32 }
 0xd07   :  { %v2799_v54 = vpop.eup %2798 }
 0xd08   :  { %884 = vrot.lane.b32.xlu2 %v2799_v54, %s2918_s28  ;;  %v1427_v54 = vsel %vm1393_vm2, %v1380_v28, 0.0  ;;  %v1421_v28 = vsel %vm1393_vm2, %v3454_v48, 0.0  ;;  %v1409_v48 = vsel %vm1393_vm2, %v3435_v12, 0.0  ;;  %v1412_v12 = vsel %vm1393_vm2, %v3437_v15, 0.0  ;;  %v1600_v15 = vld [vmem:[%s4835_s1 + $0x20] sm:$0xff] }
 0xd4e   :  { %v954_v33 = vpop.permute.xlu1 %953 }
 0xd4f   :  { %v956_v35 = vmul.f32 %v954_v33, %v934_v1  ;;  %v1333_v33 = vperm.slane %v1310_v29, 0  ;;  %v3601_v29 = vld [vmem:[%s4830_s2 + $0xa8] sm:$0xff] }
 0xd51   :  { %v980_v23 = vrot.slane %v956_v35, 4  ;;  %v1264_v35 = vpop.f32.mrf.mxu3 }
 0xd53   :  { %981 = vrot.lane.b32.xlu1 %v980_v23, %s2919_s30  ;;  %v1381_v23 = vmul.f32 %v1333_v33, %v1262_v31  ;;  %v1098_v31 = vld [vmem:[%s4830_s2 + $0x8] sm:$0xff]  ;;  %v3618_v33 = vld [vmem:[%s4830_s2 + $0xb0] sm:$0xff] }
 0xd62   :  { %v885_v38 = vpop.permute.xlu2 %884 }
 0xd63   :  { %v887_v49 = vmul.f32 %v885_v38, %v868_v19  ;;  %v1379_v19 = vmul.f32 %v1331_v18, %v1256_v17  ;;  %v1311_v38 = vrot.slane %v3446_v30, 5  ;;  %v1620_v17 = vld [vmem:[%s4834_s12] sm:$0xff] }
 0xd64   :  { %v1596_v18 = vld [vmem:[%s4835_s1] sm:$0xff] }
 0xd65   :  { %889 = vrot.lane.b32.xlu0 %v887_v49, %s2919_s30  ;;  %v1424_v22 = vsel %vm1393_vm2, %v1379_v19, 0.0  ;;  %v1265_v49 = vadd.f32 %v3426_v0, %v1264_v35  ;;  %v3563_v19 = vld [vmem:[%s4833_s16 + $0x10] sm:$0xff] }
 0xd66   :  { %v1099_v35 = vld [vmem:[%s4830_s2 + $0x10] sm:$0xff] }
 0xdc5   :  { %v982_v37 = vpop.permute.xlu1 %981 }
 0xdc6   :  { %2582 = vmatmul.msk.f32.vlgmr.msrb.gmra.mxu1 %vm127_vm6, %v982_v37  ;;  %v1430_v37 = vsel %vm1393_vm2, %v1381_v23, 0.0  ;;  %v1599_v23 = vld [vmem:[%s4835_s1 + $0x18] sm:$0xff] }
 0xdd7   :  { %v890_v27 = vpop.permute.xlu0 %889 }
 0xdd8   :  { %892 = vst.msk [vmem:[#allocation2 + $0x10] sm:$0xf] %vm279_vm15, %v890_v27  ;;  %2581 = vmatmul.msk.f32.vlgmr.msra.gmra.mxu0 %vm127_vm6, %v890_v27  ;;  %v1334_v27 = vperm.slane %v1311_v38, 0  ;;  %v3635_v38 = vld [vmem:[%s4830_s2 + $0xb8] sm:$0xff] }
 0xe43   :  { %v1002_v50 = vpop.f32.mrf.mxu1 }
 0xe55   :  { %v976_v51 = vpop.f32.mrf.mxu0 }
 0xe56   :  { %v1003_v52 = vadd.f32 %v1002_v50, %v976_v51  ;;  %v1382_v50 = vmul.f32 %v1334_v27, %v1265_v49  ;;  %v1267_v51 = vpop.f32.mrf.mxu3  ;;  %v1100_v49 = vld [vmem:[%s4830_s2 + $0x18] sm:$0xff]  ;;  %v1601_v27 = vld [vmem:[%s4835_s1 + $0x28] sm:$0xff] }
 0xe58   :  { %v1005_v55 = vadd.f32 %v2916_v34, %v1003_v52  ;;  %v1312_v52 = vrot.slane %v3446_v30, 6  ;;  %v1268_v34 = vadd.f32 %v3426_v0, %v1267_v51  ;;  %v1602_v51 = vld [vmem:[%s4835_s1 + $0x30] sm:$0xff] }
 0xe5a   :  { %2800 = vtanh.f32 %v1005_v55  ;;  %v2583_v4 = vmul.f32 -1.442695, %v1005_v55  ;;  %v1433_v55 = vsel %vm1393_vm2, %v1382_v50, 0.0 }
 0xe5c   :  { %2802 = vpow2.f32 %v2583_v4 }
 0xe60   :  { %v2801_v57 = vpop.eup %2800 }
 0xe61   :  { %1028 = vrot.lane.b32.xlu2 %v2801_v57, %s2918_s28  ;;  %v1335_v57 = vperm.slane %v1312_v52, 0 }
 0xe62   :  { %v2803_v8 = vpop.eup %2802 }
 0xe63   :  { %v1009_v42 = vadd.f32 1.0, %v2803_v8  ;;  %v1383_v4 = vmul.f32 %v1335_v57, %v1268_v34  ;;  %v1603_v34 = vld [vmem:[%s4835_s1 + $0x38] sm:$0xff]  ;;  %v1612_v57 = vld [vmem:[%s4835_s1 + $0x80] sm:$0xff] }
 0xe65   :  { %2804 = vrcp.f32 %v1009_v42  ;;  %v1021_v45 = vand.u32 2147483648, %v1009_v42  ;;  %vm1015_vm11 = vweird.f32 %v1009_v42  ;;  %v1019_v1 = vand.u32 2147483647, %v1009_v42 }
 0xe66   :  { %v1436_v8 = vsel %vm1393_vm2, %v1383_v4, 0.0 }
 0xe67   :  { %v1022_v5 = vor.u32 1.1754944e-38, %v1021_v45  ;;  %vm1020_vm13 = vcmp.eq.f32.partialorder %v1019_v1, 8.507059e+37  ;;  %v3496_v45 = vld [vmem:[%s4830_s2 + $0x80] sm:$0xff]  ;;  %v3510_v1 = vld [vmem:[%s4830_s2 + $0x90] sm:$0xff] }
 0xe68   :  { %2604 = vmatmul.msk.f32.gmra.mxu3 %vm1132_vm14, %v3496_v45 }
 0xe6b   :  { %v2805_v44 = vpop.eup %2804 }
 0xe6c   :  { %v1011_v46 = vmul.f32 %v2805_v44, %v1009_v42  ;;  %vm1016_vm10 = vweird.f32 %v2805_v44 }
 0xe6d   :  { %vm1017_vm12 = vmor %vm1015_vm11, %vm1016_vm10 }
 0xe6e   :  { %v1012_v58 = vsub.f32 1.0, %v1011_v46 }
 0xe70   :  { %v1013_v41 = vmul.f32 %v2805_v44, %v1012_v58 }
 0xe72   :  { %v1014_v43 = vadd.f32 %v2805_v44, %v1013_v41 }
 0xe74   :  { %v1018_v53 = vsel %vm1017_vm12, %v2805_v44, %v1014_v43 }
 0xe75   :  { %v1023_v9 = vsel %vm1020_vm13, %v1022_v5, %v1018_v53  ;;  %v3517_v53 = vld [vmem:[%s4833_s16 + $0x30] sm:$0xf]  ;;  %v3522_v5 = vld [vmem:[%s4833_s16 + $0x28] sm:$0xff] }
 0xe76   :  { %v1026_v42 = vmul.f32 %v1023_v9, %v3461_v32  ;;  %v3503_v32 = vld [vmem:[%s4830_s2 + $0x88] sm:$0xff]  ;;  %2636 = vmatpush.msk.msra.mxu1 %vm84_vm0, %v3517_v53 }
 0xe77   :  { %2605 = vmatmul.msk.f32.gmra.mxu3 %vm1132_vm14, %v3503_v32 }
 0xe78   :  { %1837 = vmatpush.msra.mxu1 %v3522_v5 }
 0xe7a   :  { %1838 = vmatpush.msra.mxu1 %v3540_v11 }
 0xe7c   :  { %1839 = vmatpush.msra.mxu1 %v3551_v16 }
 0xe7e   :  { %1840 = vmatpush.msra.mxu1 %v3563_v19 }
 0xe7f   :  { %2606 = vmatmul.msk.f32.gmra.mxu3 %vm1132_vm14, %v3510_v1 }
 0xebb   :  { %v1029_v7 = vpop.permute.xlu2 %1028 }
 0xebc   :  { %v1031_v10 = vmul.f32 %v1029_v7, %v1023_v9  ;;  %v1623_v7 = vld [vmem:[%s4834_s12 + $0x18] sm:$0xff] }
 0xebd   :  { %1712 = vmatpush.msrb.mxu0 %v1623_v7  ;;  %2692 = vmatpush.msrb.mxu2 %v1623_v7 }
 0xebe   :  { %1033 = vrot.lane.b32.xlu0 %v1031_v10, %s2919_s30  ;;  %v1622_v10 = vld [vmem:[%s4834_s12 + $0x10] sm:$0xff] }
 0xebf   :  { %1713 = vmatpush.msrb.mxu0 %v1622_v10  ;;  %2693 = vmatpush.msrb.mxu2 %v1622_v10 }
 0xec1   :  { %1714 = vmatpush.msrb.mxu0 %v1621_v13  ;;  %2694 = vmatpush.msrb.mxu2 %v1621_v13 }
 0xec3   :  { %1715 = vmatpush.msrb.mxu0 %v1620_v17  ;;  %2695 = vmatpush.msrb.mxu2 %v1620_v17 }
 0xec4   :  { %2612 = vmatmul.msk.f32.vlgmr.msrb.gmra.mxu0 %vm127_vm6, %v1596_v18 }
 0xecc   :  { %2613 = vmatmul.msk.f32.gmra.mxu0 %vm127_vm6, %v1597_v26 }
 0xee8   :  { %1425 = vadd.xlane.f32.xlu0 %v1424_v22  ;;  %v3576_v22 = vld [vmem:[%s4833_s16 + $0x8] sm:$0xff] }
 0xee9   :  { %1841 = vmatpush.msra.mxu1 %v3576_v22 }
 0xeeb   :  { %1842 = vmatpush.msra.mxu1 %v3583_v36 }
 0xeec   :  { %2637 = vmatmul.msk.f32.vlgmr.msra.gmra.mxu1 %vm1132_vm14, %v1097_v25 }
 0xef0   :  { %1428 = vadd.xlane.f32.xlu0 %v1427_v54  ;;  %v1598_v54 = vld [vmem:[%s4835_s1 + $0x10] sm:$0xff] }
 0xef1   :  { %2614 = vmatmul.msk.f32.gmra.mxu0 %vm127_vm6, %v1598_v54 }
 0xef4   :  { %2638 = vmatmul.msk.f32.gmra.mxu1 %vm1132_vm14, %v1098_v31 }
 0xef8   :  { %1431 = vadd.xlane.f32.xlu0 %v1430_v37  ;;  %v1101_v37 = vld [vmem:[%s4830_s2 + $0x20] sm:$0xff] }
 0xef9   :  { %2615 = vmatmul.msk.f32.gmra.mxu0 %vm127_vm6, %v1599_v23 }
 0xefc   :  { %2639 = vmatmul.msk.f32.gmra.mxu1 %vm1132_vm14, %v1099_v35 }
 0xf00   :  { %1434 = vadd.xlane.f32.xlu0 %v1433_v55 }
 0xf01   :  { %2616 = vmatmul.msk.f32.gmra.mxu0 %vm127_vm6, %v1600_v15  ;;  %v3787_v15 = vld [vmem:[%s4836_s13] ss:$0 sm:$0xff] }
 0xf04   :  { %2640 = vmatmul.msk.f32.gmra.mxu1 %vm1132_vm14, %v1100_v49 }
 0xf08   :  { %1437 = vadd.xlane.f32.xlu0 %v1436_v8 }
 0xf09   :  { %2617 = vmatmul.msk.f32.gmra.mxu0 %vm127_vm6, %v1601_v27  ;;  %v1321_v27 = vperm.slane %v3428_v2, 0 }
 0xf0c   :  { %2641 = vmatmul.msk.f32.gmra.mxu1 %vm1132_vm14, %v1101_v37 }
 0xf11   :  { %2618 = vmatmul.msk.f32.gmra.mxu0 %vm127_vm6, %v1602_v51 }
 0xf14   :  { %2642 = vmatmul.msk.f32.gmra.mxu1 %vm1132_vm14, %v3338_v56  ;;  %v1604_v56 = vld [vmem:[%s4835_s1 + $0x40] sm:$0xff] }
 0xf19   :  { %2619 = vmatmul.msk.f32.gmra.mxu0 %vm127_vm6, %v1603_v34  ;;  %v1313_v34 = vrot.slane %v3446_v30, 7 }
 0xf1c   :  { %2643 = vmatmul.msk.f32.gmra.mxu1 %vm1132_vm14, %v3346_v47  ;;  %v1605_v47 = vld [vmem:[%s4835_s1 + $0x48] sm:$0xff] }
 0xf21   :  { %2620 = vmatmul.msk.f32.gmra.mxu0 %vm127_vm6, %v1604_v56 }
 0xf24   :  { %2644 = vmatmul.msk.f32.gmra.mxu1 %vm1132_vm14, %v3353_v3  ;;  %v1606_v3 = vld [vmem:[%s4835_s1 + $0x50] sm:$0xff] }
 0xf29   :  { %2621 = vmatmul.msk.f32.gmra.mxu0 %vm127_vm6, %v1605_v47  ;;  %v3798_v47 = vld [vmem:[%s4837_s17] ss:$0 sm:$0xff] }
 0xf2c   :  { %2645 = vmatmul.msk.f32.gmra.mxu1 %vm1132_vm14, %v3362_v6  ;;  %v1607_v6 = vld [vmem:[%s4835_s1 + $0x58] sm:$0xff] }
 0xf30   :  { %v1034_v44 = vpop.permute.xlu0 %1033 }
 0xf31   :  { %v1036_v46 = vadd.f32 %v1034_v44, %v1026_v42  ;;  %2622 = vmatmul.msk.f32.gmra.mxu0 %vm127_vm6, %v1606_v3 }
 0xf33   :  { %2806 = vtanh.f32 %v1036_v46 }
 0xf34   :  { %2646 = vmatmul.msk.f32.gmra.mxu1 %vm1132_vm14, %v3370_v59  ;;  %v1608_v59 = vld [vmem:[%s4835_s1 + $0x60] sm:$0xff] }
 0xf39   :  { %v2807_v58 = vpop.eup %2806  ;;  %2623 = vmatmul.msk.f32.gmra.mxu0 %vm127_vm6, %v1607_v6 }
 0xf3a   :  { %1039 = vrot.lane.b32.xlu1 %v2807_v58, %s2918_s28  ;;  %v1270_v58 = vpop.f32.mrf.mxu3 }
 0xf3c   :  { %2647 = vmatmul.msk.f32.gmra.mxu1 %vm1132_vm14, %v3377_v14  ;;  %v1609_v14 = vld [vmem:[%s4835_s1 + $0x68] sm:$0xff] }
 0xf41   :  { %2624 = vmatmul.msk.f32.gmra.mxu0 %vm127_vm6, %v1608_v59  ;;  %v1717_v55 = vpop.f32.mrf.mxu0 }
 0xf42   :  { %v1718_v56 = vadd.f32 %v3787_v15, %v1717_v55 }
 0xf44   :  { %2648 = vmatmul.msk.f32.gmra.mxu1 %vm1132_vm14, %v3384_v60  ;;  %v1610_v60 = vld [vmem:[%s4835_s1 + $0x70] sm:$0xff] }
 0xf49   :  { %2625 = vmatmul.msk.f32.gmra.mxu0 %vm127_vm6, %v1609_v14  ;;  %v1271_v14 = vadd.f32 %v3426_v0, %v1270_v58 }
 0xf4c   :  { %2649 = vmatmul.msk.f32.gmra.mxu1 %vm1132_vm14, %v3391_v61  ;;  %v1611_v61 = vld [vmem:[%s4835_s1 + $0x78] sm:$0xff] }
 0xf51   :  { %2626 = vmatmul.msk.f32.gmra.mxu0 %vm127_vm6, %v1610_v60 }
 0xf54   :  { %2650 = vmatmul.msk.f32.gmra.mxu1 %vm1132_vm14, %v3398_v62 }
 0xf59   :  { %2627 = vmatmul.msk.f32.gmra.mxu0 %vm127_vm6, %v1611_v61 }
 0xf5c   :  { %2651 = vmatmul.msk.f32.gmra.mxu1 %vm1132_vm14, %v3405_v40  ;;  %v1720_v40 = vpop.f32.mrf.mxu0 }
 0xf5d   :  { %v1721_v55 = vadd.f32 %v3787_v15, %v1720_v40 }
 0xf61   :  { %2628 = vmatmul.msk.f32.gmra.mxu0 %vm127_vm6, %v1612_v57  ;;  %v1336_v57 = vperm.slane %v1313_v34, 0 }
 0xf63   :  { %v1384_v58 = vmul.f32 %v1336_v57, %v1271_v14 }
 0xf64   :  { %2652 = vmatmul.msk.f32.gmra.mxu1 %vm1132_vm14, %v3412_v63 }
 0xf69   :  { %v3733_v62 = vpop.f32.mrf.mxu1 }
 0xf6c   :  { %2653 = vmatmul.msk.f32.gmra.mxu1 %vm1132_vm14, %v3496_v45  ;;  %v1273_v45 = vpop.f32.mrf.mxu3 }
 0xf6d   :  { %v1274_v18 = vadd.f32 %v3426_v0, %v1273_v45  ;;  %v1789_v45 = vmax.f32 %v1718_v56, 0.0 }
 0xf6e   :  { %v3745_v63 = vpop.f32.mrf.mxu0 }
 0xf71   :  { %v3741_v4 = vpop.f32.mrf.mxu1 }
 0xf72   :  { %v1848_v40 = vadd.f32 %v3798_v47, %v3741_v4 }
 0xf74   :  { %2654 = vmatmul.msk.f32.gmra.mxu1 %vm1132_vm14, %v3503_v32  ;;  %v1276_v32 = vpop.f32.mrf.mxu3 }
 0xf76   :  { %v3749_v42 = vpop.f32.mrf.mxu0 }
 0xf79   :  { %v3747_v8 = vpop.f32.mrf.mxu1 }
 0xf7c   :  { %v1279_v13 = vpop.f32.mrf.mxu3 }
 0xf7d   :  { %v1280_v23 = vadd.f32 %v3426_v0, %v1279_v13 }
 0xf7e   :  { %v3753_v46 = vpop.f32.mrf.mxu0 }
 0xf81   :  { %v3751_v44 = vpop.f32.mrf.mxu1 }
 0xfac   :  { %v1040_v41 = vpop.permute.xlu1 %1039 }
 0xfad   :  { %v1042_v43 = vmul.f32 %v1040_v41, %v1023_v9  ;;  %v3532_v9 = vld [vmem:[%s4830_s2 + $0x98] sm:$0xff]  ;;  %v3755_v41 = vpop.f32.mrf.mxu1 }
 0xfae   :  { %2607 = vmatmul.msk.f32.gmra.mxu3 %vm1132_vm14, %v3532_v9 }
 0xfaf   :  { %1044 = vrot.lane.b32.xlu2 %v1042_v43, %s2919_s30  ;;  %v3757_v43 = vpop.f32.mrf.mxu0 }
 0xfb6   :  { %2608 = vmatmul.msk.f32.gmra.mxu3 %vm1132_vm14, %v3571_v21 }
 0xfbe   :  { %2609 = vmatmul.msk.f32.gmra.mxu3 %vm1132_vm14, %v3601_v29 }
 0xfc6   :  { %2610 = vmatmul.msk.f32.gmra.mxu3 %vm1132_vm14, %v3618_v33 }
 0xfce   :  { %2611 = vmatmul.msk.f32.gmra.mxu3 %vm1132_vm14, %v3635_v38 }
 0xfd8   :  { %1419 = vadd.xlane.f32.xlu2 %v1418_v20 }
 0xfe0   :  { %1422 = vadd.xlane.f32.xlu2 %v1421_v28 }
 0xfe8   :  { %1410 = vadd.xlane.f32.xlu2 %v1409_v48 }
 0xff0   :  { %1413 = vadd.xlane.f32.xlu2 %v1412_v12 }
0x1009   :  { %v1045_v50 = vpop.permute.xlu2 %1044 }
0x100a   :  { %1047 = vst.msk [vmem:[#allocation2 + $0x14] sm:$0xf] %vm279_vm15, %v1045_v50  ;;  %vm1524_vm15 = vcmask 1042434  }
0x1011   :  { %v1050_v52 = vld [vmem:[#allocation2 + $0x10] sm:$0xff] }
0x1012   :  { %2586 = vmatmul.msk.f32.gmra.mxu2 %vm127_vm6, %v1050_v52 }
0x101a   :  { %2588 = vmatmul.msk.f32.vlgmr.msra.gmra.mxu2 %vm1132_vm14, %v1097_v25 }
0x101b   :  { %2696 = vmatpush.msk.msra.mxu2 %vm84_vm0, %v3517_v53  ;;  %v3759_v53 = vpop.f32.mrf.mxu1  ;;  %vm1522_vm0 = vcmask 1041409  }
0x101d   :  { %2697 = vmatpush.msra.mxu2 %v3522_v5  ;;  %v3761_v5 = vpop.f32.mrf.mxu0 }
0x101f   :  { %2698 = vmatpush.msra.mxu2 %v3540_v11 }
0x1021   :  { %2699 = vmatpush.msra.mxu2 %v3551_v16 }
0x1022   :  { %2589 = vmatmul.msk.f32.gmra.mxu2 %vm1132_vm14, %v1098_v31 }
0x1023   :  { %2700 = vmatpush.msra.mxu2 %v3563_v19  ;;  %v3763_v7 = vpop.f32.mrf.mxu1 }
0x1025   :  { %2701 = vmatpush.msra.mxu2 %v3576_v22  ;;  %v3765_v10 = vpop.f32.mrf.mxu0  ;;  %v1277_v22 = vadd.f32 %v3426_v0, %v1276_v32  ;;  %v1845_v32 = vadd.f32 %v3798_v47, %v3733_v62 }
0x1027   :  { %2702 = vmatpush.msra.mxu2 %v3583_v36 }
0x102a   :  { %2590 = vmatmul.msk.f32.gmra.mxu2 %vm1132_vm14, %v1099_v35 }
0x102b   :  { %v3768_v17 = vpop.f32.mrf.mxu1 }
0x102d   :  { %v3773_v20 = vpop.f32.mrf.mxu0 }
0x1032   :  { %2591 = vmatmul.msk.f32.gmra.mxu2 %vm1132_vm14, %v1100_v49  ;;  %v1282_v49 = vpop.f32.mrf.mxu3 }
0x1033   :  { %v3781_v12 = vpop.f32.mrf.mxu1  ;;  %v1283_v30 = vadd.f32 %v3426_v0, %v1282_v49 }
0x1035   :  { %v3791_v51 = vpop.f32.mrf.mxu0 }
0x103a   :  { %2592 = vmatmul.msk.f32.gmra.mxu2 %vm1132_vm14, %v1101_v37 }
0x103b   :  { %v3805_v61 = vpop.f32.mrf.mxu1 }
0x1095   :  { %v1091_v11 = vpop.f32.mrf.mxu2 }
0x1096   :  { %v1092_v16 = vadd.f32 %v3420_v39, %v1091_v11 }
0x1098   :  { %v3771_v19 = vmax.f32 %v1092_v16, 0.0  ;;  %v1285_v16 = vpop.f32.mrf.mxu3 }
0x109a   :  { %v1337_v36 = vperm.slane %v3771_v19, 0  ;;  %v1314_v25 = vrot.slane %v3771_v19, 1  ;;  %v1315_v31 = vrot.slane %v3771_v19, 2  ;;  %v1316_v6 = vrot.slane %v3771_v19, 3 }
0x109c   :  { %v1385_v26 = vmul.f32 %v1337_v36, %v1274_v18  ;;  %v1338_v28 = vperm.slane %v1314_v25, 0  ;;  %v1339_v50 = vperm.slane %v1315_v31, 0  ;;  %v1340_v13 = vperm.slane %v1316_v6, 0 }
0x109d   :  { %v1225_v48 = vpop.f32.mrf.mxu2  ;;  %v1301_v18 = vrot.slane %v3428_v2, 2  ;;  %v1790_v36 = vmax.f32 %v1721_v55, 0.0 }
0x109e   :  { %v1226_v39 = vadd.f32 %v3426_v0, %v1225_v48  ;;  %v1442_v54 = vsel %vm1393_vm2, %v1385_v26, 0.0  ;;  %v1386_v35 = vmul.f32 %v1338_v28, %v1277_v22  ;;  %v1387_v3 = vmul.f32 %v1339_v50, %v1280_v23  ;;  %v3813_v22 = vpop.f32.mrf.mxu0 }
0x109f   :  { %1443 = vadd.xlane.f32.xlu0 %v1442_v54  ;;  %v1388_v25 = vmul.f32 %v1340_v13, %v1283_v30  ;;  %v1317_v26 = vrot.slane %v3771_v19, 4  ;;  %v3818_v28 = vmul.f32 %v1845_v32, %v1789_v45  ;;  %v1439_v48 = vsel %vm1393_vm2, %v1384_v58, 0.0  ;;  %v3822_v54 = vpop.f32.mrf.mxu1 }
0x10a0   :  { %v1445_v37 = vsel %vm1393_vm2, %v1386_v35, 0.0  ;;  %v1369_v52 = vmul.f32 %v1321_v27, %v1226_v39  ;;  %v1448_v11 = vsel %vm1393_vm2, %v1387_v3, 0.0  ;;  %v1323_v39 = vperm.slane %v1301_v18, 0  ;;  %v1288_v34 = vpop.f32.mrf.mxu3 }
0x10a1   :  { %1446 = vadd.xlane.f32.xlu1 %v1445_v37  ;;  %v1286_v35 = vadd.f32 %v3426_v0, %v1285_v16  ;;  %v1451_v23 = vsel %vm1393_vm2, %v1388_v25, 0.0  ;;  %v1341_v4 = vperm.slane %v1317_v26, 0  ;;  %v3826_v37 = vmul.f32 %v1848_v40, %v1790_v36  ;;  %v1615_v16 = vld [vmem:[%s4835_s1 + $0x98] sm:$0xff] }
0x10a2   :  { %v1394_v60 = vsel %vm1393_vm2, %v1369_v52, 0.0  ;;  %v1302_v50 = vrot.slane %v3428_v2, 3  ;;  %v1724_v52 = vadd.f32 %v3787_v15, %v3745_v63  ;;  %v1318_v3 = vrot.slane %v3771_v19, 5  ;;  %2631 = vmatmul.msk.f32.vlgmr.msrb.gmra.mxu2 %vm127_vm6, %v1615_v16 }
0x10a3   :  { %v1389_v56 = vmul.f32 %v1341_v4, %v1286_v35  ;;  %v1289_v57 = vadd.f32 %v3426_v0, %v1288_v34  ;;  %v1851_v32 = vadd.f32 %v3798_v47, %v3747_v8  ;;  %v1303_v18 = vrot.slane %v3428_v2, 4 }
0x10a4   :  { %v1324_v30 = vperm.slane %v1302_v50, 0  ;;  %v1791_v45 = vmax.f32 %v1724_v52, 0.0  ;;  %v1342_v13 = vperm.slane %v1318_v3, 0  ;;  %v1727_v36 = vadd.f32 %v3787_v15, %v3749_v42  ;;  %v1616_v52 = vld [vmem:[%s4835_s1 + $0xa0] sm:$0xff] }
0x10a5   :  { %v3801_v59 = vpop.f32.mrf.mxu2  ;;  %v1454_v63 = vsel %vm1393_vm2, %v1389_v56, 0.0  ;;  %v1319_v40 = vrot.slane %v3771_v19, 6  ;;  %v1854_v42 = vadd.f32 %v3798_v47, %v3751_v44  ;;  %v1730_v56 = vadd.f32 %v3787_v15, %v3753_v46  ;;  %v1617_v46 = vld [vmem:[%s4835_s1 + $0xa8] sm:$0xff] }
0x10a6   :  { %v3833_v6 = vpop.f32.mrf.mxu0  ;;  %v1390_v8 = vmul.f32 %v1342_v13, %v1289_v57  ;;  %v3853_v26 = vmul.f32 %v1851_v32, %v1791_v45  ;;  %v1857_v45 = vadd.f32 %v3798_v47, %v3755_v41  ;;  %v1229_v32 = vadd.f32 %v3426_v0, %v3801_v59 }
0x10a7   :  { %1395 = vadd.xlane.f32.xlu0 %v1394_v60  ;;  %v3836_v55 = vpop.f32.mrf.mxu1  ;;  %v1343_v50 = vperm.slane %v1319_v40, 0  ;;  %v1793_v57 = vmax.f32 %v1730_v56, 0.0  ;;  %v1733_v41 = vadd.f32 %v3787_v15, %v3757_v43  ;;  %v1320_v59 = vrot.slane %v3771_v19, 7  ;;  %v1618_v43 = vld [vmem:[%s4835_s1 + $0xb0] sm:$0xff] }
0x10a8   :  { %v1457_v4 = vsel %vm1393_vm2, %v1390_v8, 0.0  ;;  %v1860_v40 = vadd.f32 %v3798_v47, %v3759_v53  ;;  %v1943_v19 = vsel %vm1393_vm2, %v3826_v37, 0.0  ;;  %v1863_v37 = vadd.f32 %v3798_v47, %v3763_v7 }
0x10a9   :  { %1449 = vadd.xlane.f32.xlu1 %v1448_v11 }
0x10aa   :  { %2632 = vmatmul.msk.f32.gmra.mxu2 %vm127_vm6, %v1616_v52 }
0x10ad   :  { %v1231_v62 = vpop.f32.mrf.mxu2 }
0x10ae   :  { %v1232_v31 = vadd.f32 %v3426_v0, %v1231_v62  ;;  %v3851_v25 = vpop.f32.mrf.mxu0 }
0x10af   :  { %1440 = vadd.xlane.f32.xlu0 %v1439_v48  ;;  %v3856_v35 = vpop.f32.mrf.mxu1 }
0x10b0   :  { %v1371_v49 = vmul.f32 %v1323_v39, %v1232_v31  ;;  %v1291_v31 = vpop.f32.mrf.mxu3  ;;  %v1325_v39 = vperm.slane %v1303_v18, 0  ;;  %v3892_v18 = vmul.f32 %v1857_v45, %v1793_v57 }
0x10b1   :  { %1452 = vadd.xlane.f32.xlu1 %v1451_v23  ;;  %v1292_v23 = vadd.f32 %v3426_v0, %v1291_v31  ;;  %v1344_v31 = vperm.slane %v1320_v59, 0 }
0x10b2   :  { %v1400_v27 = vsel %vm1393_vm2, %v1371_v49, 0.0  ;;  %v1792_v49 = vmax.f32 %v1727_v36, 0.0  ;;  %2633 = vmatmul.msk.f32.gmra.mxu2 %vm127_vm6, %v1617_v46 }
0x10b3   :  { %1401 = vadd.xlane.f32.xlu2 %v1400_v27  ;;  %v1391_v3 = vmul.f32 %v1343_v50, %v1292_v23 }
0x10b4   :  { %v3871_v44 = vmul.f32 %v1854_v42, %v1792_v49  ;;  %v1619_v49 = vld [vmem:[%s4835_s1 + $0xb8] sm:$0xff] }
0x10b5   :  { %v1234_v14 = vpop.f32.mrf.mxu2 }
0x10b6   :  { %v1235_v60 = vadd.f32 %v3426_v0, %v1234_v14  ;;  %v3869_v14 = vpop.f32.mrf.mxu0 }
0x10b8   :  { %v1372_v11 = vmul.f32 %v1324_v30, %v1235_v60  ;;  %v1300_v60 = vrot.slane %v3428_v2, 1  ;;  %v3874_v30 = vpop.f32.mrf.mxu1  ;;  %v1294_v13 = vpop.f32.mrf.mxu3 }
0x10b9   :  { %1455 = vadd.xlane.f32.xlu1 %v1454_v63  ;;  %v1460_v63 = vsel %vm1393_vm2, %v1391_v3, 0.0  ;;  %v1295_v8 = vadd.f32 %v3426_v0, %v1294_v13  ;;  %v1872_v3 = vadd.f32 %v3798_v47, %v3805_v61  ;;  %v1742_v13 = vadd.f32 %v3787_v15, %v3773_v20 }
0x10ba   :  { %v1403_v58 = vsel %vm1393_vm2, %v1372_v11, 0.0  ;;  %v1415_v11 = vsel %vm1393_vm2, %v3442_v24, 0.0  ;;  %v1322_v2 = vperm.slane %v1300_v60, 0  ;;  %v1794_v24 = vmax.f32 %v1733_v41, 0.0  ;;  %2634 = vmatmul.msk.f32.gmra.mxu2 %vm127_vm6, %v1618_v43  ;;  %v1420_v43 = vpop.xlane.xlu2 %1419 }
0x10bb   :  { %1404 = vadd.xlane.f32.xlu2 %v1403_v58 }
0x10bc   :  { %v1370_v16 = vmul.f32 %v1322_v2, %v1229_v32  ;;  %v3910_v53 = vmul.f32 %v1860_v40, %v1794_v24  ;;  %v1940_v32 = vsel %vm1393_vm2, %v3818_v28, 0.0  ;;  %v1878_v40 = vadd.f32 %v3798_v47, %v3836_v55 }
0x10bd   :  { %v1237_v62 = vpop.f32.mrf.mxu2  ;;  %v1754_v55 = vadd.f32 %v3787_v15, %v3851_v25 }
0x10be   :  { %v1238_v48 = vadd.f32 %v3426_v0, %v1237_v62  ;;  %v3890_v58 = vpop.f32.mrf.mxu0  ;;  %v1397_v62 = vsel %vm1393_vm2, %v1370_v16, 0.0  ;;  %v1736_v0 = vadd.f32 %v3787_v15, %v3761_v5  ;;  %v1745_v5 = vadd.f32 %v3787_v15, %v3791_v51 }
0x10bf   :  { %v1797_v16 = vmax.f32 %v1742_v13, 0.0 }
0x10c0   :  { %v1373_v27 = vmul.f32 %v1325_v39, %v1238_v48  ;;  %v3894_v36 = vpop.f32.mrf.mxu1  ;;  %v1392_v48 = vmul.f32 %v1344_v31, %v1295_v8  ;;  %v1795_v42 = vmax.f32 %v1736_v0, 0.0  ;;  %v1798_v7 = vmax.f32 %v1745_v5, 0.0 }
0x10c1   :  { %1458 = vadd.xlane.f32.xlu1 %v1457_v4  ;;  %v1760_v5 = vadd.f32 %v3787_v15, %v3890_v58  ;;  %v1887_v58 = vadd.f32 %v3798_v47, %v3894_v36 }
0x10c2   :  { %v1406_v34 = vsel %vm1393_vm2, %v1373_v27, 0.0  ;;  %v1463_v4 = vsel %vm1393_vm2, %v1392_v48, 0.0  ;;  %2635 = vmatmul.msk.f32.gmra.mxu2 %vm127_vm6, %v1619_v49  ;;  %v1739_v27 = vadd.f32 %v3787_v15, %v3765_v10  ;;  %v3925_v52 = vmul.f32 %v1863_v37, %v1795_v42  ;;  %v1423_v0 = vpop.xlane.xlu2 %1422 }
0x10c3   :  { %1407 = vadd.xlane.f32.xlu2 %v1406_v34  ;;  %v1748_v34 = vadd.f32 %v3787_v15, %v3813_v22  ;;  %v1866_v10 = vadd.f32 %v3798_v47, %v3768_v17  ;;  %v1875_v22 = vadd.f32 %v3798_v47, %v3822_v54  ;;  %v1925_v2 = vmul.f32 %v1872_v3, %v1798_v7 }
0x10c4   :  { %v1796_v45 = vmax.f32 %v1739_v27, 0.0  ;;  %v1869_v54 = vadd.f32 %v3798_v47, %v3781_v12  ;;  %v1946_v12 = vsel %vm1393_vm2, %v3853_v26, 0.0  ;;  %v1801_v26 = vmax.f32 %v1754_v55, 0.0 }
0x10c5   :  { %v1967_v41 = vsel %vm1393_vm2, %v1925_v2, 0.0  ;;  %v1496_v48 = vlaneseq  ;;  %v1803_v3 = vmax.f32 %v1760_v5, 0.0 }
0x10c6   :  { %v3908_v39 = vpop.f32.mrf.mxu0  ;;  %v3944_v17 = vmul.f32 %v1866_v10, %v1796_v45  ;;  %v3954_v8 = vmul.f32 %v1869_v54, %v1797_v16 }
0x10c7   :  { %v3977_v42 = vand.u32 127, %v1496_v48  ;;  %v1763_v10 = vadd.f32 %v3787_v15, %v3908_v39 }
0x10c8   :  { %v3912_v23 = vpop.f32.mrf.mxu1 }
0x10c9   :  { %1461 = vadd.xlane.f32.xlu1 %v1460_v63  ;;  %v1799_v63 = vmax.f32 %v1748_v34, 0.0  ;;  %v1890_v2 = vadd.f32 %v3798_v47, %v3912_v23 }
0x10ca   :  { %2655 = vmatmul.msk.f32.vlgmr.msra.gmra.mxu2 %vm1132_vm14, %v3510_v1  ;;  %v1751_v1 = vadd.f32 %v3787_v15, %v3833_v6 }
0x10cb   :  { %1416 = vadd.xlane.f32.xlu2 %v1415_v11  ;;  %v1426_v11 = vpop.xlane.xlu0 %1425  ;;  %v1926_v28 = vmul.f32 %v1875_v22, %v1799_v63  ;;  %v4011_v63 = vmul.f32 %v1887_v58, %v1803_v3 }
0x10cc   :  { %v1800_v24 = vmax.f32 %v1751_v1, 0.0  ;;  %v1508_v34 = vperm.slane %v1426_v11, %v3977_v42  ;;  %v1804_v11 = vmax.f32 %v1763_v10, 0.0 }
0x10cd   :  { %v1970_v59 = vsel %vm1393_vm2, %v1926_v28, 0.0 }
0x10ce   :  { %v1765_v50 = vpop.f32.mrf.mxu0 }
0x10cf   :  { %v1766_v56 = vadd.f32 %v3787_v15, %v1765_v50 }
0x10d0   :  { %v1892_v60 = vpop.f32.mrf.mxu1 }
0x10d1   :  { %1398 = vadd.xlane.f32.xlu1 %v1397_v62  ;;  %v1805_v57 = vmax.f32 %v1766_v56, 0.0  ;;  %v1893_v51 = vadd.f32 %v3798_v47, %v1892_v60  ;;  %v1927_v62 = vmul.f32 %v1878_v40, %v1800_v24  ;;  %v1614_v56 = vld [vmem:[%s4835_s1 + $0x90] sm:$0xff] }
0x10d2   :  { %2656 = vmatmul.msk.f32.gmra.mxu2 %vm1132_vm14, %v3532_v9 }
0x10d3   :  { %1944 = vadd.xlane.f32.xlu2 %v1943_v19  ;;  %v1932_v46 = vmul.f32 %v1893_v51, %v1805_v57  ;;  %v1429_v20 = vpop.xlane.xlu0 %1428  ;;  %v1973_v9 = vsel %vm1393_vm2, %v1927_v62, 0.0 }
0x10d4   :  { %v1509_v60 = vperm.slane %v1429_v20, %v3977_v42 }
0x10d5   :  { %v1988_v61 = vsel %vm1393_vm2, %v1932_v46, 0.0 }
0x10d9   :  { %1464 = vadd.xlane.f32.xlu1 %v1463_v4  ;;  %v3989_v4 = vpop.xlane.xlu2 %1410 }
0x10da   :  { %2657 = vmatmul.msk.f32.gmra.mxu2 %vm1132_vm14, %v3571_v21  ;;  %v1881_v21 = vadd.f32 %v3798_v47, %v3856_v35  ;;  %v1884_v35 = vadd.f32 %v3798_v47, %v3874_v30 }
0x10db   :  { %1989 = vadd.xlane.f32.xlu2 %v1988_v61  ;;  %v1432_v31 = vpop.xlane.xlu0 %1431  ;;  %v1467_v61 = vld [vmem:[%s4838_s3 + $0x8] sm:$0xff] }
0x10dc   :  { %v3975_v49 = vmul.f32 %v1881_v21, %v1801_v26  ;;  %v1510_v45 = vperm.slane %v1432_v31, %v3977_v42  ;;  %vm1470_vm1 = vcmp.gt.f32.partialorder %v1467_v61, 0.5 }
0x10e1   :  { %1941 = vadd.xlane.f32.xlu1 %v1940_v32  ;;  %v4013_v22 = vpop.xlane.xlu2 %1413 }
0x10e2   :  { %2658 = vmatmul.msk.f32.gmra.mxu2 %vm1132_vm14, %v3601_v29  ;;  %v1757_v29 = vadd.f32 %v3787_v15, %v3869_v14  ;;  %v1506_v14 = vperm.slane %v1420_v43, %v3977_v42 }
0x10e3   :  { %1971 = vadd.xlane.f32.xlu2 %v1970_v59  ;;  %v1435_v6 = vpop.xlane.xlu0 %1434  ;;  %v4026_v59 = vmul.f32 %v1890_v2, %v1804_v11 }
0x10e4   :  { %v1802_v25 = vmax.f32 %v1757_v29, 0.0  ;;  %v1511_v46 = vperm.slane %v1435_v6, %v3977_v42 }
0x10e6   :  { %v3995_v50 = vmul.f32 %v1884_v35, %v1802_v25 }
0x10e9   :  { %1968 = vadd.xlane.f32.xlu1 %v1967_v41 }
0x10ea   :  { %2659 = vmatmul.msk.f32.gmra.mxu2 %vm1132_vm14, %v3618_v33  ;;  %v1613_v33 = vld [vmem:[%s4835_s1 + $0x88] sm:$0xff] }
0x10eb   :  { %1974 = vadd.xlane.f32.xlu2 %v1973_v9  ;;  %v1438_v19 = vpop.xlane.xlu0 %1437  ;;  %2629 = vmatmul.msk.f32.gmra.mxu0 %vm127_vm6, %v1613_v33 }
0x10ec   :  { %v1512_v13 = vperm.slane %v1438_v19, %v3977_v42 }
0x10f1   :  { %1947 = vadd.xlane.f32.xlu1 %v1946_v12 }
0x10f2   :  { %2660 = vmatmul.msk.f32.gmra.mxu2 %vm1132_vm14, %v3635_v38  ;;  %v1507_v38 = vperm.slane %v1423_v0, %v3977_v42  ;;  %vm4846_vm14 = vcmask 1043459  }
0x10f3   :  { %2630 = vmatmul.msk.f32.gmra.mxu0 %vm127_vm6, %v1614_v56  ;;  %vm4843_vm6 = vcmask 1046534  }
0x10f4   :  { %v1536_v30 = vsel %vm1522_vm0, %v1507_v38, %v1506_v14  ;;  %v1503_v14 = vperm.slane %v3989_v4, %v3977_v42  ;;  %v1504_v4 = vperm.slane %v4013_v22, %v3977_v42 }
0x10f5   :  { %v1537_v7 = vsel %vm1524_vm15, %v1508_v34, %v1536_v30  ;;  %v1466_v30 = vld [vmem:[%s4838_s3] sm:$0xff] }
0x10f6   :  { %v1538_v51 = vsel %vm4846_vm14, %v1509_v60, %v1537_v7  ;;  %vm1469_vm8 = vcmp.gt.f32.partialorder %v1466_v30, 0.5 }
0x10f7   :  { %v1539_v36 = vsel %vm4845_vm3, %v1510_v45, %v1538_v51 }
0x10f8   :  { %v1540_v39 = vsel %vm4844_vm4, %v1511_v46, %v1539_v36 }
0x10f9   :  { %v1541_v54 = vsel %vm4843_vm6, %v1512_v13, %v1540_v39 }
0x1112   :  { %v3986_v37 = vpop.xlane.xlu0 %1443 }
0x1113   :  { %v1514_v19 = vperm.slane %v3986_v37, %v3977_v42 }
0x1114   :  { %v3993_v27 = vpop.xlane.xlu1 %1446 }
0x1115   :  { %v1515_v55 = vperm.slane %v3993_v27, %v3977_v42 }
0x1117   :  { %v1543_v34 = vsel %vm1522_vm0, %v1515_v55, %v1514_v19  ;;  %v1979_v55 = vsel %vm1393_vm2, %v3995_v50, 0.0  ;;  %v1955_v50 = vsel %vm1393_vm2, %v3910_v53, 0.0 }
0x111a   :  { %v1396_v57 = vpop.xlane.xlu0 %1395 }
0x111b   :  { %v1498_v26 = vperm.slane %v1396_v57, %v3977_v42  ;;  %v1468_v57 = vld [vmem:[%s4838_s3 + $0x10] sm:$0xff] }
0x111c   :  { %v1450_v32 = vpop.xlane.xlu1 %1449  ;;  %vm1471_vm9 = vcmp.gt.f32.partialorder %v1468_v57, 0.5 }
0x111d   :  { %v1516_v0 = vperm.slane %v1450_v32, %v3977_v42 }
0x111f   :  { %v1544_v3 = vsel %vm1524_vm15, %v1516_v0, %v1543_v34 }
0x1122   :  { %v1441_v28 = vpop.xlane.xlu0 %1440 }
0x1123   :  { %v1513_v41 = vperm.slane %v1441_v28, %v3977_v42 }
0x1124   :  { %v1453_v16 = vpop.xlane.xlu1 %1452 }
0x1125   :  { %v1542_v23 = vsel %vm4842_vm5, %v1513_v41, %v1541_v54  ;;  %v1517_v33 = vperm.slane %v1453_v16, %v3977_v42 }
0x1126   :  { %v1402_v1 = vpop.xlane.xlu2 %1401  ;;  %v4029_v20 = vsel %vm1470_vm1, -inf, %v1542_v23 }
0x1127   :  { %v1560_v24 = vsel %vm1556_vm7, %v4029_v20, -inf  ;;  %v1500_v48 = vperm.slane %v1402_v1, %v3977_v42  ;;  %v1545_v51 = vsel %vm4846_vm14, %v1517_v33, %v1544_v3  ;;  %v1961_v3 = vsel %vm1393_vm2, %v3944_v17, 0.0 }
0x1128   :  { %1561 = vmax.xlane.f32.xlu0 %v1560_v24 }
0x112c   :  { %v1456_v40 = vpop.xlane.xlu1 %1455 }
0x112d   :  { %v1518_v5 = vperm.slane %v1456_v40, %v3977_v42  ;;  %v1976_v40 = vsel %vm1393_vm2, %v3975_v49, 0.0 }
0x112e   :  { %v1405_v12 = vpop.xlane.xlu2 %1404 }
0x112f   :  { %v1501_v25 = vperm.slane %v1405_v12, %v3977_v42  ;;  %v1546_v32 = vsel %vm4845_vm3, %v1518_v5, %v1545_v51  ;;  %v4094_v5 = vadd.s32 4294967288, %v3977_v42 }
0x1134   :  { %v1459_v62 = vpop.xlane.xlu1 %1458 }
0x1135   :  { %v1519_v56 = vperm.slane %v1459_v62, %v3977_v42  ;;  %v1949_v62 = vsel %vm1393_vm2, %v3871_v44, 0.0  ;;  %v1982_v44 = vsel %vm1393_vm2, %v4011_v63, 0.0 }
0x1136   :  { %v1408_v9 = vpop.xlane.xlu2 %1407 }
0x1137   :  { %v1502_v27 = vperm.slane %v1408_v9, %v3977_v42  ;;  %v1547_v46 = vsel %vm4844_vm4, %v1519_v56, %v1546_v32 }
0x113c   :  { %v1462_v31 = vpop.xlane.xlu1 %1461 }
0x113d   :  { %v1520_v58 = vperm.slane %v1462_v31, %v3977_v42 }
0x113e   :  { %v1417_v6 = vpop.xlane.xlu2 %1416 }
0x113f   :  { %v1505_v45 = vperm.slane %v1417_v6, %v3977_v42  ;;  %v1548_v61 = vsel %vm4843_vm6, %v1520_v58, %v1547_v46 }
0x1144   :  { %v1399_v43 = vpop.xlane.xlu1 %1398 }
0x1145   :  { %v1499_v21 = vperm.slane %v1399_v43, %v3977_v42 }
0x1146   :  { %v1945_v29 = vpop.xlane.xlu2 %1944 }
0x1147   :  { %v1523_v35 = vsel %vm1522_vm0, %v1499_v21, %v1498_v26  ;;  %v2662_v38 = vmul.f32 -1.442695, %v1945_v29  ;;  %v1952_v26 = vsel %vm1393_vm2, %v3892_v18, 0.0 }
0x1148   :  { %v1525_v37 = vsel %vm1524_vm15, %v1500_v48, %v1523_v35 }
0x1149   :  { %v1527_v7 = vsel %vm4846_vm14, %v1501_v25, %v1525_v37  ;;  %2808 = vpow2.f32 %v2662_v38 }
0x114a   :  { %v1529_v60 = vsel %vm4845_vm3, %v1502_v27, %v1527_v7  ;;  %v1958_v7 = vsel %vm1393_vm2, %v3925_v52, 0.0 }
0x114b   :  { %v1531_v10 = vsel %vm4844_vm4, %v1503_v14, %v1529_v60 }
0x114c   :  { %v1465_v22 = vpop.xlane.xlu1 %1464  ;;  %v1533_v36 = vsel %vm4843_vm6, %v1504_v4, %v1531_v10  ;;  %v1774_v4 = vpop.f32.mrf.mxu2 }
0x114d   :  { %v1521_v11 = vperm.slane %v1465_v22, %v3977_v42  ;;  %v1535_v2 = vsel %vm4842_vm5, %v1505_v45, %v1533_v36 }
0x114e   :  { %v4072_v39 = vsel %vm1469_vm8, -inf, %v1535_v2  ;;  %v4113_v36 = vpop.xlane.xlu2 %1989  ;;  %v1895_v2 = vpop.f32.mrf.mxu1 }
0x114f   :  { %v2809_v13 = vpop.eup %2808  ;;  %v1557_v28 = vsel %vm1556_vm7, %v4072_v39, -inf  ;;  %v1549_v41 = vsel %vm4842_vm5, %v1521_v11, %v1548_v61 }
0x1150   :  { %v2085_v16 = vadd.f32 1.0, %v2809_v13  ;;  %1558 = vmax.xlane.f32.xlu2 %v1557_v28  ;;  %v4077_v54 = vsel %vm1471_vm9, -inf, %v1549_v41  ;;  %v1896_v13 = vadd.f32 %v3798_v47, %v1895_v2  ;;  %v1964_v41 = vsel %vm1393_vm2, %v3954_v8, 0.0 }
0x1151   :  { %v1563_v23 = vsel %vm1556_vm7, %v4077_v54, -inf }
0x1152   :  { %2810 = vrcp.f32 %v2085_v16  ;;  %1564 = vmax.xlane.f32.xlu1 %v1563_v23  ;;  %v2134_v48 = vand.u32 2147483648, %v2085_v16  ;;  %vm2128_vm11 = vweird.f32 %v2085_v16  ;;  %v2132_v29 = vand.u32 2147483647, %v2085_v16 }
0x1154   :  { %v1942_v1 = vpop.xlane.xlu1 %1941  ;;  %v2135_v14 = vor.u32 1.1754944e-38, %v2134_v48  ;;  %vm2133_vm1 = vcmp.eq.f32.partialorder %v2132_v29, 8.507059e+37  ;;  %v1777_v58 = vpop.f32.mrf.mxu2 }
0x1155   :  { %v2661_v24 = vmul.f32 -1.442695, %v1942_v1 }
0x1157   :  { %2812 = vpow2.f32 %v2661_v24 }
0x1158   :  { %v2811_v12 = vpop.eup %2810  ;;  %1977 = vadd.xlane.f32.xlu2 %v1976_v40 }
0x1159   :  { %v2124_v9 = vmul.f32 %v2811_v12, %v2085_v16  ;;  %vm2129_vm10 = vweird.f32 %v2811_v12  ;;  %v4120_v16 = vpop.xlane.xlu2 %1971 }
0x115a   :  { %1950 = vadd.xlane.f32.xlu1 %v1949_v62  ;;  %vm2130_vm12 = vmor %vm2128_vm11, %vm2129_vm10 }
0x115b   :  { %v2125_v43 = vsub.f32 1.0, %v2124_v9 }
0x115c   :  { %v1780_v60 = vpop.f32.mrf.mxu2  ;;  %v4123_v24 = vpop.xlane.xlu1 %1968 }
0x115d   :  { %v2813_v31 = vpop.eup %2812  ;;  %v2126_v49 = vmul.f32 %v2811_v12, %v2125_v43 }
0x115e   :  { %v2084_v6 = vadd.f32 1.0, %v2813_v31 }
0x115f   :  { %v2127_v19 = vadd.f32 %v2811_v12, %v2126_v49 }
0x1160   :  { %2814 = vrcp.f32 %v2084_v6  ;;  %1980 = vadd.xlane.f32.xlu2 %v1979_v55  ;;  %v2119_v25 = vand.u32 2147483648, %v2084_v6  ;;  %v2117_v38 = vand.u32 2147483647, %v2084_v6  ;;  %vm2113_vm8 = vweird.f32 %v2084_v6 }
0x1161   :  { %v2131_v18 = vsel %vm2130_vm12, %v2811_v12, %v2127_v19  ;;  %v1975_v43 = vpop.xlane.xlu2 %1974  ;;  %v1778_v19 = vadd.f32 %v3787_v15, %v1777_v58 }
0x1162   :  { %1953 = vadd.xlane.f32.xlu1 %v1952_v26  ;;  %v2136_v27 = vsel %vm2133_vm1, %v2135_v14, %v2131_v18  ;;  %v2120_v37 = vor.u32 1.1754944e-38, %v2119_v25  ;;  %vm2118_vm5 = vcmp.eq.f32.partialorder %v2117_v38, 8.507059e+37 }
0x1163   :  { %v2497_v34 = vperm.slane %v2136_v27, %v4094_v5  ;;  %v1809_v25 = vmax.f32 %v1778_v19, 0.0 }
0x1164   :  { %v4105_v57 = vpop.f32.mrf.mxu2  ;;  %v1948_v8 = vpop.xlane.xlu1 %1947 }
0x1165   :  { %v1784_v58 = vadd.f32 %v3787_v15, %v4105_v57 }
0x1166   :  { %v2815_v21 = vpop.eup %2814 }
0x1167   :  { %v2109_v0 = vmul.f32 %v2815_v21, %v2084_v6  ;;  %vm2114_vm13 = vweird.f32 %v2815_v21  ;;  %v1775_v6 = vadd.f32 %v3787_v15, %v1774_v4 }
0x1168   :  { %1983 = vadd.xlane.f32.xlu2 %v1982_v44  ;;  %vm2115_vm9 = vmor %vm2113_vm8, %vm2114_vm13  ;;  %v1768_v32 = vpop.f32.mrf.mxu0 }
0x1169   :  { %v2110_v33 = vsub.f32 1.0, %v2109_v0  ;;  %v1769_v46 = vadd.f32 %v3787_v15, %v1768_v32  ;;  %v1808_v49 = vmax.f32 %v1775_v6, 0.0 }
0x116a   :  { %1956 = vadd.xlane.f32.xlu1 %v1955_v50 }
0x116b   :  { %v2111_v35 = vmul.f32 %v2815_v21, %v2110_v33  ;;  %v1806_v61 = vmax.f32 %v1769_v46, 0.0 }
0x116c   :  { %v4111_v52 = vpop.f32.mrf.mxu2 }
0x116d   :  { %v2112_v63 = vadd.f32 %v2815_v21, %v2111_v35  ;;  %v1933_v1 = vmul.f32 %v1896_v13, %v1806_v61 }
0x116f   :  { %v2116_v30 = vsel %vm2115_vm9, %v2815_v21, %v2112_v63  ;;  %v1991_v9 = vsel %vm1393_vm2, %v1933_v1, 0.0  ;;  %v1781_v63 = vadd.f32 %v3787_v15, %v1780_v60  ;;  %v2670_v1 = vmul.f32 -1.442695, %v4123_v24 }
0x1170   :  { %v2121_v53 = vsel %vm2118_vm5, %v2120_v37, %v2116_v30  ;;  %v1771_v28 = vpop.f32.mrf.mxu0 }
0x1171   :  { %v2496_v56 = vperm.slane %v2121_v53, %v4094_v5  ;;  %v1772_v23 = vadd.f32 %v3787_v15, %v1771_v28  ;;  %v1810_v30 = vmax.f32 %v1781_v63, 0.0 }
0x1172   :  { %1959 = vadd.xlane.f32.xlu1 %v1958_v7 }
0x1173   :  { %v4101_v42 = vsel %vm1522_vm0, %v2497_v34, %v2496_v56  ;;  %v1807_v62 = vmax.f32 %v1772_v23, 0.0 }
0x1174   :  { %v1898_v11 = vpop.f32.mrf.mxu2 }
0x1175   :  { %v1899_v12 = vadd.f32 %v3798_v47, %v1898_v11 }
0x1177   :  { %v1934_v31 = vmul.f32 %v1899_v12, %v1807_v62  ;;  %v2677_v62 = vmul.f32 -1.442695, %v4113_v36 }
0x1179   :  { %v1994_v55 = vsel %vm1393_vm2, %v1934_v31, 0.0 }
0x117a   :  { %1962 = vadd.xlane.f32.xlu1 %v1961_v3 }
0x117c   :  { %v1901_v40 = vpop.f32.mrf.mxu2 }
0x117d   :  { %v1902_v21 = vadd.f32 %v3798_v47, %v1901_v40 }
0x117f   :  { %v1935_v44 = vmul.f32 %v1902_v21, %v1808_v49 }
0x1181   :  { %v1997_v35 = vsel %vm1393_vm2, %v1935_v44, 0.0 }
0x1184   :  { %v1904_v26 = vpop.f32.mrf.mxu2 }
0x1185   :  { %v1905_v18 = vadd.f32 %v3798_v47, %v1904_v26 }
0x1187   :  { %v1936_v27 = vmul.f32 %v1905_v18, %v1809_v25 }
0x1189   :  { %v2000_v34 = vsel %vm1393_vm2, %v1936_v27, 0.0 }
0x118c   :  { %v1907_v38 = vpop.f32.mrf.mxu2 }
0x118d   :  { %v1908_v53 = vadd.f32 %v3798_v47, %v1907_v38 }
0x118f   :  { %v1937_v60 = vmul.f32 %v1908_v53, %v1810_v30 }
0x1191   :  { %v2003_v32 = vsel %vm1393_vm2, %v1937_v60, 0.0 }
0x1194   :  { %v1910_v3 = vpop.f32.mrf.mxu2 }
0x119b   :  { %v4107_v51 = vpop.xlane.xlu0 %1561 }
0x119c   :  { %v1567_v45 = vsub.f32 %v4029_v20, %v4107_v51  ;;  %v1913_v11 = vpop.f32.mrf.mxu2 }
0x119d   :  { %v1914_v61 = vadd.f32 %v3798_v47, %v1913_v11 }
0x119e   :  { %v1571_v10 = vmul.f32 1.442695, %v1567_v45  ;;  %v1811_v45 = vmax.f32 %v1784_v58, 0.0 }
0x11a0   :  { %2816 = vpow2.f32 %v1571_v10  ;;  %v1911_v10 = vadd.f32 %v3798_v47, %v1910_v3 }
0x11a2   :  { %v1938_v46 = vmul.f32 %v1911_v10, %v1811_v45 }
0x11a4   :  { %v2006_v57 = vsel %vm1393_vm2, %v1938_v46, 0.0 }
0x11a6   :  { %v2817_v22 = vpop.eup %2816 }
0x11a7   :  { %v1578_v17 = vsel %vm1556_vm7, %v2817_v22, 0.0  ;;  %v1985_v22 = vsel %vm1393_vm2, %v4026_v59, 0.0  ;;  %v2663_v59 = vmul.f32 -1.442695, %v1948_v8 }
0x11a8   :  { %1579 = vadd.xlane.f32.xlu0 %v1578_v17  ;;  %v1787_v17 = vadd.f32 %v3787_v15, %v4111_v52  ;;  %v2671_v15 = vmul.f32 -1.442695, %v4120_v16  ;;  %v2672_v52 = vmul.f32 -1.442695, %v1975_v43 }
0x11aa   :  { %v1812_v2 = vmax.f32 %v1787_v17, 0.0 }
0x11ac   :  { %v1939_v13 = vmul.f32 %v1914_v61, %v1812_v2 }
0x11ae   :  { %v2009_v28 = vsel %vm1393_vm2, %v1939_v13, 0.0 }
0x11b0   :  { %1965 = vadd.xlane.f32.xlu0 %v1964_v41 }
0x11b8   :  { %1992 = vadd.xlane.f32.xlu0 %v1991_v9 }
0x11c0   :  { %1995 = vadd.xlane.f32.xlu0 %v1994_v55 }
0x11c3   :  { %v4131_v0 = vpop.xlane.xlu2 %1558 }
0x11c4   :  { %v1566_v48 = vsub.f32 %v4072_v39, %v4131_v0 }
0x11c5   :  { %v4135_v29 = vpop.xlane.xlu1 %1564 }
0x11c6   :  { %v1569_v33 = vmul.f32 1.442695, %v1566_v48  ;;  %v1568_v50 = vsub.f32 %v4077_v54, %v4135_v29 }
0x11c8   :  { %2818 = vpow2.f32 %v1569_v33  ;;  %v1573_v14 = vmul.f32 1.442695, %v1568_v50  ;;  %1998 = vadd.xlane.f32.xlu0 %v1997_v35 }
0x11ca   :  { %2820 = vpow2.f32 %v1573_v14 }
0x11cb   :  { %2822 = vpow2.f32 %v2663_v59  ;;  %v1978_v24 = vpop.xlane.xlu2 %1977 }
0x11cc   :  { %2824 = vpow2.f32 %v2670_v1  ;;  %v2673_v36 = vmul.f32 -1.442695, %v1978_v24 }
0x11cd   :  { %v1951_v41 = vpop.xlane.xlu1 %1950  ;;  %2826 = vpow2.f32 %v2671_v15 }
0x11ce   :  { %v2819_v37 = vpop.eup %2818  ;;  %2828 = vpow2.f32 %v2672_v52  ;;  %v2664_v26 = vmul.f32 -1.442695, %v1951_v41 }
0x11cf   :  { %v1575_v56 = vsel %vm1556_vm7, %v2819_v37, 0.0  ;;  %2830 = vpow2.f32 %v2677_v62 }
0x11d0   :  { %v2821_v7 = vpop.eup %2820  ;;  %2001 = vadd.xlane.f32.xlu0 %v2000_v34  ;;  %1576 = vadd.xlane.f32.xlu2 %v1575_v56 }
0x11d1   :  { %v1581_v4 = vsel %vm1556_vm7, %v2821_v7, 0.0  ;;  %v2823_v47 = vpop.eup %2822 }
0x11d2   :  { %1582 = vadd.xlane.f32.xlu1 %v1581_v4  ;;  %v2825_v12 = vpop.eup %2824  ;;  %v4160_v9 = vadd.f32 1.0, %v2823_v47 }
0x11d3   :  { %v4162_v31 = vadd.f32 1.0, %v2825_v12  ;;  %v2827_v6 = vpop.eup %2826  ;;  %v1981_v35 = vpop.xlane.xlu2 %1980 }
0x11d4   :  { %v2829_v8 = vpop.eup %2828  ;;  %2832 = vrcp.f32 %v4160_v9  ;;  %v4166_v16 = vadd.f32 1.0, %v2827_v6  ;;  %v2149_v60 = vand.u32 2147483648, %v4160_v9  ;;  %v2147_v10 = vand.u32 2147483647, %v4160_v9 }
0x11d5   :  { %v1954_v23 = vpop.xlane.xlu1 %1953  ;;  %2834 = vrcp.f32 %v4162_v31  ;;  %v4168_v55 = vadd.f32 1.0, %v2829_v8  ;;  %v2831_v49 = vpop.eup %2830  ;;  %v2254_v18 = vand.u32 2147483648, %v4162_v31  ;;  %vm2248_vm2 = vweird.f32 %v4162_v31 }
0x11d6   :  { %2836 = vrcp.f32 %v4166_v16  ;;  %v4176_v44 = vadd.f32 1.0, %v2831_v49  ;;  %v2665_v48 = vmul.f32 -1.442695, %v1954_v23  ;;  %v2252_v7 = vand.u32 2147483647, %v4162_v31 }
0x11d7   :  { %2838 = vrcp.f32 %v4168_v55  ;;  %v4193_v58 = vor.u32 1.1754944e-38, %v2254_v18  ;;  %vm2143_vm10 = vweird.f32 %v4160_v9  ;;  %v2674_v13 = vmul.f32 -1.442695, %v1981_v35 }
0x11d8   :  { %2004 = vadd.xlane.f32.xlu0 %v2003_v32  ;;  %1986 = vadd.xlane.f32.xlu2 %v1985_v22  ;;  %2840 = vpow2.f32 %v2664_v26  ;;  %v2359_v32 = vand.u32 2147483648, %v4176_v44  ;;  %v2150_v41 = vor.u32 1.1754944e-38, %v2149_v60  ;;  %vm2263_vm11 = vweird.f32 %v4166_v16 }
0x11d9   :  { %2842 = vpow2.f32 %v2673_v36  ;;  %v2267_v23 = vand.u32 2147483647, %v4166_v16  ;;  %vm4211_vm12 = vcmp.eq.f32.partialorder %v2147_v10, 8.507059e+37  ;;  %v2269_v52 = vand.u32 2147483648, %v4166_v16 }
0x11da   :  { %v4171_v21 = vpop.eup %2832  ;;  %2844 = vrcp.f32 %v4176_v44  ;;  %vm4222_vm1 = vcmp.eq.f32.partialorder %v2252_v7, 8.507059e+37  ;;  %vm2353_vm8 = vweird.f32 %v4176_v44  ;;  %vm2278_vm14 = vweird.f32 %v4168_v55 }
0x11db   :  { %v4174_v19 = vpop.eup %2834  ;;  %v2139_v33 = vmul.f32 %v4171_v21, %v4160_v9  ;;  %2846 = vpow2.f32 %v2665_v48  ;;  %vm2144_vm13 = vweird.f32 %v4171_v21  ;;  %v1984_v62 = vpop.xlane.xlu2 %1983  ;;  %v2282_v7 = vand.u32 2147483647, %v4168_v55 }
0x11dc   :  { %v2244_v50 = vmul.f32 %v4174_v19, %v4162_v31  ;;  %v4182_v25 = vpop.eup %2836  ;;  %vm2249_vm5 = vweird.f32 %v4174_v19  ;;  %vm4248_vm3 = vmor %vm2143_vm10, %vm2144_vm13  ;;  %v2284_v31 = vand.u32 2147483648, %v4168_v55 }
0x11dd   :  { %v1957_v40 = vpop.xlane.xlu1 %1956  ;;  %v4186_v14 = vpop.eup %2838  ;;  %v2140_v30 = vsub.f32 1.0, %v2139_v33  ;;  %v2259_v4 = vmul.f32 %v4182_v25, %v4166_v16  ;;  %vm4238_vm6 = vmor %vm2248_vm2, %vm2249_vm5  ;;  %vm2264_vm4 = vweird.f32 %v4182_v25 }
0x11de   :  { %v2666_v63 = vmul.f32 -1.442695, %v1957_v40  ;;  %v2841_v37 = vpop.eup %2840  ;;  %v2245_v56 = vsub.f32 1.0, %v2244_v50  ;;  %v2274_v45 = vmul.f32 %v4186_v14, %v4168_v55  ;;  %vm2279_vm2 = vweird.f32 %v4186_v14  ;;  %vm4276_vm5 = vmor %vm2263_vm11, %vm2264_vm4 }
0x11df   :  { %v2843_v34 = vpop.eup %2842  ;;  %v4200_v22 = vadd.f32 1.0, %v2841_v37  ;;  %v2141_v46 = vmul.f32 %v4171_v21, %v2140_v30  ;;  %vm4296_vm4 = vmor %vm2278_vm14, %vm2279_vm2  ;;  %vm2283_vm14 = vcmp.eq.f32.partialorder %v2282_v7, 8.507059e+37 }
0x11e0   :  { %2007 = vadd.xlane.f32.xlu0 %v2006_v57  ;;  %v4202_v17 = vpop.eup %2844  ;;  %v4206_v11 = vadd.f32 1.0, %v2843_v34  ;;  %v2246_v61 = vmul.f32 %v4174_v19, %v2245_v56  ;;  %v2260_v57 = vsub.f32 1.0, %v2259_v4  ;;  %v2275_v59 = vsub.f32 1.0, %v2274_v45 }
0x11e1   :  { %v2847_v2 = vpop.eup %2846  ;;  %v2349_v15 = vmul.f32 %v4202_v17, %v4176_v44  ;;  %v2142_v12 = vadd.f32 %v4171_v21, %v2141_v46  ;;  %vm2354_vm9 = vweird.f32 %v4202_v17  ;;  %v2270_v45 = vor.u32 1.1754944e-38, %v2269_v52 }
0x11e2   :  { %v4228_v26 = vadd.f32 1.0, %v2847_v2  ;;  %v2247_v48 = vadd.f32 %v4174_v19, %v2246_v61  ;;  %v2276_v33 = vmul.f32 %v4186_v14, %v2275_v59  ;;  %vm2158_vm10 = vweird.f32 %v4200_v22 }
0x11e3   :  { %v2350_v35 = vsub.f32 1.0, %v2349_v15  ;;  %v2357_v15 = vand.u32 2147483647, %v4176_v44 }
0x11e4   :  { %v2277_v56 = vadd.f32 %v4186_v14, %v2276_v33  ;;  %v2251_v60 = vsel %vm4238_vm6, %v4174_v19, %v2247_v48  ;;  %vm4336_vm6 = vmor %vm2353_vm8, %vm2354_vm9  ;;  %vm2173_vm13 = vweird.f32 %v4228_v26 }
0x11e5   :  { %v1960_v43 = vpop.xlane.xlu1 %1959  ;;  %v2351_v16 = vmul.f32 %v4202_v17, %v2350_v35 }
0x11e6   :  { %v2667_v53 = vmul.f32 -1.442695, %v1960_v43  ;;  %v2261_v43 = vmul.f32 %v4182_v25, %v2260_v57  ;;  %v2285_v57 = vor.u32 1.1754944e-38, %v2284_v31  ;;  %v2297_v31 = vand.u32 2147483647, %v4206_v11 }
0x11e7   :  { %v4323_v1 = vadd.f32 %v4202_v17, %v2351_v16 }
0x11e8   :  { %2010 = vadd.xlane.f32.xlu0 %v2009_v28  ;;  %v2262_v9 = vadd.f32 %v4182_v25, %v2261_v43 }
0x11e9   :  { %v2356_v18 = vsel %vm4336_vm6, %v4202_v17, %v4323_v1 }
0x11ea   :  { %v2266_v55 = vsel %vm4276_vm5, %v4182_v25, %v2262_v9 }
0x11ed   :  { %v1963_v38 = vpop.xlane.xlu1 %1962 }
0x11ee   :  { %v2668_v3 = vmul.f32 -1.442695, %v1963_v38 }
0x121b   :  { %v1580_v27 = vpop.xlane.xlu0 %1579 }
0x121c   :  { %2848 = vlog2.f32 %v1580_v27 }
0x121d   :  { %2850 = vpow2.f32 %v2666_v63 }
0x121e   :  { %2852 = vpow2.f32 %v2667_v53 }
0x121f   :  { %2854 = vpow2.f32 %v2668_v3 }
0x1220   :  { %2856 = vrcp.f32 %v4200_v22 }
0x1221   :  { %2858 = vrcp.f32 %v4206_v11 }
0x1222   :  { %v2849_v28 = vpop.eup %2848  ;;  %2860 = vpow2.f32 %v2674_v13 }
0x1223   :  { %v1587_v40 = vmul.f32 0.6931472, %v2849_v28  ;;  %v1966_v47 = vpop.xlane.xlu0 %1965  ;;  %v2851_v8 = vpop.eup %2850 }
0x1224   :  { %v2669_v6 = vmul.f32 -1.442695, %v1966_v47  ;;  %v2853_v36 = vpop.eup %2852  ;;  %v4255_v27 = vadd.f32 1.0, %v2851_v8  ;;  %v2299_v47 = vand.u32 2147483648, %v4206_v11 }
0x1225   :  { %v1591_v49 = vadd.f32 %v1587_v40, %v4107_v51  ;;  %v2855_v50 = vpop.eup %2854  ;;  %v2675_v51 = vmul.f32 -1.442695, %v1984_v62  ;;  %v4264_v30 = vadd.f32 1.0, %v2853_v36  ;;  %v2164_v36 = vand.u32 2147483648, %v4200_v22 }
0x1226   :  { %2862 = vpow2.f32 %v2669_v6  ;;  %v4257_v37 = vpop.eup %2856  ;;  %v4286_v4 = vadd.f32 1.0, %v2855_v50 }
0x1227   :  { %v1594_v38 = vsub.f32 %v4029_v20, %v1591_v49  ;;  %v2146_v20 = vsel %vm4248_vm3, %v4171_v21, %v2142_v12  ;;  %2864 = vrcp.f32 %v4228_v26  ;;  %v4270_v53 = vpop.eup %2858  ;;  %vm4280_vm3 = vcmp.eq.f32.partialorder %v2267_v23, 8.507059e+37 }
0x1228   :  { %v2861_v3 = vpop.eup %2860  ;;  %2866 = vpow2.f32 %v2675_v51  ;;  %v2151_v61 = vsel %vm4211_vm12, %v2150_v41, %v2146_v20  ;;  %v2154_v19 = vmul.f32 %v4257_v37, %v4200_v22  ;;  %v2289_v13 = vmul.f32 %v4270_v53, %v4206_v11 }
0x1229   :  { %2469 = vst.msk [vmem:[%s4839_s18 + $0x8] sm:$0xff] %vm1556_vm7, %v1594_v38  ;;  %2868 = vrcp.f32 %v4255_v27  ;;  %v2281_v41 = vsel %vm4296_vm4, %v4186_v14, %v2277_v56  ;;  %v4316_v23 = vadd.f32 1.0, %v2861_v3  ;;  %v2498_v25 = vperm.slane %v2151_v61, %v4094_v5 }
0x122a   :  { %2870 = vrcp.f32 %v4264_v30  ;;  %v4330_v14 = vsel %vm4222_vm1, %v4193_v58, %v2251_v60  ;;  %v4342_v40 = vsel %vm4280_vm3, %v2270_v45, %v2266_v55  ;;  %v2155_v12 = vsub.f32 1.0, %v2154_v19 }
0x122b   :  { %v1993_v46 = vpop.xlane.xlu0 %1992  ;;  %2872 = vrcp.f32 %v4286_v4  ;;  %v4347_v58 = vor.u32 1.1754944e-38, %v2359_v32  ;;  %v4349_v6 = vsel %vm2283_vm14, %v2285_v57, %v2281_v41  ;;  %v2290_v8 = vsub.f32 1.0, %v2289_v13 }
0x122c   :  { %v2863_v2 = vpop.eup %2862  ;;  %v2678_v24 = vmul.f32 -1.442695, %v1993_v46  ;;  %v2162_v49 = vand.u32 2147483647, %v4200_v22  ;;  %v2505_v32 = vperm.slane %v4330_v14, %v4094_v5  ;;  %v4364_v50 = vsel %vm1524_vm15, %v2498_v25, %v4101_v42 }
0x122d   :  { %v4311_v28 = vadd.f32 1.0, %v2863_v2  ;;  %v4319_v59 = vpop.eup %2864  ;;  %v2506_v35 = vperm.slane %v4342_v40, %v4094_v5  ;;  %v2507_v63 = vperm.slane %v4349_v6, %v4094_v5  ;;  %v4377_v20 = vor.u32 1.1754944e-38, %v2299_v47 }
0x122e   :  { %v2867_v62 = vpop.eup %2866  ;;  %v2169_v48 = vmul.f32 %v4319_v59, %v4228_v26  ;;  %v2156_v42 = vmul.f32 %v4257_v37, %v2155_v12  ;;  %v2291_v34 = vmul.f32 %v4270_v53, %v2290_v8  ;;  %vm4384_vm11 = vcmp.eq.f32.partialorder %v2162_v49, 8.507059e+37 }
0x122f   :  { %2874 = vrcp.f32 %v4311_v28  ;;  %v4351_v43 = vpop.eup %2868  ;;  %v2165_v7 = vor.u32 1.1754944e-38, %v2164_v36  ;;  %v2312_v3 = vand.u32 2147483647, %v4316_v23  ;;  %vm2159_vm12 = vweird.f32 %v4257_v37 }
0x1230   :  { %2876 = vrcp.f32 %v4316_v23  ;;  %v4358_v33 = vpop.eup %2870  ;;  %v2184_v21 = vmul.f32 %v4351_v43, %v4255_v27  ;;  %v2170_v60 = vsub.f32 1.0, %v2169_v48  ;;  %v2179_v45 = vand.u32 2147483648, %v4228_v26  ;;  %vm4413_vm8 = vmor %vm2158_vm10, %vm2159_vm12 }
0x1231   :  { %v4372_v38 = vpop.eup %2872  ;;  %2878 = vpow2.f32 %v2678_v24  ;;  %v4392_v10 = vadd.f32 1.0, %v2867_v62  ;;  %v2199_v46 = vmul.f32 %v4358_v33, %v4264_v30  ;;  %v2157_v61 = vadd.f32 %v4257_v37, %v2156_v42 }
0x1232   :  { %v2177_v57 = vand.u32 2147483647, %v4228_v26  ;;  %v2214_v19 = vmul.f32 %v4372_v38, %v4286_v4  ;;  %v4404_v13 = vadd.f32 %v4270_v53, %v2291_v34  ;;  %v2185_v41 = vsub.f32 1.0, %v2184_v21 }
0x1233   :  { %v1996_v51 = vpop.xlane.xlu0 %1995  ;;  %v2239_v25 = vand.u32 2147483648, %v4311_v28  ;;  %v2171_v12 = vmul.f32 %v4319_v59, %v2170_v60  ;;  %v2237_v8 = vand.u32 2147483647, %v4311_v28  ;;  %v4421_v48 = vor.u32 1.1754944e-38, %v2179_v45 }
0x1234   :  { %v2679_v47 = vmul.f32 -1.442695, %v1996_v51  ;;  %2880 = vrcp.f32 %v4392_v10  ;;  %v2200_v51 = vsub.f32 1.0, %v2199_v46  ;;  %v2161_v34 = vsel %vm4413_vm8, %v4257_v37, %v2157_v61 }
0x1235   :  { %v2875_v9 = vpop.eup %2874  ;;  %v2215_v21 = vsub.f32 1.0, %v2214_v19  ;;  %vm2233_vm9 = vweird.f32 %v4311_v28  ;;  %vm2174_vm2 = vweird.f32 %v4319_v59  ;;  %v2186_v60 = vmul.f32 %v4351_v43, %v2185_v41 }
0x1236   :  { %v2229_v16 = vmul.f32 %v2875_v9, %v4311_v28  ;;  %v4396_v2 = vpop.eup %2876  ;;  %vm2234_vm1 = vweird.f32 %v2875_v9  ;;  %2882 = vpow2.f32 %v2679_v47  ;;  %v2172_v45 = vadd.f32 %v4319_v59, %v2171_v12  ;;  %vm4454_vm10 = vmor %vm2173_vm13, %vm2174_vm2 }
0x1237   :  { %v2879_v24 = vpop.eup %2878  ;;  %v4419_v36 = vmul.f32 %v4396_v2, %v4316_v23  ;;  %vm2235_vm5 = vmor %vm2233_vm9, %vm2234_vm1  ;;  %vm2238_vm3 = vcmp.eq.f32.partialorder %v2237_v8, 8.507059e+37  ;;  %v4436_v37 = vsel %vm4384_vm11, %v2165_v7, %v2161_v34  ;;  %vm4439_vm4 = vcmp.eq.f32.partialorder %v2177_v57, 8.507059e+37 }
0x1238   :  { %v2230_v55 = vsub.f32 1.0, %v2229_v16  ;;  %v2240_v16 = vor.u32 1.1754944e-38, %v2239_v25  ;;  %v2201_v19 = vmul.f32 %v4358_v33, %v2200_v51  ;;  %vm2188_vm14 = vweird.f32 %v4255_v27 }
0x1239   :  { %v2305_v28 = vsub.f32 1.0, %v4419_v36  ;;  %v2216_v25 = vmul.f32 %v4372_v38, %v2215_v21  ;;  %v2187_v57 = vadd.f32 %v4351_v43, %v2186_v60  ;;  %vm2189_vm11 = vweird.f32 %v4351_v43 }
0x123a   :  { %v2231_v62 = vmul.f32 %v2875_v9, %v2230_v55  ;;  %v4432_v55 = vadd.f32 1.0, %v2879_v24  ;;  %v4448_v56 = vpop.eup %2880  ;;  %v2194_v12 = vand.u32 2147483648, %v4255_v27  ;;  %v2176_v8 = vsel %vm4454_vm10, %v4319_v59, %v2172_v45  ;;  %vm4481_vm1 = vmor %vm2188_vm14, %vm2189_vm11 }
0x123b   :  { %v1999_v42 = vpop.xlane.xlu0 %1998  ;;  %vm2203_vm12 = vweird.f32 %v4264_v30  ;;  %v2202_v49 = vadd.f32 %v4358_v33, %v2201_v19  ;;  %vm2204_vm13 = vweird.f32 %v4358_v33  ;;  %v2209_v36 = vand.u32 2147483648, %v4264_v30 }
0x123c   :  { %v2232_v22 = vadd.f32 %v2875_v9, %v2231_v62  ;;  %v2680_v62 = vmul.f32 -1.442695, %v1999_v42  ;;  %2884 = vrcp.f32 %v4432_v55  ;;  %v2883_v24 = vpop.eup %2882  ;;  %vm2219_vm8 = vweird.f32 %v4372_v38  ;;  %vm4497_vm2 = vmor %vm2203_vm12, %vm2204_vm13 }
0x123d   :  { %vm2294_vm9 = vweird.f32 %v4270_v53  ;;  %v2191_v40 = vsel %vm4481_vm1, %v4351_v43, %v2187_v57  ;;  %v2222_v60 = vand.u32 2147483647, %v4286_v4  ;;  %v2319_v43 = vmul.f32 %v4448_v56, %v4392_v10 }
0x123e   :  { %v2236_v46 = vsel %vm2235_vm5, %v2875_v9, %v2232_v22  ;;  %v2192_v9 = vand.u32 2147483647, %v4255_v27  ;;  %v2224_v27 = vand.u32 2147483648, %v4286_v4  ;;  %vm2218_vm5 = vweird.f32 %v4286_v4 }
0x123f   :  { %v2241_v41 = vsel %vm2238_vm3, %v2240_v16, %v2236_v46  ;;  %v4503_v16 = vadd.f32 1.0, %v2883_v24  ;;  %vm2293_vm3 = vweird.f32 %v4206_v11  ;;  %v2195_v45 = vor.u32 1.1754944e-38, %v2194_v12  ;;  %vm4513_vm10 = vmor %vm2218_vm5, %vm2219_vm8 }
0x1240   :  { %v2504_v47 = vperm.slane %v2241_v41, %v4094_v5  ;;  %vm2193_vm14 = vcmp.eq.f32.partialorder %v2192_v9, 8.507059e+37  ;;  %vm2308_vm11 = vweird.f32 %v4316_v23  ;;  %v2181_v19 = vsel %vm4439_vm4, %v4421_v48, %v2176_v8 }
0x1241   :  { %v2210_v41 = vor.u32 1.1754944e-38, %v2209_v36  ;;  %v2499_v57 = vperm.slane %v4436_v37, %v4094_v5  ;;  %vm2223_vm13 = vcmp.eq.f32.partialorder %v2222_v60, 8.507059e+37  ;;  %v2500_v61 = vperm.slane %v2181_v19, %v4094_v5 }
0x1242   :  { %v2527_v26 = vsel %vm1522_vm0, %v2505_v32, %v2504_v47  ;;  %v2217_v32 = vadd.f32 %v4372_v38, %v2216_v25  ;;  %v4517_v4 = vpop.eup %2884  ;;  %v2196_v25 = vsel %vm2193_vm14, %v2195_v45, %v2191_v40  ;;  %v2225_v47 = vor.u32 1.1754944e-38, %v2224_v27  ;;  %vm4565_vm14 = vmor %vm2293_vm3, %vm2294_vm9 }
0x1243   :  { %v4477_v59 = vsel %vm1524_vm15, %v2506_v35, %v2527_v26  ;;  %v2002_v51 = vpop.xlane.xlu0 %2001  ;;  %v1577_v42 = vpop.xlane.xlu2 %1576  ;;  %v2207_v35 = vand.u32 2147483647, %v4264_v30  ;;  %v2206_v30 = vsel %vm4497_vm2, %v4358_v33, %v2202_v49  ;;  %v2306_v33 = vmul.f32 %v4396_v2, %v2305_v28 }
0x1244   :  { %v2681_v34 = vmul.f32 -1.442695, %v2002_v51  ;;  %2886 = vlog2.f32 %v1577_v42  ;;  %v2221_v9 = vsel %vm4513_vm10, %v4372_v38, %v2217_v32  ;;  %v2364_v38 = vmul.f32 %v4517_v4, %v4432_v55 }
0x1245   :  { %2888 = vpow2.f32 %v2680_v62  ;;  %v1583_v21 = vpop.xlane.xlu1 %1582  ;;  %vm2208_vm12 = vcmp.eq.f32.partialorder %v2207_v35, 8.507059e+37  ;;  %v2226_v62 = vsel %vm2223_vm13, %v2225_v47, %v2221_v9  ;;  %vm4535_vm4 = vcmp.eq.f32.partialorder %v2297_v31, 8.507059e+37 }
0x1246   :  { %2890 = vpow2.f32 %v2681_v34  ;;  %v2211_v12 = vsel %vm2208_vm12, %v2210_v41, %v2206_v30  ;;  %vm2309_vm1 = vweird.f32 %v4396_v2  ;;  %v2320_v37 = vsub.f32 1.0, %v2319_v43 }
0x1247   :  { %2892 = vlog2.f32 %v1583_v21  ;;  %v2501_v36 = vperm.slane %v2196_v25, %v4094_v5  ;;  %v2307_v42 = vadd.f32 %v4396_v2, %v2306_v33  ;;  %v2502_v14 = vperm.slane %v2211_v12, %v4094_v5  ;;  %vm4576_vm13 = vmor %vm2308_vm11, %vm2309_vm1 }
0x1248   :  { %2894 = vrcp.f32 %v4503_v16  ;;  %vm4546_vm8 = vcmp.eq.f32.partialorder %v2357_v15, 8.507059e+37  ;;  %vm4887_vm2 = vcmask 1043459   ;;  %v2503_v27 = vperm.slane %v2226_v62, %v4094_v5 }
0x1249   :  { %v2522_v35 = vsel %vm4887_vm2, %v2499_v57, %v4364_v50  ;;  %v2314_v22 = vand.u32 2147483648, %v4316_v23  ;;  %vm4888_vm5 = vcmask 1044484   ;;  %v2365_v60 = vsub.f32 1.0, %v2364_v38 }
0x124a   :  { %v2887_v7 = vpop.eup %2886  ;;  %v2321_v50 = vmul.f32 %v4448_v56, %v2320_v37  ;;  %vm2544_vm10 = vcmask 130112   ;;  %vm4891_vm12 = vcmask 1045509   ;;  %vm4582_vm9 = vcmp.eq.f32.partialorder %v2312_v3, 8.507059e+37 }
0x124b   :  { %v2889_v48 = vpop.eup %2888  ;;  %v1585_v8 = vmul.f32 0.6931472, %v2887_v7  ;;  %v2005_v28 = vpop.xlane.xlu0 %2004  ;;  %vm4896_vm3 = vcmask 1046534   ;;  %v2311_v9 = vsel %vm4576_vm13, %v4396_v2, %v2307_v42  ;;  %vm4897_vm11 = vcmask 1047559  }
0x124c   :  { %v1987_v26 = vpop.xlane.xlu2 %1986  ;;  %v2891_v24 = vpop.eup %2890  ;;  %v2682_v51 = vmul.f32 -1.442695, %v2005_v28  ;;  %v4553_v21 = vadd.f32 1.0, %v2889_v48  ;;  %v2366_v3 = vmul.f32 %v4517_v4, %v2365_v60  ;;  %v2315_v25 = vor.u32 1.1754944e-38, %v2314_v22 }
0x124d   :  { %v1590_v32 = vadd.f32 %v1585_v8, %v4131_v0  ;;  %v2676_v34 = vmul.f32 -1.442695, %v1987_v26  ;;  %v2893_v40 = vpop.eup %2892  ;;  %v2523_v0 = vsel %vm4888_vm5, %v2500_v61, %v2522_v35  ;;  %v4557_v43 = vadd.f32 1.0, %v2891_v24 }
0x124e   :  { %2896 = vpow2.f32 %v2682_v51  ;;  %v4559_v44 = vpop.eup %2894  ;;  %v2524_v30 = vsel %vm4891_vm12, %v2501_v36, %v2523_v0  ;;  %v1589_v41 = vmul.f32 0.6931472, %v2893_v40  ;;  %v2322_v47 = vadd.f32 %v4448_v56, %v2321_v50 }
0x124f   :  { %v1593_v45 = vsub.f32 %v4072_v39, %v1590_v32  ;;  %v2525_v19 = vsel %vm4896_vm3, %v2502_v14, %v2524_v30  ;;  %2898 = vpow2.f32 %v2676_v34  ;;  %v2296_v39 = vsel %vm4565_vm14, %v4270_v53, %v4404_v13 }
0x1250   :  { %2900 = vrcp.f32 %v4553_v21  ;;  %v2526_v23 = vsel %vm4897_vm11, %v2503_v27, %v2525_v19  ;;  %v2379_v33 = vmul.f32 %v4559_v44, %v4503_v16  ;;  %v1592_v53 = vadd.f32 %v1589_v41, %v4135_v29 }
0x1251   :  { %2468 = vst.msk [vmem:[%s4839_s18] sm:$0xff] %vm1556_vm7, %v1593_v45  ;;  %2902 = vrcp.f32 %v4557_v43  ;;  %vm2324_vm1 = vweird.f32 %v4448_v56  ;;  %v2301_v57 = vsel %vm4535_vm4, %v4377_v20, %v2296_v39  ;;  %v2329_v12 = vand.u32 2147483648, %v4392_v10 }
0x1252   :  { %2545 = vst.msk [vmem:[%s4839_s18] sm:$0xff] %vm2544_vm10, %v2526_v23  ;;  %v1595_v48 = vsub.f32 %v4077_v54, %v1592_v53  ;;  %v2316_v29 = vsel %vm4582_vm9, %v2315_v25, %v2311_v9  ;;  %vm2323_vm2 = vweird.f32 %v4392_v10  ;;  %v2327_v62 = vand.u32 2147483647, %v4392_v10 }
0x1253   :  { %v2008_v2 = vpop.xlane.xlu0 %2007  ;;  %vm4622_vm5 = vmor %vm2323_vm2, %vm2324_vm1  ;;  %v2367_v20 = vadd.f32 %v4517_v4, %v2366_v3  ;;  %vm2369_vm4 = vweird.f32 %v4517_v4  ;;  %v2380_v54 = vsub.f32 1.0, %v2379_v33  ;;  %v2372_v26 = vand.u32 2147483647, %v4432_v55 }
0x1254   :  { %v2897_v13 = vpop.eup %2896  ;;  %v2683_v7 = vmul.f32 -1.442695, %v2008_v2  ;;  %2470 = vst.msk [vmem:[%s4839_s18 + $0x10] sm:$0xff] %vm1556_vm7, %v1595_v48  ;;  %v2326_v10 = vsel %vm4622_vm5, %v4448_v56, %v2322_v47  ;;  %v2374_v24 = vand.u32 2147483648, %v4432_v55  ;;  %v4652_v36 = vsel %vm4546_vm8, %v4347_v58, %v2356_v18 }
0x1255   :  { %v4616_v61 = vadd.f32 1.0, %v2897_v13  ;;  %v2899_v38 = vpop.eup %2898  ;;  %v2508_v56 = vperm.slane %v2301_v57, %v4094_v5  ;;  %v2330_v51 = vor.u32 1.1754944e-38, %v2329_v12  ;;  %vm2368_vm7 = vweird.f32 %v4432_v55 }
0x1256   :  { %2904 = vpow2.f32 %v2683_v7  ;;  %v4633_v28 = vpop.eup %2900  ;;  %v4640_v49 = vadd.f32 1.0, %v2899_v38  ;;  %v2509_v42 = vperm.slane %v2316_v29, %v4094_v5  ;;  %vm2328_vm14 = vcmp.eq.f32.partialorder %v2327_v62, 8.507059e+37  ;;  %vm4664_vm6 = vmor %vm2368_vm7, %vm2369_vm4 }
0x1257   :  { %2906 = vrcp.f32 %v4616_v61  ;;  %v4642_v37 = vpop.eup %2902  ;;  %vm4900_vm12 = vcmask 1043459   ;;  %v2331_v1 = vsel %vm2328_vm14, %v2330_v51, %v2326_v10  ;;  %v2371_v58 = vsel %vm4664_vm6, %v4517_v4, %v2367_v20 }
0x1258   :  { %v2529_v52 = vsel %vm4900_vm12, %v2507_v63, %v4477_v59  ;;  %2908 = vrcp.f32 %v4640_v49  ;;  %v2381_v18 = vmul.f32 %v4559_v44, %v2380_v54  ;;  %v2394_v6 = vmul.f32 %v4633_v28, %v4553_v21 }
0x1259   :  { %vm2373_vm8 = vcmp.eq.f32.partialorder %v2372_v26, 8.507059e+37  ;;  %v2375_v59 = vor.u32 1.1754944e-38, %v2374_v24  ;;  %v2409_v14 = vmul.f32 %v4642_v37, %v4557_v43  ;;  %v2387_v40 = vand.u32 2147483647, %v4503_v16 }
0x125a   :  { %v2389_v31 = vand.u32 2147483648, %v4503_v16  ;;  %vm4903_vm13 = vcmask 1044484   ;;  %vm2384_vm9 = vweird.f32 %v4559_v44  ;;  %v2382_v0 = vadd.f32 %v4559_v44, %v2381_v18 }
0x125b   :  { %v2011_v55 = vpop.xlane.xlu0 %2010  ;;  %v2530_v4 = vsel %vm4903_vm13, %v2508_v56, %v2529_v52  ;;  %v4684_v27 = vsel %vm2373_vm8, %v2375_v59, %v2371_v58  ;;  %v2395_v60 = vsub.f32 1.0, %v2394_v6  ;;  %v2404_v15 = vand.u32 2147483648, %v4553_v21 }
0x125c   :  { %v2905_v63 = vpop.eup %2904  ;;  %v2684_v32 = vmul.f32 -1.442695, %v2011_v55  ;;  %v2512_v45 = vperm.slane %v4652_v36, %v4094_v5  ;;  %v2510_v30 = vperm.slane %v2331_v1, %v4094_v5  ;;  %vm2383_vm3 = vweird.f32 %v4503_v16 }
0x125d   :  { %v4677_v34 = vpop.eup %2906  ;;  %v4682_v35 = vadd.f32 1.0, %v2905_v63  ;;  %v2410_v46 = vsub.f32 1.0, %v2409_v14  ;;  %vm4696_vm11 = vcmp.eq.f32.partialorder %v2387_v40, 8.507059e+37  ;;  %v2402_v19 = vand.u32 2147483647, %v4553_v21  ;;  %vm4707_vm2 = vmor %vm2383_vm3, %vm2384_vm9 }
0x125e   :  { %v2424_v22 = vmul.f32 %v4677_v34, %v4616_v61  ;;  %2910 = vpow2.f32 %v2684_v32  ;;  %v2909_v50 = vpop.eup %2908  ;;  %vm4906_vm1 = vcmask 1045509   ;;  %v2513_v9 = vperm.slane %v4684_v27, %v4094_v5 }
0x125f   :  { %2912 = vrcp.f32 %v4682_v35  ;;  %v2334_v41 = vmul.f32 %v2909_v50, %v4640_v49  ;;  %v2531_v39 = vsel %vm4906_vm1, %v2509_v42, %v2530_v4  ;;  %v2390_v16 = vor.u32 1.1754944e-38, %v2389_v31 }
0x1260   :  { %vm2398_vm5 = vweird.f32 %v4553_v21  ;;  %v2425_v3 = vsub.f32 1.0, %v2424_v22  ;;  %v2386_v33 = vsel %vm4707_vm2, %v4559_v44, %v2382_v0  ;;  %v2396_v53 = vmul.f32 %v4633_v28, %v2395_v60 }
0x1261   :  { %v2405_v2 = vor.u32 1.1754944e-38, %v2404_v15  ;;  %v2335_v13 = vsub.f32 1.0, %v2334_v41  ;;  %vm2399_vm4 = vweird.f32 %v4633_v28  ;;  %v2411_v47 = vmul.f32 %v4642_v37, %v2410_v46 }
0x1262   :  { %v2344_v7 = vand.u32 2147483648, %v4640_v49  ;;  %vm4909_vm7 = vcmask 1046534   ;;  %vm4722_vm14 = vcmp.eq.f32.partialorder %v2402_v19, 8.507059e+37  ;;  %vm2339_vm12 = vweird.f32 %v2909_v50 }
0x1263   :  { %v2532_v57 = vsel %vm4909_vm7, %v2510_v30, %v2531_v39  ;;  %v2336_v44 = vmul.f32 %v2909_v50, %v2335_v13  ;;  %v2342_v29 = vand.u32 2147483647, %v4640_v49  ;;  %v4731_v38 = vsel %vm4696_vm11, %v2390_v16, %v2386_v33  ;;  %vm4748_vm11 = vmor %vm2398_vm5, %vm2399_vm4 }
0x1264   :  { %v2911_v25 = vpop.eup %2910  ;;  %vm2413_vm6 = vweird.f32 %v4557_v43  ;;  %v2426_v8 = vmul.f32 %v4677_v34, %v2425_v3  ;;  %v2397_v54 = vadd.f32 %v4633_v28, %v2396_v53  ;;  %vm2338_vm8 = vweird.f32 %v4640_v49 }
0x1265   :  { %v4720_v12 = vpop.eup %2912  ;;  %v4727_v62 = vadd.f32 1.0, %v2911_v25  ;;  %v2337_v10 = vadd.f32 %v2909_v50, %v2336_v44  ;;  %v2417_v26 = vand.u32 2147483647, %v4557_v43  ;;  %v2419_v24 = vand.u32 2147483648, %v4557_v43  ;;  %vm2340_vm13 = vmor %vm2338_vm8, %vm2339_vm12 }
0x1266   :  { %v2439_v20 = vmul.f32 %v4720_v12, %v4682_v35  ;;  %v2345_v56 = vor.u32 1.1754944e-38, %v2344_v7  ;;  %v2412_v42 = vadd.f32 %v4642_v37, %v2411_v47  ;;  %vm2414_vm9 = vweird.f32 %v4642_v37 }
0x1267   :  { %2914 = vrcp.f32 %v4727_v62  ;;  %v2341_v52 = vsel %vm2340_vm13, %v2909_v50, %v2337_v10  ;;  %vm2343_vm3 = vcmp.eq.f32.partialorder %v2342_v29, 8.507059e+37  ;;  %v2427_v17 = vadd.f32 %v4677_v34, %v2426_v8  ;;  %vm4763_vm5 = vmor %vm2413_vm6, %vm2414_vm9 }
0x1268   :  { %v2440_v51 = vsub.f32 1.0, %v2439_v20  ;;  %vm2429_vm1 = vweird.f32 %v4677_v34  ;;  %v2346_v1 = vsel %vm2343_vm3, %v2345_v56, %v2341_v52  ;;  %v2401_v18 = vsel %vm4748_vm11, %v4633_v28, %v2397_v54 }
0x1269   :  { %v2434_v6 = vand.u32 2147483648, %v4616_v61  ;;  %v2511_v55 = vperm.slane %v2346_v1, %v4094_v5  ;;  %vm2444_vm2 = vweird.f32 %v4720_v12  ;;  %vm2428_vm4 = vweird.f32 %v4616_v61 }
0x126a   :  { %v2441_v58 = vmul.f32 %v4720_v12, %v2440_v51  ;;  %v2432_v63 = vand.u32 2147483647, %v4616_v61  ;;  %v2449_v28 = vand.u32 2147483648, %v4682_v35  ;;  %v2416_v32 = vsel %vm4763_vm5, %v4642_v37, %v2412_v42  ;;  %vm4774_vm7 = vmor %vm2428_vm4, %vm2429_vm1 }
0x126b   :  { %vm4918_vm12 = vcmask 1047559   ;;  %vm2443_vm6 = vweird.f32 %v4682_v35  ;;  %v2447_v31 = vand.u32 2147483647, %v4682_v35  ;;  %v2406_v61 = vsel %vm4722_vm14, %v2405_v2, %v2401_v18 }
0x126c   :  { %v2442_v59 = vadd.f32 %v4720_v12, %v2441_v58  ;;  %v2533_v43 = vsel %vm4918_vm12, %v2511_v55, %v2532_v57  ;;  %v2420_v4 = vor.u32 1.1754944e-38, %v2419_v24  ;;  %v2431_v22 = vsel %vm4774_vm7, %v4677_v34, %v2427_v17  ;;  %vm2445_vm8 = vmor %vm2443_vm6, %vm2444_vm2 }
0x126d   :  { %v2915_v14 = vpop.eup %2914  ;;  %2546 = vst.msk [vmem:[%s4839_s18 + $0x8] sm:$0xff] %vm2544_vm10, %v2533_v43  ;;  %v2514_v35 = vperm.slane %v4731_v38, %v4094_v5  ;;  %vm2418_vm13 = vcmp.eq.f32.partialorder %v2417_v26, 8.507059e+37  ;;  %v2435_v0 = vor.u32 1.1754944e-38, %v2434_v6  ;;  %vm2433_vm14 = vcmp.eq.f32.partialorder %v2432_v63, 8.507059e+37 }
0x126e   :  { %v2454_v37 = vmul.f32 %v2915_v14, %v4727_v62  ;;  %v2446_v60 = vsel %vm2445_vm8, %v4720_v12, %v2442_v59  ;;  %v2421_v15 = vsel %vm2418_vm13, %v2420_v4, %v2416_v32  ;;  %v2450_v34 = vor.u32 1.1754944e-38, %v2449_v28 }
0x126f   :  { %v2515_v30 = vperm.slane %v2406_v61, %v4094_v5  ;;  %v2436_v46 = vsel %vm2433_vm14, %v2435_v0, %v2431_v22  ;;  %vm2448_vm9 = vcmp.eq.f32.partialorder %v2447_v31, 8.507059e+37  ;;  %v2464_v11 = vand.u32 2147483648, %v4727_v62 }
0x1270   :  { %v2455_v50 = vsub.f32 1.0, %v2454_v37  ;;  %v2451_v19 = vsel %vm2448_vm9, %v2450_v34, %v2446_v60  ;;  %vm2459_vm3 = vweird.f32 %v2915_v14  ;;  %v2462_v39 = vand.u32 2147483647, %v4727_v62 }
0x1271   :  { %v2516_v23 = vperm.slane %v2421_v15, %v4094_v5  ;;  %v2534_v16 = vsel %vm1522_vm0, %v2513_v9, %v2512_v45  ;;  %v2517_v3 = vperm.slane %v2436_v46, %v4094_v5  ;;  %vm2458_vm11 = vweird.f32 %v4727_v62 }
0x1272   :  { %v2456_v41 = vmul.f32 %v2915_v14, %v2455_v50  ;;  %v2535_v53 = vsel %vm1524_vm15, %v2514_v35, %v2534_v16  ;;  %v2518_v2 = vperm.slane %v2451_v19, %v4094_v5  ;;  %vm2460_vm1 = vmor %vm2458_vm11, %vm2459_vm3  ;;  %v2465_v13 = vor.u32 1.1754944e-38, %v2464_v11 }
0x1273   :  { %vm4919_vm2 = vcmask 1043459   ;;  %vm2463_vm5 = vcmp.eq.f32.partialorder %v2462_v39, 8.507059e+37  ;;  %vm4920_vm4 = vcmask 1044484   ;;  %vm4921_vm7 = vcmask 1045509  }
0x1274   :  { %v2457_v33 = vadd.f32 %v2915_v14, %v2456_v41  ;;  %v2536_v25 = vsel %vm4919_vm2, %v2515_v30, %v2535_v53  ;;  %vm4922_vm0 = vcmask 1046534  }
0x1275   :  { %v2537_v36 = vsel %vm4920_vm4, %v2516_v23, %v2536_v25 }
0x1276   :  { %v2461_v47 = vsel %vm2460_vm1, %v2915_v14, %v2457_v33  ;;  %v2538_v45 = vsel %vm4921_vm7, %v2517_v3, %v2537_v36 }
0x1277   :  { %v2466_v27 = vsel %vm2463_vm5, %v2465_v13, %v2461_v47  ;;  %v2539_v7 = vsel %vm4922_vm0, %v2518_v2, %v2538_v45 }
0x1278   :  { %v2519_v9 = vperm.slane %v2466_v27, %v4094_v5 }
0x127a   :  { %v2540_v57 = vsel %vm4918_vm12, %v2519_v9, %v2539_v7 }
0x127b   :  { %2547 = vst.msk [vmem:[%s4839_s18 + $0x10] sm:$0xff] %vm2544_vm10, %v2540_v57 }

</bundles_post_ra>
